<compile_context>
chip_gen: v6e
topology: v6e:2x2x1
jax: 0.10.0
libtpu: 0.0.40
codegen_flags: <defaults>
</compile_context>

<pallas_src>
import functools

import numpy as np
import jax
import jax.numpy as jnp
from jax.experimental import pallas as pl
from jax.experimental.pallas import tpu as pltpu


# ----------------------------------------------------------------------------
# Fused Pallas kernel: the entire RCAN body in one pallas_call.
# ----------------------------------------------------------------------------
def _rcan_kernel(x_ref, cw_ref, cb_ref, caw1_ref, cab1_ref, caw2_ref, cab2_ref,
                 out_ref, pad_ref, *, H, W, C, num_rg, num_rcab):
    WC = W * C

    # Zero the halo scratch once per image; only its interior is rewritten by
    # each conv, so the zero halo provides "same" padding for every layer.
    pad_ref[...] = jnp.zeros_like(pad_ref)

    def conv3x3(y, li, relu=False):
        # y: (H, W*C) lane-dense activation (f32).
        pad_ref[1:H + 1, 0:WC] = y                 # interior; halo stays zero
        xp = pad_ref[...]                          # (H+2, (W+2)*C)
        acc = jnp.zeros((H, WC), jnp.float32)
        for dy in range(3):                        # 3 banded MXU matmuls
            acc = acc + jnp.dot(xp[dy:dy + H, :], cw_ref[li, dy],
                                preferred_element_type=jnp.float32)
        acc = acc + cb_ref[li]                     # bias pre-tiled to (1, W*C)
        if relu:
            acc = jnp.maximum(acc, 0.0)
        return acc

    def channel_attention(y, ci):
        # Global average pool is folded into caw1 (host side), and the
        # channel->lane broadcast is folded into caw2/cab2, so everything
        # stays in the (H, W*C) layout with zero relayouts.
        col = jnp.sum(y, axis=0, keepdims=True)    # (1, W*C)
        h = jnp.dot(col, caw1_ref[ci],
                    preferred_element_type=jnp.float32) + cab1_ref[ci]
        h = jnp.maximum(h, 0.0)                    # (1, Mid)
        a = jnp.dot(h, caw2_ref[ci],
                    preferred_element_type=jnp.float32) + cab2_ref[ci]
        att = 1.0 / (1.0 + jnp.exp(-a))            # sigmoid, (1, W*C)
        return y * att

    x0 = x_ref[0].astype(jnp.float32)              # (H, W*C)
    y = x0
    li = 0   # conv layer index
    ci = 0   # channel-attention index
    for _ in range(num_rg):
        z = y
        for _ in range(num_rcab):
            a = conv3x3(z, li, relu=True); li += 1
            a = conv3x3(a, li); li += 1
            z = z + channel_attention(a, ci); ci += 1   # RCAB residual
        y = conv3x3(z, li) + y; li += 1                  # RG residual
    out = conv3x3(y, li) + x0                            # recons + global res.
    out_ref[0] = out.astype(out_ref.dtype)


# ----------------------------------------------------------------------------
# Host-side weight transforms (exact; just re-layout of the parameters).
# ----------------------------------------------------------------------------
def _band_weight(w_hwio, W):
    """(3,3,Cin,Cout) -> (3, (W+2)*Cin, W*Cout) block-banded matrices.

    Row layout of the padded activation is pad[w*Cin + ci] = x[w, ci] for
    w in [0, W); lanes >= W*Cin are the (always-zero) right halo; the left
    halo taps are simply dropped (they multiply zeros).
    """
    w = np.asarray(w_hwio, np.float32)
    _, _, ci_dim, co_dim = w.shape
    band = np.zeros((3, (W + 2) * ci_dim, W * co_dim), np.float32)
    for dx in range(3):
        for col in range(W):
            win = col + dx - 1
            if win < 0:
                continue                      # left zero-padding tap
            band[:, win * ci_dim:(win + 1) * ci_dim,
                 col * co_dim:(col + 1) * co_dim] = w[:, dx]
    return band


# ----------------------------------------------------------------------------
# RCAN forward: one fused pallas_call.
# ----------------------------------------------------------------------------
def rcan_forward(x, params):
    N, H, W, C = x.shape
    num_rg = len(params["rgs"])
    num_rcab = len(params["rgs"][0]["rcabs"])
    HW, WC, Wp2C = H * W, W * C, (W + 2) * C

    conv_w, conv_b = [], []
    ca_w1, ca_b1, ca_w2, ca_b2 = [], [], [], []

    def add_conv(w, b):
        conv_w.append(_band_weight(w, W))
        conv_b.append(np.tile(np.asarray(b, np.float32), W)[None, :])

    for rg_p in params["rgs"]:
        for p in rg_p["rcabs"]:
            add_conv(p["w1"], p["b1"])
            add_conv(p["w2"], p["b2"])
            w1 = np.asarray(p["ca_w1"], np.float32)          # (C, Mid)
            w2 = np.asarray(p["ca_w2"], np.float32)          # (Mid, C)
            ca_w1.append(np.tile(w1 / HW, (W, 1)))           # pool folded in
            ca_b1.append(np.asarray(p["ca_b1"], np.float32)[None, :])
            ca_w2.append(np.tile(w2, (1, W)))                # lane broadcast
            ca_b2.append(np.tile(np.asarray(p["ca_b2"], np.float32), W)[None, :])
        add_conv(rg_p["tail_w"], rg_p["tail_b"])
    add_conv(params["recons_w"], params["recons_b"])

    cw = jnp.asarray(np.stack(conv_w))        # (L, 3, (W+2)*C, W*C)
    cb = jnp.asarray(np.stack(conv_b))        # (L, 1, W*C)
    caw1 = jnp.asarray(np.stack(ca_w1))       # (nCA, W*C, Mid)
    cab1 = jnp.asarray(np.stack(ca_b1))       # (nCA, 1, Mid)
    caw2 = jnp.asarray(np.stack(ca_w2))       # (nCA, Mid, W*C)
    cab2 = jnp.asarray(np.stack(ca_b2))       # (nCA, 1, W*C)

    L = cw.shape[0]
    nCA = caw1.shape[0]
    Mid = caw1.shape[-1]

    x2 = x.reshape(N, H, WC)                  # lane-dense I/O view (free)

    kern = functools.partial(_rcan_kernel, H=H, W=W, C=C,
                             num_rg=num_rg, num_rcab=num_rcab)

    out = pl.pallas_call(
        kern,
        out_shape=jax.ShapeDtypeStruct((N, H, WC), x.dtype),
        grid=(N,),
        in_specs=[
            pl.BlockSpec((1, H, WC), lambda n: (n, 0, 0)),
            pl.BlockSpec((L, 3, Wp2C, WC), lambda n: (0, 0, 0, 0)),
            pl.BlockSpec((L, 1, WC), lambda n: (0, 0, 0)),
            pl.BlockSpec((nCA, WC, Mid), lambda n: (0, 0, 0)),
            pl.BlockSpec((nCA, 1, Mid), lambda n: (0, 0, 0)),
            pl.BlockSpec((nCA, Mid, WC), lambda n: (0, 0, 0)),
            pl.BlockSpec((nCA, 1, WC), lambda n: (0, 0, 0)),
        ],
        out_specs=pl.BlockSpec((1, H, WC), lambda n: (n, 0, 0)),
        scratch_shapes=[pltpu.VMEM((H + 2, Wp2C), jnp.float32)],
        compiler_params=pltpu.CompilerParams(
            dimension_semantics=("parallel",)),
    )(x2, cw, cb, caw1, cab1, caw2, cab2)

    return out.reshape(N, H, W, C)


# ----------------------------------------------------------------------------
# Pure-JAX reference (for correctness checking only)
# ----------------------------------------------------------------------------
def _conv3x3_ref(x, w, b):
    y = jax.lax.conv_general_dilated(
        x, w, window_strides=(1, 1), padding=((1, 1), (1, 1)),
        dimension_numbers=("NHWC", "HWIO", "NHWC"),
        precision=jax.lax.Precision.HIGHEST)
    return y + b


def _ca_ref(y, skip, w1, b1, w2, b2):
    pooled = jnp.mean(y, axis=(1, 2))                       # (N, C)
    h = jnp.maximum(pooled @ w1 + b1, 0.0)
    att = jax.nn.sigmoid(h @ w2 + b2)                       # (N, C)
    return skip + y * att[:, None, None, :]


def rcan_forward_ref(x, params):
    y = x
    for rg_p in params["rgs"]:
        z = y
        for p in rg_p["rcabs"]:
            a = jnp.maximum(_conv3x3_ref(z, p["w1"], p["b1"]), 0.0)
            a = _conv3x3_ref(a, p["w2"], p["b2"])
            z = _ca_ref(a, z, p["ca_w1"], p["ca_b1"], p["ca_w2"], p["ca_b2"])
        y = _conv3x3_ref(z, rg_p["tail_w"], rg_p["tail_b"]) + y
    return _conv3x3_ref(y, params["recons_w"], params["recons_b"]) + x


# ----------------------------------------------------------------------------
# Deterministic parameter init
# ----------------------------------------------------------------------------
def init_params(key, num_features, num_rg, num_rcab, reduction):
    mid = num_features // reduction
    scale = 0.05

    def nrm(k, shape):
        return scale * jax.random.normal(k, shape, dtype=jnp.float32)

    params = {"rgs": []}
    for g in range(num_rg):
        rg_p = {"rcabs": []}
        for r in range(num_rcab):
            k = jax.random.fold_in(jax.random.fold_in(key, g), r)
            ks = jax.random.split(k, 8)
            rg_p["rcabs"].append({
                "w1": nrm(ks[0], (3, 3, num_features, num_features)),
                "b1": nrm(ks[1], (num_features,)),
                "w2": nrm(ks[2], (3, 3, num_features, num_features)),
                "b2": nrm(ks[3], (num_features,)),
                "ca_w1": nrm(ks[4], (num_features, mid)),
                "ca_b1": nrm(ks[5], (mid,)),
                "ca_w2": nrm(ks[6], (mid, num_features)),
                "ca_b2": nrm(ks[7], (num_features,)),
            })
        kt = jax.random.fold_in(jax.random.fold_in(key, g), 10_000)
        kt1, kt2 = jax.random.split(kt)
        rg_p["tail_w"] = nrm(kt1, (3, 3, num_features, num_features))
        rg_p["tail_b"] = nrm(kt2, (num_features,))
        params["rgs"].append(rg_p)
    kr1, kr2 = jax.random.split(jax.random.fold_in(key, 99_999))
    params["recons_w"] = nrm(kr1, (3, 3, num_features, num_features))
    params["recons_b"] = nrm(kr2, (num_features,))
    return params


# ----------------------------------------------------------------------------
if __name__ == "__main__":
    # Small RCAN config: n_feats=8, n_resgroups=2, n_resblocks=2,
    # reduction = n_feats // 4 = 2  -> bottleneck channels = 4.
    N, C, H, W = 2, 8, 16, 16
    num_rg, num_rcab, reduction = 2, 2, C // 4

    key = jax.random.PRNGKey(0)
    kx, kp = jax.random.split(key)
    # input in NHWC layout (PyTorch module would take NCHW; same data)
    x = jax.random.normal(kx, (N, H, W, C), dtype=jnp.float32)
    params = init_params(kp, C, num_rg, num_rcab, reduction)

    out = rcan_forward(x, params)
    out = jax.block_until_ready(out)

    ref = jax.block_until_ready(rcan_forward_ref(x, params))
    assert out.shape == (N, H, W, C)
    assert jnp.allclose(out, ref, rtol=2e-3, atol=2e-3), (
        float(jnp.max(jnp.abs(out - ref))))

    print("KERNEL_OK")
</pallas_src>

<mosaic_0001>
module attributes {stable_mosaic.version = 11 : i64} {
  func.func @_rcan_kernel(%arg0: i32, %arg1: memref<1x16x128xf32, #tpu.memory_space<vmem>>, %arg2: memref<11x3x144x128xf32, #tpu.memory_space<vmem>>, %arg3: memref<11x1x128xf32, #tpu.memory_space<vmem>>, %arg4: memref<4x128x4xf32, #tpu.memory_space<vmem>>, %arg5: memref<4x1x4xf32, #tpu.memory_space<vmem>>, %arg6: memref<4x4x128xf32, #tpu.memory_space<vmem>>, %arg7: memref<4x1x128xf32, #tpu.memory_space<vmem>>, %arg8: memref<1x16x128xf32, #tpu.memory_space<vmem>>, %arg9: memref<18x144xf32, #tpu.memory_space<vmem>>) attributes {dimension_semantics = [#tpu.dimension_semantics<parallel>], iteration_bounds = array<i64: 2>, scalar_prefetch = 0 : i64, scratch_operands = 1 : i64, tpu.core_type = #tpu.core_type<tc>, window_params = [{transform_indices = @transform_0, window_bounds = array<i64: 1, 16, 128>}, {pipeline_mode = #tpu.pipeline_mode<synchronous>, transform_indices = @transform_1, window_bounds = array<i64: 11, 3, 144, 128>}, {pipeline_mode = #tpu.pipeline_mode<synchronous>, transform_indices = @transform_2, window_bounds = array<i64: 11, 1, 128>}, {pipeline_mode = #tpu.pipeline_mode<synchronous>, transform_indices = @transform_3, window_bounds = array<i64: 4, 128, 4>}, {pipeline_mode = #tpu.pipeline_mode<synchronous>, transform_indices = @transform_4, window_bounds = array<i64: 4, 1, 4>}, {pipeline_mode = #tpu.pipeline_mode<synchronous>, transform_indices = @transform_5, window_bounds = array<i64: 4, 4, 128>}, {pipeline_mode = #tpu.pipeline_mode<synchronous>, transform_indices = @transform_6, window_bounds = array<i64: 4, 1, 128>}, {transform_indices = @transform_7, window_bounds = array<i64: 1, 16, 128>}]} {
    %cst = arith.constant 0.000000e+00 : f32
    %0 = vector.broadcast %cst : f32 to vector<18x144xf32>
    %c0 = arith.constant 0 : index
    %c0_0 = arith.constant 0 : index
    %1 = vector.load %arg9[%c0, %c0_0] : memref<18x144xf32, #tpu.memory_space<vmem>>, vector<18x144xf32>
    tpu.vector_store %arg9[%c0, %c0_0], %0 {strides = array<i32>} : memref<18x144xf32, #tpu.memory_space<vmem>>, vector<18x144xf32>,
    %c0_1 = arith.constant 0 : index
    %c0_2 = arith.constant 0 : index
    %c0_3 = arith.constant 0 : index
    %2 = vector.load %arg1[%c0_1, %c0_2, %c0_3] : memref<1x16x128xf32, #tpu.memory_space<vmem>>, vector<1x16x128xf32>
    %3 = vector.shape_cast %2 : vector<1x16x128xf32> to vector<16x128xf32>
    %c1 = arith.constant 1 : index
    %c0_4 = arith.constant 0 : index
    %4 = vector.load %arg9[%c1, %c0_4] : memref<18x144xf32, #tpu.memory_space<vmem>>, vector<16x128xf32>
    tpu.vector_store %arg9[%c1, %c0_4], %3 {strides = array<i32>} : memref<18x144xf32, #tpu.memory_space<vmem>>, vector<16x128xf32>,
    %c0_5 = arith.constant 0 : index
    %c0_6 = arith.constant 0 : index
    %5 = vector.load %arg9[%c0_5, %c0_6] : memref<18x144xf32, #tpu.memory_space<vmem>>, vector<18x144xf32>
    %cst_7 = arith.constant 0.000000e+00 : f32
    %6 = vector.broadcast %cst_7 : f32 to vector<16x128xf32>
    %7 = vector.extract_strided_slice %5 {offsets = [0, 0], sizes = [16, 144], strides = [1, 1]} : vector<18x144xf32> to vector<16x144xf32>
    %c0_8 = arith.constant 0 : index
    %c0_9 = arith.constant 0 : index
    %c0_10 = arith.constant 0 : index
    %c0_11 = arith.constant 0 : index
    %8 = vector.load %arg2[%c0_8, %c0_9, %c0_10, %c0_11] : memref<11x3x144x128xf32, #tpu.memory_space<vmem>>, vector<1x1x144x128xf32>
    %9 = vector.shape_cast %8 : vector<1x1x144x128xf32> to vector<144x128xf32>
    %cst_12 = arith.constant dense<0.000000e+00> : vector<16x128xf32>
    %10 = tpu.matmul %7, %9, %cst_12 {dimension_numbers = #tpu.dot_dimension_numbers<[1], [0], [0], [1], [0, 0, 1, 1], [], []>} : vector<16x144xf32>, vector<144x128xf32>, vector<16x128xf32> -> vector<16x128xf32>
    %11 = arith.addf %6, %10 : vector<16x128xf32>
    %12 = vector.extract_strided_slice %5 {offsets = [1, 0], sizes = [16, 144], strides = [1, 1]} : vector<18x144xf32> to vector<16x144xf32>
    %c0_13 = arith.constant 0 : index
    %c1_14 = arith.constant 1 : index
    %c0_15 = arith.constant 0 : index
    %c0_16 = arith.constant 0 : index
    %13 = vector.load %arg2[%c0_13, %c1_14, %c0_15, %c0_16] : memref<11x3x144x128xf32, #tpu.memory_space<vmem>>, vector<1x1x144x128xf32>
    %14 = vector.shape_cast %13 : vector<1x1x144x128xf32> to vector<144x128xf32>
    %cst_17 = arith.constant dense<0.000000e+00> : vector<16x128xf32>
    %15 = tpu.matmul %12, %14, %cst_17 {dimension_numbers = #tpu.dot_dimension_numbers<[1], [0], [0], [1], [0, 0, 1, 1], [], []>} : vector<16x144xf32>, vector<144x128xf32>, vector<16x128xf32> -> vector<16x128xf32>
    %16 = arith.addf %11, %15 : vector<16x128xf32>
    %17 = vector.extract_strided_slice %5 {offsets = [2, 0], sizes = [16, 144], strides = [1, 1]} : vector<18x144xf32> to vector<16x144xf32>
    %c0_18 = arith.constant 0 : index
    %c2 = arith.constant 2 : index
    %c0_19 = arith.constant 0 : index
    %c0_20 = arith.constant 0 : index
    %18 = vector.load %arg2[%c0_18, %c2, %c0_19, %c0_20] : memref<11x3x144x128xf32, #tpu.memory_space<vmem>>, vector<1x1x144x128xf32>
    %19 = vector.shape_cast %18 : vector<1x1x144x128xf32> to vector<144x128xf32>
    %cst_21 = arith.constant dense<0.000000e+00> : vector<16x128xf32>
    %20 = tpu.matmul %17, %19, %cst_21 {dimension_numbers = #tpu.dot_dimension_numbers<[1], [0], [0], [1], [0, 0, 1, 1], [], []>} : vector<16x144xf32>, vector<144x128xf32>, vector<16x128xf32> -> vector<16x128xf32>
    %21 = arith.addf %16, %20 : vector<16x128xf32>
    %c0_22 = arith.constant 0 : index
    %c0_23 = arith.constant 0 : index
    %c0_24 = arith.constant 0 : index
    %22 = vector.load %arg3[%c0_22, %c0_23, %c0_24] : memref<11x1x128xf32, #tpu.memory_space<vmem>>, vector<1x1x128xf32>
    %23 = vector.shape_cast %22 : vector<1x1x128xf32> to vector<1x128xf32>
    %24 = vector.broadcast %23 : vector<1x128xf32> to vector<16x128xf32>
    %25 = arith.addf %21, %24 : vector<16x128xf32>
    %cst_25 = arith.constant 0.000000e+00 : f32
    %26 = vector.broadcast %cst_25 : f32 to vector<16x128xf32>
    %27 = arith.maximumf %25, %26 : vector<16x128xf32>
    %c1_26 = arith.constant 1 : index
    %c0_27 = arith.constant 0 : index
    %28 = vector.load %arg9[%c1_26, %c0_27] : memref<18x144xf32, #tpu.memory_space<vmem>>, vector<16x128xf32>
    tpu.vector_store %arg9[%c1_26, %c0_27], %27 {strides = array<i32>} : memref<18x144xf32, #tpu.memory_space<vmem>>, vector<16x128xf32>,
    %c0_28 = arith.constant 0 : index
    %c0_29 = arith.constant 0 : index
    %29 = vector.load %arg9[%c0_28, %c0_29] : memref<18x144xf32, #tpu.memory_space<vmem>>, vector<18x144xf32>
    %cst_30 = arith.constant 0.000000e+00 : f32
    %30 = vector.broadcast %cst_30 : f32 to vector<16x128xf32>
    %31 = vector.extract_strided_slice %29 {offsets = [0, 0], sizes = [16, 144], strides = [1, 1]} : vector<18x144xf32> to vector<16x144xf32>
    %c1_31 = arith.constant 1 : index
    %c0_32 = arith.constant 0 : index
    %c0_33 = arith.constant 0 : index
    %c0_34 = arith.constant 0 : index
    %32 = vector.load %arg2[%c1_31, %c0_32, %c0_33, %c0_34] : memref<11x3x144x128xf32, #tpu.memory_space<vmem>>, vector<1x1x144x128xf32>
    %33 = vector.shape_cast %32 : vector<1x1x144x128xf32> to vector<144x128xf32>
    %cst_35 = arith.constant dense<0.000000e+00> : vector<16x128xf32>
    %34 = tpu.matmul %31, %33, %cst_35 {dimension_numbers = #tpu.dot_dimension_numbers<[1], [0], [0], [1], [0, 0, 1, 1], [], []>} : vector<16x144xf32>, vector<144x128xf32>, vector<16x128xf32> -> vector<16x128xf32>
    %35 = arith.addf %30, %34 : vector<16x128xf32>
    %36 = vector.extract_strided_slice %29 {offsets = [1, 0], sizes = [16, 144], strides = [1, 1]} : vector<18x144xf32> to vector<16x144xf32>
    %c1_36 = arith.constant 1 : index
    %c1_37 = arith.constant 1 : index
    %c0_38 = arith.constant 0 : index
    %c0_39 = arith.constant 0 : index
    %37 = vector.load %arg2[%c1_36, %c1_37, %c0_38, %c0_39] : memref<11x3x144x128xf32, #tpu.memory_space<vmem>>, vector<1x1x144x128xf32>
    %38 = vector.shape_cast %37 : vector<1x1x144x128xf32> to vector<144x128xf32>
    %cst_40 = arith.constant dense<0.000000e+00> : vector<16x128xf32>
    %39 = tpu.matmul %36, %38, %cst_40 {dimension_numbers = #tpu.dot_dimension_numbers<[1], [0], [0], [1], [0, 0, 1, 1], [], []>} : vector<16x144xf32>, vector<144x128xf32>, vector<16x128xf32> -> vector<16x128xf32>
    %40 = arith.addf %35, %39 : vector<16x128xf32>
    %41 = vector.extract_strided_slice %29 {offsets = [2, 0], sizes = [16, 144], strides = [1, 1]} : vector<18x144xf32> to vector<16x144xf32>
    %c1_41 = arith.constant 1 : index
    %c2_42 = arith.constant 2 : index
    %c0_43 = arith.constant 0 : index
    %c0_44 = arith.constant 0 : index
    %42 = vector.load %arg2[%c1_41, %c2_42, %c0_43, %c0_44] : memref<11x3x144x128xf32, #tpu.memory_space<vmem>>, vector<1x1x144x128xf32>
    %43 = vector.shape_cast %42 : vector<1x1x144x128xf32> to vector<144x128xf32>
    %cst_45 = arith.constant dense<0.000000e+00> : vector<16x128xf32>
    %44 = tpu.matmul %41, %43, %cst_45 {dimension_numbers = #tpu.dot_dimension_numbers<[1], [0], [0], [1], [0, 0, 1, 1], [], []>} : vector<16x144xf32>, vector<144x128xf32>, vector<16x128xf32> -> vector<16x128xf32>
    %45 = arith.addf %40, %44 : vector<16x128xf32>
    %c1_46 = arith.constant 1 : index
    %c0_47 = arith.constant 0 : index
    %c0_48 = arith.constant 0 : index
    %46 = vector.load %arg3[%c1_46, %c0_47, %c0_48] : memref<11x1x128xf32, #tpu.memory_space<vmem>>, vector<1x1x128xf32>
    %47 = vector.shape_cast %46 : vector<1x1x128xf32> to vector<1x128xf32>
    %48 = vector.broadcast %47 : vector<1x128xf32> to vector<16x128xf32>
    %49 = arith.addf %45, %48 : vector<16x128xf32>
    %cst_49 = arith.constant dense<0.000000e+00> : vector<128xf32>
    %50 = vector.multi_reduction <add>, %49, %cst_49 [0] : vector<16x128xf32> to vector<128xf32>
    %51 = vector.shape_cast %50 : vector<128xf32> to vector<1x128xf32>
    %c0_50 = arith.constant 0 : index
    %c0_51 = arith.constant 0 : index
    %c0_52 = arith.constant 0 : index
    %52 = vector.load %arg4[%c0_50, %c0_51, %c0_52] : memref<4x128x4xf32, #tpu.memory_space<vmem>>, vector<1x128x4xf32>
    %53 = vector.shape_cast %52 : vector<1x128x4xf32> to vector<128x4xf32>
    %cst_53 = arith.constant dense<0.000000e+00> : vector<1x4xf32>
    %54 = tpu.matmul %51, %53, %cst_53 {dimension_numbers = #tpu.dot_dimension_numbers<[1], [0], [0], [1], [0, 0, 1, 1], [], []>} : vector<1x128xf32>, vector<128x4xf32>, vector<1x4xf32> -> vector<1x4xf32>
    %c0_54 = arith.constant 0 : index
    %c0_55 = arith.constant 0 : index
    %c0_56 = arith.constant 0 : index
    %55 = vector.load %arg5[%c0_54, %c0_55, %c0_56] : memref<4x1x4xf32, #tpu.memory_space<vmem>>, vector<1x1x4xf32>
    %56 = vector.shape_cast %55 : vector<1x1x4xf32> to vector<1x4xf32>
    %57 = arith.addf %54, %56 : vector<1x4xf32>
    %cst_57 = arith.constant 0.000000e+00 : f32
    %58 = vector.broadcast %cst_57 : f32 to vector<1x4xf32>
    %59 = arith.maximumf %57, %58 : vector<1x4xf32>
    %c0_58 = arith.constant 0 : index
    %c0_59 = arith.constant 0 : index
    %c0_60 = arith.constant 0 : index
    %60 = vector.load %arg6[%c0_58, %c0_59, %c0_60] : memref<4x4x128xf32, #tpu.memory_space<vmem>>, vector<1x4x128xf32>
    %61 = vector.shape_cast %60 : vector<1x4x128xf32> to vector<4x128xf32>
    %cst_61 = arith.constant dense<0.000000e+00> : vector<1x128xf32>
    %62 = tpu.matmul %59, %61, %cst_61 {dimension_numbers = #tpu.dot_dimension_numbers<[1], [0], [0], [1], [0, 0, 1, 1], [], []>} : vector<1x4xf32>, vector<4x128xf32>, vector<1x128xf32> -> vector<1x128xf32>
    %c0_62 = arith.constant 0 : index
    %c0_63 = arith.constant 0 : index
    %c0_64 = arith.constant 0 : index
    %63 = vector.load %arg7[%c0_62, %c0_63, %c0_64] : memref<4x1x128xf32, #tpu.memory_space<vmem>>, vector<1x1x128xf32>
    %64 = vector.shape_cast %63 : vector<1x1x128xf32> to vector<1x128xf32>
    %65 = arith.addf %62, %64 : vector<1x128xf32>
    %cst_65 = arith.constant 0.000000e+00 : f32
    %66 = vector.broadcast %cst_65 : f32 to vector<1x128xf32>
    %67 = arith.subf %66, %65 : vector<1x128xf32>
    %68 = math.exp %67 : vector<1x128xf32>
    %cst_66 = arith.constant 1.000000e+00 : f32
    %69 = vector.broadcast %cst_66 : f32 to vector<1x128xf32>
    %70 = arith.addf %69, %68 : vector<1x128xf32>
    %cst_67 = arith.constant 1.000000e+00 : f32
    %71 = vector.broadcast %cst_67 : f32 to vector<1x128xf32>
    %72 = arith.divf %71, %70 : vector<1x128xf32>
    %73 = vector.broadcast %72 : vector<1x128xf32> to vector<16x128xf32>
    %74 = arith.mulf %49, %73 : vector<16x128xf32>
    %75 = arith.addf %3, %74 : vector<16x128xf32>
    %c1_68 = arith.constant 1 : index
    %c0_69 = arith.constant 0 : index
    %76 = vector.load %arg9[%c1_68, %c0_69] : memref<18x144xf32, #tpu.memory_space<vmem>>, vector<16x128xf32>
    tpu.vector_store %arg9[%c1_68, %c0_69], %75 {strides = array<i32>} : memref<18x144xf32, #tpu.memory_space<vmem>>, vector<16x128xf32>,
    %c0_70 = arith.constant 0 : index
    %c0_71 = arith.constant 0 : index
    %77 = vector.load %arg9[%c0_70, %c0_71] : memref<18x144xf32, #tpu.memory_space<vmem>>, vector<18x144xf32>
    %cst_72 = arith.constant 0.000000e+00 : f32
    %78 = vector.broadcast %cst_72 : f32 to vector<16x128xf32>
    %79 = vector.extract_strided_slice %77 {offsets = [0, 0], sizes = [16, 144], strides = [1, 1]} : vector<18x144xf32> to vector<16x144xf32>
    %c2_73 = arith.constant 2 : index
    %c0_74 = arith.constant 0 : index
    %c0_75 = arith.constant 0 : index
    %c0_76 = arith.constant 0 : index
    %80 = vector.load %arg2[%c2_73, %c0_74, %c0_75, %c0_76] : memref<11x3x144x128xf32, #tpu.memory_space<vmem>>, vector<1x1x144x128xf32>
    %81 = vector.shape_cast %80 : vector<1x1x144x128xf32> to vector<144x128xf32>
    %cst_77 = arith.constant dense<0.000000e+00> : vector<16x128xf32>
    %82 = tpu.matmul %79, %81, %cst_77 {dimension_numbers = #tpu.dot_dimension_numbers<[1], [0], [0], [1], [0, 0, 1, 1], [], []>} : vector<16x144xf32>, vector<144x128xf32>, vector<16x128xf32> -> vector<16x128xf32>
    %83 = arith.addf %78, %82 : vector<16x128xf32>
    %84 = vector.extract_strided_slice %77 {offsets = [1, 0], sizes = [16, 144], strides = [1, 1]} : vector<18x144xf32> to vector<16x144xf32>
    %c2_78 = arith.constant 2 : index
    %c1_79 = arith.constant 1 : index
    %c0_80 = arith.constant 0 : index
    %c0_81 = arith.constant 0 : index
    %85 = vector.load %arg2[%c2_78, %c1_79, %c0_80, %c0_81] : memref<11x3x144x128xf32, #tpu.memory_space<vmem>>, vector<1x1x144x128xf32>
    %86 = vector.shape_cast %85 : vector<1x1x144x128xf32> to vector<144x128xf32>
    %cst_82 = arith.constant dense<0.000000e+00> : vector<16x128xf32>
    %87 = tpu.matmul %84, %86, %cst_82 {dimension_numbers = #tpu.dot_dimension_numbers<[1], [0], [0], [1], [0, 0, 1, 1], [], []>} : vector<16x144xf32>, vector<144x128xf32>, vector<16x128xf32> -> vector<16x128xf32>
    %88 = arith.addf %83, %87 : vector<16x128xf32>
    %89 = vector.extract_strided_slice %77 {offsets = [2, 0], sizes = [16, 144], strides = [1, 1]} : vector<18x144xf32> to vector<16x144xf32>
    %c2_83 = arith.constant 2 : index
    %c2_84 = arith.constant 2 : index
    %c0_85 = arith.constant 0 : index
    %c0_86 = arith.constant 0 : index
    %90 = vector.load %arg2[%c2_83, %c2_84, %c0_85, %c0_86] : memref<11x3x144x128xf32, #tpu.memory_space<vmem>>, vector<1x1x144x128xf32>
    %91 = vector.shape_cast %90 : vector<1x1x144x128xf32> to vector<144x128xf32>
    %cst_87 = arith.constant dense<0.000000e+00> : vector<16x128xf32>
    %92 = tpu.matmul %89, %91, %cst_87 {dimension_numbers = #tpu.dot_dimension_numbers<[1], [0], [0], [1], [0, 0, 1, 1], [], []>} : vector<16x144xf32>, vector<144x128xf32>, vector<16x128xf32> -> vector<16x128xf32>
    %93 = arith.addf %88, %92 : vector<16x128xf32>
    %c2_88 = arith.constant 2 : index
    %c0_89 = arith.constant 0 : index
    %c0_90 = arith.constant 0 : index
    %94 = vector.load %arg3[%c2_88, %c0_89, %c0_90] : memref<11x1x128xf32, #tpu.memory_space<vmem>>, vector<1x1x128xf32>
    %95 = vector.shape_cast %94 : vector<1x1x128xf32> to vector<1x128xf32>
    %96 = vector.broadcast %95 : vector<1x128xf32> to vector<16x128xf32>
    %97 = arith.addf %93, %96 : vector<16x128xf32>
    %cst_91 = arith.constant 0.000000e+00 : f32
    %98 = vector.broadcast %cst_91 : f32 to vector<16x128xf32>
    %99 = arith.maximumf %97, %98 : vector<16x128xf32>
    %c1_92 = arith.constant 1 : index
    %c0_93 = arith.constant 0 : index
    %100 = vector.load %arg9[%c1_92, %c0_93] : memref<18x144xf32, #tpu.memory_space<vmem>>, vector<16x128xf32>
    tpu.vector_store %arg9[%c1_92, %c0_93], %99 {strides = array<i32>} : memref<18x144xf32, #tpu.memory_space<vmem>>, vector<16x128xf32>,
    %c0_94 = arith.constant 0 : index
    %c0_95 = arith.constant 0 : index
    %101 = vector.load %arg9[%c0_94, %c0_95] : memref<18x144xf32, #tpu.memory_space<vmem>>, vector<18x144xf32>
    %cst_96 = arith.constant 0.000000e+00 : f32
    %102 = vector.broadcast %cst_96 : f32 to vector<16x128xf32>
    %103 = vector.extract_strided_slice %101 {offsets = [0, 0], sizes = [16, 144], strides = [1, 1]} : vector<18x144xf32> to vector<16x144xf32>
    %c3 = arith.constant 3 : index
    %c0_97 = arith.constant 0 : index
    %c0_98 = arith.constant 0 : index
    %c0_99 = arith.constant 0 : index
    %104 = vector.load %arg2[%c3, %c0_97, %c0_98, %c0_99] : memref<11x3x144x128xf32, #tpu.memory_space<vmem>>, vector<1x1x144x128xf32>
    %105 = vector.shape_cast %104 : vector<1x1x144x128xf32> to vector<144x128xf32>
    %cst_100 = arith.constant dense<0.000000e+00> : vector<16x128xf32>
    %106 = tpu.matmul %103, %105, %cst_100 {dimension_numbers = #tpu.dot_dimension_numbers<[1], [0], [0], [1], [0, 0, 1, 1], [], []>} : vector<16x144xf32>, vector<144x128xf32>, vector<16x128xf32> -> vector<16x128xf32>
    %107 = arith.addf %102, %106 : vector<16x128xf32>
    %108 = vector.extract_strided_slice %101 {offsets = [1, 0], sizes = [16, 144], strides = [1, 1]} : vector<18x144xf32> to vector<16x144xf32>
    %c3_101 = arith.constant 3 : index
    %c1_102 = arith.constant 1 : index
    %c0_103 = arith.constant 0 : index
    %c0_104 = arith.constant 0 : index
    %109 = vector.load %arg2[%c3_101, %c1_102, %c0_103, %c0_104] : memref<11x3x144x128xf32, #tpu.memory_space<vmem>>, vector<1x1x144x128xf32>
    %110 = vector.shape_cast %109 : vector<1x1x144x128xf32> to vector<144x128xf32>
    %cst_105 = arith.constant dense<0.000000e+00> : vector<16x128xf32>
    %111 = tpu.matmul %108, %110, %cst_105 {dimension_numbers = #tpu.dot_dimension_numbers<[1], [0], [0], [1], [0, 0, 1, 1], [], []>} : vector<16x144xf32>, vector<144x128xf32>, vector<16x128xf32> -> vector<16x128xf32>
    %112 = arith.addf %107, %111 : vector<16x128xf32>
    %113 = vector.extract_strided_slice %101 {offsets = [2, 0], sizes = [16, 144], strides = [1, 1]} : vector<18x144xf32> to vector<16x144xf32>
    %c3_106 = arith.constant 3 : index
    %c2_107 = arith.constant 2 : index
    %c0_108 = arith.constant 0 : index
    %c0_109 = arith.constant 0 : index
    %114 = vector.load %arg2[%c3_106, %c2_107, %c0_108, %c0_109] : memref<11x3x144x128xf32, #tpu.memory_space<vmem>>, vector<1x1x144x128xf32>
    %115 = vector.shape_cast %114 : vector<1x1x144x128xf32> to vector<144x128xf32>
    %cst_110 = arith.constant dense<0.000000e+00> : vector<16x128xf32>
    %116 = tpu.matmul %113, %115, %cst_110 {dimension_numbers = #tpu.dot_dimension_numbers<[1], [0], [0], [1], [0, 0, 1, 1], [], []>} : vector<16x144xf32>, vector<144x128xf32>, vector<16x128xf32> -> vector<16x128xf32>
    %117 = arith.addf %112, %116 : vector<16x128xf32>
    %c3_111 = arith.constant 3 : index
    %c0_112 = arith.constant 0 : index
    %c0_113 = arith.constant 0 : index
    %118 = vector.load %arg3[%c3_111, %c0_112, %c0_113] : memref<11x1x128xf32, #tpu.memory_space<vmem>>, vector<1x1x128xf32>
    %119 = vector.shape_cast %118 : vector<1x1x128xf32> to vector<1x128xf32>
    %120 = vector.broadcast %119 : vector<1x128xf32> to vector<16x128xf32>
    %121 = arith.addf %117, %120 : vector<16x128xf32>
    %cst_114 = arith.constant dense<0.000000e+00> : vector<128xf32>
    %122 = vector.multi_reduction <add>, %121, %cst_114 [0] : vector<16x128xf32> to vector<128xf32>
    %123 = vector.shape_cast %122 : vector<128xf32> to vector<1x128xf32>
    %c1_115 = arith.constant 1 : index
    %c0_116 = arith.constant 0 : index
    %c0_117 = arith.constant 0 : index
    %124 = vector.load %arg4[%c1_115, %c0_116, %c0_117] : memref<4x128x4xf32, #tpu.memory_space<vmem>>, vector<1x128x4xf32>
    %125 = vector.shape_cast %124 : vector<1x128x4xf32> to vector<128x4xf32>
    %cst_118 = arith.constant dense<0.000000e+00> : vector<1x4xf32>
    %126 = tpu.matmul %123, %125, %cst_118 {dimension_numbers = #tpu.dot_dimension_numbers<[1], [0], [0], [1], [0, 0, 1, 1], [], []>} : vector<1x128xf32>, vector<128x4xf32>, vector<1x4xf32> -> vector<1x4xf32>
    %c1_119 = arith.constant 1 : index
    %c0_120 = arith.constant 0 : index
    %c0_121 = arith.constant 0 : index
    %127 = vector.load %arg5[%c1_119, %c0_120, %c0_121] : memref<4x1x4xf32, #tpu.memory_space<vmem>>, vector<1x1x4xf32>
    %128 = vector.shape_cast %127 : vector<1x1x4xf32> to vector<1x4xf32>
    %129 = arith.addf %126, %128 : vector<1x4xf32>
    %cst_122 = arith.constant 0.000000e+00 : f32
    %130 = vector.broadcast %cst_122 : f32 to vector<1x4xf32>
    %131 = arith.maximumf %129, %130 : vector<1x4xf32>
    %c1_123 = arith.constant 1 : index
    %c0_124 = arith.constant 0 : index
    %c0_125 = arith.constant 0 : index
    %132 = vector.load %arg6[%c1_123, %c0_124, %c0_125] : memref<4x4x128xf32, #tpu.memory_space<vmem>>, vector<1x4x128xf32>
    %133 = vector.shape_cast %132 : vector<1x4x128xf32> to vector<4x128xf32>
    %cst_126 = arith.constant dense<0.000000e+00> : vector<1x128xf32>
    %134 = tpu.matmul %131, %133, %cst_126 {dimension_numbers = #tpu.dot_dimension_numbers<[1], [0], [0], [1], [0, 0, 1, 1], [], []>} : vector<1x4xf32>, vector<4x128xf32>, vector<1x128xf32> -> vector<1x128xf32>
    %c1_127 = arith.constant 1 : index
    %c0_128 = arith.constant 0 : index
    %c0_129 = arith.constant 0 : index
    %135 = vector.load %arg7[%c1_127, %c0_128, %c0_129] : memref<4x1x128xf32, #tpu.memory_space<vmem>>, vector<1x1x128xf32>
    %136 = vector.shape_cast %135 : vector<1x1x128xf32> to vector<1x128xf32>
    %137 = arith.addf %134, %136 : vector<1x128xf32>
    %cst_130 = arith.constant 0.000000e+00 : f32
    %138 = vector.broadcast %cst_130 : f32 to vector<1x128xf32>
    %139 = arith.subf %138, %137 : vector<1x128xf32>
    %140 = math.exp %139 : vector<1x128xf32>
    %cst_131 = arith.constant 1.000000e+00 : f32
    %141 = vector.broadcast %cst_131 : f32 to vector<1x128xf32>
    %142 = arith.addf %141, %140 : vector<1x128xf32>
    %cst_132 = arith.constant 1.000000e+00 : f32
    %143 = vector.broadcast %cst_132 : f32 to vector<1x128xf32>
    %144 = arith.divf %143, %142 : vector<1x128xf32>
    %145 = vector.broadcast %144 : vector<1x128xf32> to vector<16x128xf32>
    %146 = arith.mulf %121, %145 : vector<16x128xf32>
    %147 = arith.addf %75, %146 : vector<16x128xf32>
    %c1_133 = arith.constant 1 : index
    %c0_134 = arith.constant 0 : index
    %148 = vector.load %arg9[%c1_133, %c0_134] : memref<18x144xf32, #tpu.memory_space<vmem>>, vector<16x128xf32>
    tpu.vector_store %arg9[%c1_133, %c0_134], %147 {strides = array<i32>} : memref<18x144xf32, #tpu.memory_space<vmem>>, vector<16x128xf32>,
    %c0_135 = arith.constant 0 : index
    %c0_136 = arith.constant 0 : index
    %149 = vector.load %arg9[%c0_135, %c0_136] : memref<18x144xf32, #tpu.memory_space<vmem>>, vector<18x144xf32>
    %cst_137 = arith.constant 0.000000e+00 : f32
    %150 = vector.broadcast %cst_137 : f32 to vector<16x128xf32>
    %151 = vector.extract_strided_slice %149 {offsets = [0, 0], sizes = [16, 144], strides = [1, 1]} : vector<18x144xf32> to vector<16x144xf32>
    %c4 = arith.constant 4 : index
    %c0_138 = arith.constant 0 : index
    %c0_139 = arith.constant 0 : index
    %c0_140 = arith.constant 0 : index
    %152 = vector.load %arg2[%c4, %c0_138, %c0_139, %c0_140] : memref<11x3x144x128xf32, #tpu.memory_space<vmem>>, vector<1x1x144x128xf32>
    %153 = vector.shape_cast %152 : vector<1x1x144x128xf32> to vector<144x128xf32>
    %cst_141 = arith.constant dense<0.000000e+00> : vector<16x128xf32>
    %154 = tpu.matmul %151, %153, %cst_141 {dimension_numbers = #tpu.dot_dimension_numbers<[1], [0], [0], [1], [0, 0, 1, 1], [], []>} : vector<16x144xf32>, vector<144x128xf32>, vector<16x128xf32> -> vector<16x128xf32>
    %155 = arith.addf %150, %154 : vector<16x128xf32>
    %156 = vector.extract_strided_slice %149 {offsets = [1, 0], sizes = [16, 144], strides = [1, 1]} : vector<18x144xf32> to vector<16x144xf32>
    %c4_142 = arith.constant 4 : index
    %c1_143 = arith.constant 1 : index
    %c0_144 = arith.constant 0 : index
    %c0_145 = arith.constant 0 : index
    %157 = vector.load %arg2[%c4_142, %c1_143, %c0_144, %c0_145] : memref<11x3x144x128xf32, #tpu.memory_space<vmem>>, vector<1x1x144x128xf32>
    %158 = vector.shape_cast %157 : vector<1x1x144x128xf32> to vector<144x128xf32>
    %cst_146 = arith.constant dense<0.000000e+00> : vector<16x128xf32>
    %159 = tpu.matmul %156, %158, %cst_146 {dimension_numbers = #tpu.dot_dimension_numbers<[1], [0], [0], [1], [0, 0, 1, 1], [], []>} : vector<16x144xf32>, vector<144x128xf32>, vector<16x128xf32> -> vector<16x128xf32>
    %160 = arith.addf %155, %159 : vector<16x128xf32>
    %161 = vector.extract_strided_slice %149 {offsets = [2, 0], sizes = [16, 144], strides = [1, 1]} : vector<18x144xf32> to vector<16x144xf32>
    %c4_147 = arith.constant 4 : index
    %c2_148 = arith.constant 2 : index
    %c0_149 = arith.constant 0 : index
    %c0_150 = arith.constant 0 : index
    %162 = vector.load %arg2[%c4_147, %c2_148, %c0_149, %c0_150] : memref<11x3x144x128xf32, #tpu.memory_space<vmem>>, vector<1x1x144x128xf32>
    %163 = vector.shape_cast %162 : vector<1x1x144x128xf32> to vector<144x128xf32>
    %cst_151 = arith.constant dense<0.000000e+00> : vector<16x128xf32>
    %164 = tpu.matmul %161, %163, %cst_151 {dimension_numbers = #tpu.dot_dimension_numbers<[1], [0], [0], [1], [0, 0, 1, 1], [], []>} : vector<16x144xf32>, vector<144x128xf32>, vector<16x128xf32> -> vector<16x128xf32>
    %165 = arith.addf %160, %164 : vector<16x128xf32>
    %c4_152 = arith.constant 4 : index
    %c0_153 = arith.constant 0 : index
    %c0_154 = arith.constant 0 : index
    %166 = vector.load %arg3[%c4_152, %c0_153, %c0_154] : memref<11x1x128xf32, #tpu.memory_space<vmem>>, vector<1x1x128xf32>
    %167 = vector.shape_cast %166 : vector<1x1x128xf32> to vector<1x128xf32>
    %168 = vector.broadcast %167 : vector<1x128xf32> to vector<16x128xf32>
    %169 = arith.addf %165, %168 : vector<16x128xf32>
    %170 = arith.addf %169, %3 : vector<16x128xf32>
    %c1_155 = arith.constant 1 : index
    %c0_156 = arith.constant 0 : index
    %171 = vector.load %arg9[%c1_155, %c0_156] : memref<18x144xf32, #tpu.memory_space<vmem>>, vector<16x128xf32>
    tpu.vector_store %arg9[%c1_155, %c0_156], %170 {strides = array<i32>} : memref<18x144xf32, #tpu.memory_space<vmem>>, vector<16x128xf32>,
    %c0_157 = arith.constant 0 : index
    %c0_158 = arith.constant 0 : index
    %172 = vector.load %arg9[%c0_157, %c0_158] : memref<18x144xf32, #tpu.memory_space<vmem>>, vector<18x144xf32>
    %cst_159 = arith.constant 0.000000e+00 : f32
    %173 = vector.broadcast %cst_159 : f32 to vector<16x128xf32>
    %174 = vector.extract_strided_slice %172 {offsets = [0, 0], sizes = [16, 144], strides = [1, 1]} : vector<18x144xf32> to vector<16x144xf32>
    %c5 = arith.constant 5 : index
    %c0_160 = arith.constant 0 : index
    %c0_161 = arith.constant 0 : index
    %c0_162 = arith.constant 0 : index
    %175 = vector.load %arg2[%c5, %c0_160, %c0_161, %c0_162] : memref<11x3x144x128xf32, #tpu.memory_space<vmem>>, vector<1x1x144x128xf32>
    %176 = vector.shape_cast %175 : vector<1x1x144x128xf32> to vector<144x128xf32>
    %cst_163 = arith.constant dense<0.000000e+00> : vector<16x128xf32>
    %177 = tpu.matmul %174, %176, %cst_163 {dimension_numbers = #tpu.dot_dimension_numbers<[1], [0], [0], [1], [0, 0, 1, 1], [], []>} : vector<16x144xf32>, vector<144x128xf32>, vector<16x128xf32> -> vector<16x128xf32>
    %178 = arith.addf %173, %177 : vector<16x128xf32>
    %179 = vector.extract_strided_slice %172 {offsets = [1, 0], sizes = [16, 144], strides = [1, 1]} : vector<18x144xf32> to vector<16x144xf32>
    %c5_164 = arith.constant 5 : index
    %c1_165 = arith.constant 1 : index
    %c0_166 = arith.constant 0 : index
    %c0_167 = arith.constant 0 : index
    %180 = vector.load %arg2[%c5_164, %c1_165, %c0_166, %c0_167] : memref<11x3x144x128xf32, #tpu.memory_space<vmem>>, vector<1x1x144x128xf32>
    %181 = vector.shape_cast %180 : vector<1x1x144x128xf32> to vector<144x128xf32>
    %cst_168 = arith.constant dense<0.000000e+00> : vector<16x128xf32>
    %182 = tpu.matmul %179, %181, %cst_168 {dimension_numbers = #tpu.dot_dimension_numbers<[1], [0], [0], [1], [0, 0, 1, 1], [], []>} : vector<16x144xf32>, vector<144x128xf32>, vector<16x128xf32> -> vector<16x128xf32>
    %183 = arith.addf %178, %182 : vector<16x128xf32>
    %184 = vector.extract_strided_slice %172 {offsets = [2, 0], sizes = [16, 144], strides = [1, 1]} : vector<18x144xf32> to vector<16x144xf32>
    %c5_169 = arith.constant 5 : index
    %c2_170 = arith.constant 2 : index
    %c0_171 = arith.constant 0 : index
    %c0_172 = arith.constant 0 : index
    %185 = vector.load %arg2[%c5_169, %c2_170, %c0_171, %c0_172] : memref<11x3x144x128xf32, #tpu.memory_space<vmem>>, vector<1x1x144x128xf32>
    %186 = vector.shape_cast %185 : vector<1x1x144x128xf32> to vector<144x128xf32>
    %cst_173 = arith.constant dense<0.000000e+00> : vector<16x128xf32>
    %187 = tpu.matmul %184, %186, %cst_173 {dimension_numbers = #tpu.dot_dimension_numbers<[1], [0], [0], [1], [0, 0, 1, 1], [], []>} : vector<16x144xf32>, vector<144x128xf32>, vector<16x128xf32> -> vector<16x128xf32>
    %188 = arith.addf %183, %187 : vector<16x128xf32>
    %c5_174 = arith.constant 5 : index
    %c0_175 = arith.constant 0 : index
    %c0_176 = arith.constant 0 : index
    %189 = vector.load %arg3[%c5_174, %c0_175, %c0_176] : memref<11x1x128xf32, #tpu.memory_space<vmem>>, vector<1x1x128xf32>
    %190 = vector.shape_cast %189 : vector<1x1x128xf32> to vector<1x128xf32>
    %191 = vector.broadcast %190 : vector<1x128xf32> to vector<16x128xf32>
    %192 = arith.addf %188, %191 : vector<16x128xf32>
    %cst_177 = arith.constant 0.000000e+00 : f32
    %193 = vector.broadcast %cst_177 : f32 to vector<16x128xf32>
    %194 = arith.maximumf %192, %193 : vector<16x128xf32>
    %c1_178 = arith.constant 1 : index
    %c0_179 = arith.constant 0 : index
    %195 = vector.load %arg9[%c1_178, %c0_179] : memref<18x144xf32, #tpu.memory_space<vmem>>, vector<16x128xf32>
    tpu.vector_store %arg9[%c1_178, %c0_179], %194 {strides = array<i32>} : memref<18x144xf32, #tpu.memory_space<vmem>>, vector<16x128xf32>,
    %c0_180 = arith.constant 0 : index
    %c0_181 = arith.constant 0 : index
    %196 = vector.load %arg9[%c0_180, %c0_181] : memref<18x144xf32, #tpu.memory_space<vmem>>, vector<18x144xf32>
    %cst_182 = arith.constant 0.000000e+00 : f32
    %197 = vector.broadcast %cst_182 : f32 to vector<16x128xf32>
    %198 = vector.extract_strided_slice %196 {offsets = [0, 0], sizes = [16, 144], strides = [1, 1]} : vector<18x144xf32> to vector<16x144xf32>
    %c6 = arith.constant 6 : index
    %c0_183 = arith.constant 0 : index
    %c0_184 = arith.constant 0 : index
    %c0_185 = arith.constant 0 : index
    %199 = vector.load %arg2[%c6, %c0_183, %c0_184, %c0_185] : memref<11x3x144x128xf32, #tpu.memory_space<vmem>>, vector<1x1x144x128xf32>
    %200 = vector.shape_cast %199 : vector<1x1x144x128xf32> to vector<144x128xf32>
    %cst_186 = arith.constant dense<0.000000e+00> : vector<16x128xf32>
    %201 = tpu.matmul %198, %200, %cst_186 {dimension_numbers = #tpu.dot_dimension_numbers<[1], [0], [0], [1], [0, 0, 1, 1], [], []>} : vector<16x144xf32>, vector<144x128xf32>, vector<16x128xf32> -> vector<16x128xf32>
    %202 = arith.addf %197, %201 : vector<16x128xf32>
    %203 = vector.extract_strided_slice %196 {offsets = [1, 0], sizes = [16, 144], strides = [1, 1]} : vector<18x144xf32> to vector<16x144xf32>
    %c6_187 = arith.constant 6 : index
    %c1_188 = arith.constant 1 : index
    %c0_189 = arith.constant 0 : index
    %c0_190 = arith.constant 0 : index
    %204 = vector.load %arg2[%c6_187, %c1_188, %c0_189, %c0_190] : memref<11x3x144x128xf32, #tpu.memory_space<vmem>>, vector<1x1x144x128xf32>
    %205 = vector.shape_cast %204 : vector<1x1x144x128xf32> to vector<144x128xf32>
    %cst_191 = arith.constant dense<0.000000e+00> : vector<16x128xf32>
    %206 = tpu.matmul %203, %205, %cst_191 {dimension_numbers = #tpu.dot_dimension_numbers<[1], [0], [0], [1], [0, 0, 1, 1], [], []>} : vector<16x144xf32>, vector<144x128xf32>, vector<16x128xf32> -> vector<16x128xf32>
    %207 = arith.addf %202, %206 : vector<16x128xf32>
    %208 = vector.extract_strided_slice %196 {offsets = [2, 0], sizes = [16, 144], strides = [1, 1]} : vector<18x144xf32> to vector<16x144xf32>
    %c6_192 = arith.constant 6 : index
    %c2_193 = arith.constant 2 : index
    %c0_194 = arith.constant 0 : index
    %c0_195 = arith.constant 0 : index
    %209 = vector.load %arg2[%c6_192, %c2_193, %c0_194, %c0_195] : memref<11x3x144x128xf32, #tpu.memory_space<vmem>>, vector<1x1x144x128xf32>
    %210 = vector.shape_cast %209 : vector<1x1x144x128xf32> to vector<144x128xf32>
    %cst_196 = arith.constant dense<0.000000e+00> : vector<16x128xf32>
    %211 = tpu.matmul %208, %210, %cst_196 {dimension_numbers = #tpu.dot_dimension_numbers<[1], [0], [0], [1], [0, 0, 1, 1], [], []>} : vector<16x144xf32>, vector<144x128xf32>, vector<16x128xf32> -> vector<16x128xf32>
    %212 = arith.addf %207, %211 : vector<16x128xf32>
    %c6_197 = arith.constant 6 : index
    %c0_198 = arith.constant 0 : index
    %c0_199 = arith.constant 0 : index
    %213 = vector.load %arg3[%c6_197, %c0_198, %c0_199] : memref<11x1x128xf32, #tpu.memory_space<vmem>>, vector<1x1x128xf32>
    %214 = vector.shape_cast %213 : vector<1x1x128xf32> to vector<1x128xf32>
    %215 = vector.broadcast %214 : vector<1x128xf32> to vector<16x128xf32>
    %216 = arith.addf %212, %215 : vector<16x128xf32>
    %cst_200 = arith.constant dense<0.000000e+00> : vector<128xf32>
    %217 = vector.multi_reduction <add>, %216, %cst_200 [0] : vector<16x128xf32> to vector<128xf32>
    %218 = vector.shape_cast %217 : vector<128xf32> to vector<1x128xf32>
    %c2_201 = arith.constant 2 : index
    %c0_202 = arith.constant 0 : index
    %c0_203 = arith.constant 0 : index
    %219 = vector.load %arg4[%c2_201, %c0_202, %c0_203] : memref<4x128x4xf32, #tpu.memory_space<vmem>>, vector<1x128x4xf32>
    %220 = vector.shape_cast %219 : vector<1x128x4xf32> to vector<128x4xf32>
    %cst_204 = arith.constant dense<0.000000e+00> : vector<1x4xf32>
    %221 = tpu.matmul %218, %220, %cst_204 {dimension_numbers = #tpu.dot_dimension_numbers<[1], [0], [0], [1], [0, 0, 1, 1], [], []>} : vector<1x128xf32>, vector<128x4xf32>, vector<1x4xf32> -> vector<1x4xf32>
    %c2_205 = arith.constant 2 : index
    %c0_206 = arith.constant 0 : index
    %c0_207 = arith.constant 0 : index
    %222 = vector.load %arg5[%c2_205, %c0_206, %c0_207] : memref<4x1x4xf32, #tpu.memory_space<vmem>>, vector<1x1x4xf32>
    %223 = vector.shape_cast %222 : vector<1x1x4xf32> to vector<1x4xf32>
    %224 = arith.addf %221, %223 : vector<1x4xf32>
    %cst_208 = arith.constant 0.000000e+00 : f32
    %225 = vector.broadcast %cst_208 : f32 to vector<1x4xf32>
    %226 = arith.maximumf %224, %225 : vector<1x4xf32>
    %c2_209 = arith.constant 2 : index
    %c0_210 = arith.constant 0 : index
    %c0_211 = arith.constant 0 : index
    %227 = vector.load %arg6[%c2_209, %c0_210, %c0_211] : memref<4x4x128xf32, #tpu.memory_space<vmem>>, vector<1x4x128xf32>
    %228 = vector.shape_cast %227 : vector<1x4x128xf32> to vector<4x128xf32>
    %cst_212 = arith.constant dense<0.000000e+00> : vector<1x128xf32>
    %229 = tpu.matmul %226, %228, %cst_212 {dimension_numbers = #tpu.dot_dimension_numbers<[1], [0], [0], [1], [0, 0, 1, 1], [], []>} : vector<1x4xf32>, vector<4x128xf32>, vector<1x128xf32> -> vector<1x128xf32>
    %c2_213 = arith.constant 2 : index
    %c0_214 = arith.constant 0 : index
    %c0_215 = arith.constant 0 : index
    %230 = vector.load %arg7[%c2_213, %c0_214, %c0_215] : memref<4x1x128xf32, #tpu.memory_space<vmem>>, vector<1x1x128xf32>
    %231 = vector.shape_cast %230 : vector<1x1x128xf32> to vector<1x128xf32>
    %232 = arith.addf %229, %231 : vector<1x128xf32>
    %cst_216 = arith.constant 0.000000e+00 : f32
    %233 = vector.broadcast %cst_216 : f32 to vector<1x128xf32>
    %234 = arith.subf %233, %232 : vector<1x128xf32>
    %235 = math.exp %234 : vector<1x128xf32>
    %cst_217 = arith.constant 1.000000e+00 : f32
    %236 = vector.broadcast %cst_217 : f32 to vector<1x128xf32>
    %237 = arith.addf %236, %235 : vector<1x128xf32>
    %cst_218 = arith.constant 1.000000e+00 : f32
    %238 = vector.broadcast %cst_218 : f32 to vector<1x128xf32>
    %239 = arith.divf %238, %237 : vector<1x128xf32>
    %240 = vector.broadcast %239 : vector<1x128xf32> to vector<16x128xf32>
    %241 = arith.mulf %216, %240 : vector<16x128xf32>
    %242 = arith.addf %170, %241 : vector<16x128xf32>
    %c1_219 = arith.constant 1 : index
    %c0_220 = arith.constant 0 : index
    %243 = vector.load %arg9[%c1_219, %c0_220] : memref<18x144xf32, #tpu.memory_space<vmem>>, vector<16x128xf32>
    tpu.vector_store %arg9[%c1_219, %c0_220], %242 {strides = array<i32>} : memref<18x144xf32, #tpu.memory_space<vmem>>, vector<16x128xf32>,
    %c0_221 = arith.constant 0 : index
    %c0_222 = arith.constant 0 : index
    %244 = vector.load %arg9[%c0_221, %c0_222] : memref<18x144xf32, #tpu.memory_space<vmem>>, vector<18x144xf32>
    %cst_223 = arith.constant 0.000000e+00 : f32
    %245 = vector.broadcast %cst_223 : f32 to vector<16x128xf32>
    %246 = vector.extract_strided_slice %244 {offsets = [0, 0], sizes = [16, 144], strides = [1, 1]} : vector<18x144xf32> to vector<16x144xf32>
    %c7 = arith.constant 7 : index
    %c0_224 = arith.constant 0 : index
    %c0_225 = arith.constant 0 : index
    %c0_226 = arith.constant 0 : index
    %247 = vector.load %arg2[%c7, %c0_224, %c0_225, %c0_226] : memref<11x3x144x128xf32, #tpu.memory_space<vmem>>, vector<1x1x144x128xf32>
    %248 = vector.shape_cast %247 : vector<1x1x144x128xf32> to vector<144x128xf32>
    %cst_227 = arith.constant dense<0.000000e+00> : vector<16x128xf32>
    %249 = tpu.matmul %246, %248, %cst_227 {dimension_numbers = #tpu.dot_dimension_numbers<[1], [0], [0], [1], [0, 0, 1, 1], [], []>} : vector<16x144xf32>, vector<144x128xf32>, vector<16x128xf32> -> vector<16x128xf32>
    %250 = arith.addf %245, %249 : vector<16x128xf32>
    %251 = vector.extract_strided_slice %244 {offsets = [1, 0], sizes = [16, 144], strides = [1, 1]} : vector<18x144xf32> to vector<16x144xf32>
    %c7_228 = arith.constant 7 : index
    %c1_229 = arith.constant 1 : index
    %c0_230 = arith.constant 0 : index
    %c0_231 = arith.constant 0 : index
    %252 = vector.load %arg2[%c7_228, %c1_229, %c0_230, %c0_231] : memref<11x3x144x128xf32, #tpu.memory_space<vmem>>, vector<1x1x144x128xf32>
    %253 = vector.shape_cast %252 : vector<1x1x144x128xf32> to vector<144x128xf32>
    %cst_232 = arith.constant dense<0.000000e+00> : vector<16x128xf32>
    %254 = tpu.matmul %251, %253, %cst_232 {dimension_numbers = #tpu.dot_dimension_numbers<[1], [0], [0], [1], [0, 0, 1, 1], [], []>} : vector<16x144xf32>, vector<144x128xf32>, vector<16x128xf32> -> vector<16x128xf32>
    %255 = arith.addf %250, %254 : vector<16x128xf32>
    %256 = vector.extract_strided_slice %244 {offsets = [2, 0], sizes = [16, 144], strides = [1, 1]} : vector<18x144xf32> to vector<16x144xf32>
    %c7_233 = arith.constant 7 : index
    %c2_234 = arith.constant 2 : index
    %c0_235 = arith.constant 0 : index
    %c0_236 = arith.constant 0 : index
    %257 = vector.load %arg2[%c7_233, %c2_234, %c0_235, %c0_236] : memref<11x3x144x128xf32, #tpu.memory_space<vmem>>, vector<1x1x144x128xf32>
    %258 = vector.shape_cast %257 : vector<1x1x144x128xf32> to vector<144x128xf32>
    %cst_237 = arith.constant dense<0.000000e+00> : vector<16x128xf32>
    %259 = tpu.matmul %256, %258, %cst_237 {dimension_numbers = #tpu.dot_dimension_numbers<[1], [0], [0], [1], [0, 0, 1, 1], [], []>} : vector<16x144xf32>, vector<144x128xf32>, vector<16x128xf32> -> vector<16x128xf32>
    %260 = arith.addf %255, %259 : vector<16x128xf32>
    %c7_238 = arith.constant 7 : index
    %c0_239 = arith.constant 0 : index
    %c0_240 = arith.constant 0 : index
    %261 = vector.load %arg3[%c7_238, %c0_239, %c0_240] : memref<11x1x128xf32, #tpu.memory_space<vmem>>, vector<1x1x128xf32>
    %262 = vector.shape_cast %261 : vector<1x1x128xf32> to vector<1x128xf32>
    %263 = vector.broadcast %262 : vector<1x128xf32> to vector<16x128xf32>
    %264 = arith.addf %260, %263 : vector<16x128xf32>
    %cst_241 = arith.constant 0.000000e+00 : f32
    %265 = vector.broadcast %cst_241 : f32 to vector<16x128xf32>
    %266 = arith.maximumf %264, %265 : vector<16x128xf32>
    %c1_242 = arith.constant 1 : index
    %c0_243 = arith.constant 0 : index
    %267 = vector.load %arg9[%c1_242, %c0_243] : memref<18x144xf32, #tpu.memory_space<vmem>>, vector<16x128xf32>
    tpu.vector_store %arg9[%c1_242, %c0_243], %266 {strides = array<i32>} : memref<18x144xf32, #tpu.memory_space<vmem>>, vector<16x128xf32>,
    %c0_244 = arith.constant 0 : index
    %c0_245 = arith.constant 0 : index
    %268 = vector.load %arg9[%c0_244, %c0_245] : memref<18x144xf32, #tpu.memory_space<vmem>>, vector<18x144xf32>
    %cst_246 = arith.constant 0.000000e+00 : f32
    %269 = vector.broadcast %cst_246 : f32 to vector<16x128xf32>
    %270 = vector.extract_strided_slice %268 {offsets = [0, 0], sizes = [16, 144], strides = [1, 1]} : vector<18x144xf32> to vector<16x144xf32>
    %c8 = arith.constant 8 : index
    %c0_247 = arith.constant 0 : index
    %c0_248 = arith.constant 0 : index
    %c0_249 = arith.constant 0 : index
    %271 = vector.load %arg2[%c8, %c0_247, %c0_248, %c0_249] : memref<11x3x144x128xf32, #tpu.memory_space<vmem>>, vector<1x1x144x128xf32>
    %272 = vector.shape_cast %271 : vector<1x1x144x128xf32> to vector<144x128xf32>
    %cst_250 = arith.constant dense<0.000000e+00> : vector<16x128xf32>
    %273 = tpu.matmul %270, %272, %cst_250 {dimension_numbers = #tpu.dot_dimension_numbers<[1], [0], [0], [1], [0, 0, 1, 1], [], []>} : vector<16x144xf32>, vector<144x128xf32>, vector<16x128xf32> -> vector<16x128xf32>
    %274 = arith.addf %269, %273 : vector<16x128xf32>
    %275 = vector.extract_strided_slice %268 {offsets = [1, 0], sizes = [16, 144], strides = [1, 1]} : vector<18x144xf32> to vector<16x144xf32>
    %c8_251 = arith.constant 8 : index
    %c1_252 = arith.constant 1 : index
    %c0_253 = arith.constant 0 : index
    %c0_254 = arith.constant 0 : index
    %276 = vector.load %arg2[%c8_251, %c1_252, %c0_253, %c0_254] : memref<11x3x144x128xf32, #tpu.memory_space<vmem>>, vector<1x1x144x128xf32>
    %277 = vector.shape_cast %276 : vector<1x1x144x128xf32> to vector<144x128xf32>
    %cst_255 = arith.constant dense<0.000000e+00> : vector<16x128xf32>
    %278 = tpu.matmul %275, %277, %cst_255 {dimension_numbers = #tpu.dot_dimension_numbers<[1], [0], [0], [1], [0, 0, 1, 1], [], []>} : vector<16x144xf32>, vector<144x128xf32>, vector<16x128xf32> -> vector<16x128xf32>
    %279 = arith.addf %274, %278 : vector<16x128xf32>
    %280 = vector.extract_strided_slice %268 {offsets = [2, 0], sizes = [16, 144], strides = [1, 1]} : vector<18x144xf32> to vector<16x144xf32>
    %c8_256 = arith.constant 8 : index
    %c2_257 = arith.constant 2 : index
    %c0_258 = arith.constant 0 : index
    %c0_259 = arith.constant 0 : index
    %281 = vector.load %arg2[%c8_256, %c2_257, %c0_258, %c0_259] : memref<11x3x144x128xf32, #tpu.memory_space<vmem>>, vector<1x1x144x128xf32>
    %282 = vector.shape_cast %281 : vector<1x1x144x128xf32> to vector<144x128xf32>
    %cst_260 = arith.constant dense<0.000000e+00> : vector<16x128xf32>
    %283 = tpu.matmul %280, %282, %cst_260 {dimension_numbers = #tpu.dot_dimension_numbers<[1], [0], [0], [1], [0, 0, 1, 1], [], []>} : vector<16x144xf32>, vector<144x128xf32>, vector<16x128xf32> -> vector<16x128xf32>
    %284 = arith.addf %279, %283 : vector<16x128xf32>
    %c8_261 = arith.constant 8 : index
    %c0_262 = arith.constant 0 : index
    %c0_263 = arith.constant 0 : index
    %285 = vector.load %arg3[%c8_261, %c0_262, %c0_263] : memref<11x1x128xf32, #tpu.memory_space<vmem>>, vector<1x1x128xf32>
    %286 = vector.shape_cast %285 : vector<1x1x128xf32> to vector<1x128xf32>
    %287 = vector.broadcast %286 : vector<1x128xf32> to vector<16x128xf32>
    %288 = arith.addf %284, %287 : vector<16x128xf32>
    %cst_264 = arith.constant dense<0.000000e+00> : vector<128xf32>
    %289 = vector.multi_reduction <add>, %288, %cst_264 [0] : vector<16x128xf32> to vector<128xf32>
    %290 = vector.shape_cast %289 : vector<128xf32> to vector<1x128xf32>
    %c3_265 = arith.constant 3 : index
    %c0_266 = arith.constant 0 : index
    %c0_267 = arith.constant 0 : index
    %291 = vector.load %arg4[%c3_265, %c0_266, %c0_267] : memref<4x128x4xf32, #tpu.memory_space<vmem>>, vector<1x128x4xf32>
    %292 = vector.shape_cast %291 : vector<1x128x4xf32> to vector<128x4xf32>
    %cst_268 = arith.constant dense<0.000000e+00> : vector<1x4xf32>
    %293 = tpu.matmul %290, %292, %cst_268 {dimension_numbers = #tpu.dot_dimension_numbers<[1], [0], [0], [1], [0, 0, 1, 1], [], []>} : vector<1x128xf32>, vector<128x4xf32>, vector<1x4xf32> -> vector<1x4xf32>
    %c3_269 = arith.constant 3 : index
    %c0_270 = arith.constant 0 : index
    %c0_271 = arith.constant 0 : index
    %294 = vector.load %arg5[%c3_269, %c0_270, %c0_271] : memref<4x1x4xf32, #tpu.memory_space<vmem>>, vector<1x1x4xf32>
    %295 = vector.shape_cast %294 : vector<1x1x4xf32> to vector<1x4xf32>
    %296 = arith.addf %293, %295 : vector<1x4xf32>
    %cst_272 = arith.constant 0.000000e+00 : f32
    %297 = vector.broadcast %cst_272 : f32 to vector<1x4xf32>
    %298 = arith.maximumf %296, %297 : vector<1x4xf32>
    %c3_273 = arith.constant 3 : index
    %c0_274 = arith.constant 0 : index
    %c0_275 = arith.constant 0 : index
    %299 = vector.load %arg6[%c3_273, %c0_274, %c0_275] : memref<4x4x128xf32, #tpu.memory_space<vmem>>, vector<1x4x128xf32>
    %300 = vector.shape_cast %299 : vector<1x4x128xf32> to vector<4x128xf32>
    %cst_276 = arith.constant dense<0.000000e+00> : vector<1x128xf32>
    %301 = tpu.matmul %298, %300, %cst_276 {dimension_numbers = #tpu.dot_dimension_numbers<[1], [0], [0], [1], [0, 0, 1, 1], [], []>} : vector<1x4xf32>, vector<4x128xf32>, vector<1x128xf32> -> vector<1x128xf32>
    %c3_277 = arith.constant 3 : index
    %c0_278 = arith.constant 0 : index
    %c0_279 = arith.constant 0 : index
    %302 = vector.load %arg7[%c3_277, %c0_278, %c0_279] : memref<4x1x128xf32, #tpu.memory_space<vmem>>, vector<1x1x128xf32>
    %303 = vector.shape_cast %302 : vector<1x1x128xf32> to vector<1x128xf32>
    %304 = arith.addf %301, %303 : vector<1x128xf32>
    %cst_280 = arith.constant 0.000000e+00 : f32
    %305 = vector.broadcast %cst_280 : f32 to vector<1x128xf32>
    %306 = arith.subf %305, %304 : vector<1x128xf32>
    %307 = math.exp %306 : vector<1x128xf32>
    %cst_281 = arith.constant 1.000000e+00 : f32
    %308 = vector.broadcast %cst_281 : f32 to vector<1x128xf32>
    %309 = arith.addf %308, %307 : vector<1x128xf32>
    %cst_282 = arith.constant 1.000000e+00 : f32
    %310 = vector.broadcast %cst_282 : f32 to vector<1x128xf32>
    %311 = arith.divf %310, %309 : vector<1x128xf32>
    %312 = vector.broadcast %311 : vector<1x128xf32> to vector<16x128xf32>
    %313 = arith.mulf %288, %312 : vector<16x128xf32>
    %314 = arith.addf %242, %313 : vector<16x128xf32>
    %c1_283 = arith.constant 1 : index
    %c0_284 = arith.constant 0 : index
    %315 = vector.load %arg9[%c1_283, %c0_284] : memref<18x144xf32, #tpu.memory_space<vmem>>, vector<16x128xf32>
    tpu.vector_store %arg9[%c1_283, %c0_284], %314 {strides = array<i32>} : memref<18x144xf32, #tpu.memory_space<vmem>>, vector<16x128xf32>,
    %c0_285 = arith.constant 0 : index
    %c0_286 = arith.constant 0 : index
    %316 = vector.load %arg9[%c0_285, %c0_286] : memref<18x144xf32, #tpu.memory_space<vmem>>, vector<18x144xf32>
    %cst_287 = arith.constant 0.000000e+00 : f32
    %317 = vector.broadcast %cst_287 : f32 to vector<16x128xf32>
    %318 = vector.extract_strided_slice %316 {offsets = [0, 0], sizes = [16, 144], strides = [1, 1]} : vector<18x144xf32> to vector<16x144xf32>
    %c9 = arith.constant 9 : index
    %c0_288 = arith.constant 0 : index
    %c0_289 = arith.constant 0 : index
    %c0_290 = arith.constant 0 : index
    %319 = vector.load %arg2[%c9, %c0_288, %c0_289, %c0_290] : memref<11x3x144x128xf32, #tpu.memory_space<vmem>>, vector<1x1x144x128xf32>
    %320 = vector.shape_cast %319 : vector<1x1x144x128xf32> to vector<144x128xf32>
    %cst_291 = arith.constant dense<0.000000e+00> : vector<16x128xf32>
    %321 = tpu.matmul %318, %320, %cst_291 {dimension_numbers = #tpu.dot_dimension_numbers<[1], [0], [0], [1], [0, 0, 1, 1], [], []>} : vector<16x144xf32>, vector<144x128xf32>, vector<16x128xf32> -> vector<16x128xf32>
    %322 = arith.addf %317, %321 : vector<16x128xf32>
    %323 = vector.extract_strided_slice %316 {offsets = [1, 0], sizes = [16, 144], strides = [1, 1]} : vector<18x144xf32> to vector<16x144xf32>
    %c9_292 = arith.constant 9 : index
    %c1_293 = arith.constant 1 : index
    %c0_294 = arith.constant 0 : index
    %c0_295 = arith.constant 0 : index
    %324 = vector.load %arg2[%c9_292, %c1_293, %c0_294, %c0_295] : memref<11x3x144x128xf32, #tpu.memory_space<vmem>>, vector<1x1x144x128xf32>
    %325 = vector.shape_cast %324 : vector<1x1x144x128xf32> to vector<144x128xf32>
    %cst_296 = arith.constant dense<0.000000e+00> : vector<16x128xf32>
    %326 = tpu.matmul %323, %325, %cst_296 {dimension_numbers = #tpu.dot_dimension_numbers<[1], [0], [0], [1], [0, 0, 1, 1], [], []>} : vector<16x144xf32>, vector<144x128xf32>, vector<16x128xf32> -> vector<16x128xf32>
    %327 = arith.addf %322, %326 : vector<16x128xf32>
    %328 = vector.extract_strided_slice %316 {offsets = [2, 0], sizes = [16, 144], strides = [1, 1]} : vector<18x144xf32> to vector<16x144xf32>
    %c9_297 = arith.constant 9 : index
    %c2_298 = arith.constant 2 : index
    %c0_299 = arith.constant 0 : index
    %c0_300 = arith.constant 0 : index
    %329 = vector.load %arg2[%c9_297, %c2_298, %c0_299, %c0_300] : memref<11x3x144x128xf32, #tpu.memory_space<vmem>>, vector<1x1x144x128xf32>
    %330 = vector.shape_cast %329 : vector<1x1x144x128xf32> to vector<144x128xf32>
    %cst_301 = arith.constant dense<0.000000e+00> : vector<16x128xf32>
    %331 = tpu.matmul %328, %330, %cst_301 {dimension_numbers = #tpu.dot_dimension_numbers<[1], [0], [0], [1], [0, 0, 1, 1], [], []>} : vector<16x144xf32>, vector<144x128xf32>, vector<16x128xf32> -> vector<16x128xf32>
    %332 = arith.addf %327, %331 : vector<16x128xf32>
    %c9_302 = arith.constant 9 : index
    %c0_303 = arith.constant 0 : index
    %c0_304 = arith.constant 0 : index
    %333 = vector.load %arg3[%c9_302, %c0_303, %c0_304] : memref<11x1x128xf32, #tpu.memory_space<vmem>>, vector<1x1x128xf32>
    %334 = vector.shape_cast %333 : vector<1x1x128xf32> to vector<1x128xf32>
    %335 = vector.broadcast %334 : vector<1x128xf32> to vector<16x128xf32>
    %336 = arith.addf %332, %335 : vector<16x128xf32>
    %337 = arith.addf %336, %170 : vector<16x128xf32>
    %c1_305 = arith.constant 1 : index
    %c0_306 = arith.constant 0 : index
    %338 = vector.load %arg9[%c1_305, %c0_306] : memref<18x144xf32, #tpu.memory_space<vmem>>, vector<16x128xf32>
    tpu.vector_store %arg9[%c1_305, %c0_306], %337 {strides = array<i32>} : memref<18x144xf32, #tpu.memory_space<vmem>>, vector<16x128xf32>,
    %c0_307 = arith.constant 0 : index
    %c0_308 = arith.constant 0 : index
    %339 = vector.load %arg9[%c0_307, %c0_308] : memref<18x144xf32, #tpu.memory_space<vmem>>, vector<18x144xf32>
    %cst_309 = arith.constant 0.000000e+00 : f32
    %340 = vector.broadcast %cst_309 : f32 to vector<16x128xf32>
    %341 = vector.extract_strided_slice %339 {offsets = [0, 0], sizes = [16, 144], strides = [1, 1]} : vector<18x144xf32> to vector<16x144xf32>
    %c10 = arith.constant 10 : index
    %c0_310 = arith.constant 0 : index
    %c0_311 = arith.constant 0 : index
    %c0_312 = arith.constant 0 : index
    %342 = vector.load %arg2[%c10, %c0_310, %c0_311, %c0_312] : memref<11x3x144x128xf32, #tpu.memory_space<vmem>>, vector<1x1x144x128xf32>
    %343 = vector.shape_cast %342 : vector<1x1x144x128xf32> to vector<144x128xf32>
    %cst_313 = arith.constant dense<0.000000e+00> : vector<16x128xf32>
    %344 = tpu.matmul %341, %343, %cst_313 {dimension_numbers = #tpu.dot_dimension_numbers<[1], [0], [0], [1], [0, 0, 1, 1], [], []>} : vector<16x144xf32>, vector<144x128xf32>, vector<16x128xf32> -> vector<16x128xf32>
    %345 = arith.addf %340, %344 : vector<16x128xf32>
    %346 = vector.extract_strided_slice %339 {offsets = [1, 0], sizes = [16, 144], strides = [1, 1]} : vector<18x144xf32> to vector<16x144xf32>
    %c10_314 = arith.constant 10 : index
    %c1_315 = arith.constant 1 : index
    %c0_316 = arith.constant 0 : index
    %c0_317 = arith.constant 0 : index
    %347 = vector.load %arg2[%c10_314, %c1_315, %c0_316, %c0_317] : memref<11x3x144x128xf32, #tpu.memory_space<vmem>>, vector<1x1x144x128xf32>
    %348 = vector.shape_cast %347 : vector<1x1x144x128xf32> to vector<144x128xf32>
    %cst_318 = arith.constant dense<0.000000e+00> : vector<16x128xf32>
    %349 = tpu.matmul %346, %348, %cst_318 {dimension_numbers = #tpu.dot_dimension_numbers<[1], [0], [0], [1], [0, 0, 1, 1], [], []>} : vector<16x144xf32>, vector<144x128xf32>, vector<16x128xf32> -> vector<16x128xf32>
    %350 = arith.addf %345, %349 : vector<16x128xf32>
    %351 = vector.extract_strided_slice %339 {offsets = [2, 0], sizes = [16, 144], strides = [1, 1]} : vector<18x144xf32> to vector<16x144xf32>
    %c10_319 = arith.constant 10 : index
    %c2_320 = arith.constant 2 : index
    %c0_321 = arith.constant 0 : index
    %c0_322 = arith.constant 0 : index
    %352 = vector.load %arg2[%c10_319, %c2_320, %c0_321, %c0_322] : memref<11x3x144x128xf32, #tpu.memory_space<vmem>>, vector<1x1x144x128xf32>
    %353 = vector.shape_cast %352 : vector<1x1x144x128xf32> to vector<144x128xf32>
    %cst_323 = arith.constant dense<0.000000e+00> : vector<16x128xf32>
    %354 = tpu.matmul %351, %353, %cst_323 {dimension_numbers = #tpu.dot_dimension_numbers<[1], [0], [0], [1], [0, 0, 1, 1], [], []>} : vector<16x144xf32>, vector<144x128xf32>, vector<16x128xf32> -> vector<16x128xf32>
    %355 = arith.addf %350, %354 : vector<16x128xf32>
    %c10_324 = arith.constant 10 : index
    %c0_325 = arith.constant 0 : index
    %c0_326 = arith.constant 0 : index
    %356 = vector.load %arg3[%c10_324, %c0_325, %c0_326] : memref<11x1x128xf32, #tpu.memory_space<vmem>>, vector<1x1x128xf32>
    %357 = vector.shape_cast %356 : vector<1x1x128xf32> to vector<1x128xf32>
    %358 = vector.broadcast %357 : vector<1x128xf32> to vector<16x128xf32>
    %359 = arith.addf %355, %358 : vector<16x128xf32>
    %360 = arith.addf %359, %3 : vector<16x128xf32>
    %c0_327 = arith.constant 0 : index
    %c0_328 = arith.constant 0 : index
    %c0_329 = arith.constant 0 : index
    %361 = vector.load %arg8[%c0_327, %c0_328, %c0_329] : memref<1x16x128xf32, #tpu.memory_space<vmem>>, vector<1x16x128xf32>
    %362 = vector.shape_cast %361 : vector<1x16x128xf32> to vector<16x128xf32>
    %363 = vector.shape_cast %360 : vector<16x128xf32> to vector<1x16x128xf32>
    tpu.vector_store %arg8[%c0_327, %c0_328, %c0_329], %363 {strides = array<i32>} : memref<1x16x128xf32, #tpu.memory_space<vmem>>, vector<1x16x128xf32>,
    return
  }
  func.func @transform_0(%arg0: i32) -> (i32, i32, i32) {
    %c0_i32 = arith.constant 0 : i32
    %c0_i32_0 = arith.constant 0 : i32
    %c0_i32_1 = arith.constant 0 : i32
    return %arg0, %c0_i32, %c0_i32_0 : i32, i32, i32
  }
  func.func @transform_1(%arg0: i32) -> (i32, i32, i32, i32) {
    %c0_i32 = arith.constant 0 : i32
    %c0_i32_0 = arith.constant 0 : i32
    %c0_i32_1 = arith.constant 0 : i32
    %c0_i32_2 = arith.constant 0 : i32
    %c0_i32_3 = arith.constant 0 : i32
    return %c0_i32, %c0_i32_0, %c0_i32_1, %c0_i32_2 : i32, i32, i32, i32
  }
  func.func @transform_2(%arg0: i32) -> (i32, i32, i32) {
    %c0_i32 = arith.constant 0 : i32
    %c0_i32_0 = arith.constant 0 : i32
    %c0_i32_1 = arith.constant 0 : i32
    %c0_i32_2 = arith.constant 0 : i32
    return %c0_i32, %c0_i32_0, %c0_i32_1 : i32, i32, i32
  }
  func.func @transform_3(%arg0: i32) -> (i32, i32, i32) {
    %c0_i32 = arith.constant 0 : i32
    %c0_i32_0 = arith.constant 0 : i32
    %c0_i32_1 = arith.constant 0 : i32
    %c0_i32_2 = arith.constant 0 : i32
    return %c0_i32, %c0_i32_0, %c0_i32_1 : i32, i32, i32
  }
  func.func @transform_4(%arg0: i32) -> (i32, i32, i32) {
    %c0_i32 = arith.constant 0 : i32
    %c0_i32_0 = arith.constant 0 : i32
    %c0_i32_1 = arith.constant 0 : i32
    %c0_i32_2 = arith.constant 0 : i32
    return %c0_i32, %c0_i32_0, %c0_i32_1 : i32, i32, i32
  }
  func.func @transform_5(%arg0: i32) -> (i32, i32, i32) {
    %c0_i32 = arith.constant 0 : i32
    %c0_i32_0 = arith.constant 0 : i32
    %c0_i32_1 = arith.constant 0 : i32
    %c0_i32_2 = arith.constant 0 : i32
    return %c0_i32, %c0_i32_0, %c0_i32_1 : i32, i32, i32
  }
  func.func @transform_6(%arg0: i32) -> (i32, i32, i32) {
    %c0_i32 = arith.constant 0 : i32
    %c0_i32_0 = arith.constant 0 : i32
    %c0_i32_1 = arith.constant 0 : i32
    %c0_i32_2 = arith.constant 0 : i32
    return %c0_i32, %c0_i32_0, %c0_i32_1 : i32, i32, i32
  }
  func.func @transform_7(%arg0: i32) -> (i32, i32, i32) {
    %c0_i32 = arith.constant 0 : i32
    %c0_i32_0 = arith.constant 0 : i32
    %c0_i32_1 = arith.constant 0 : i32
    return %arg0, %c0_i32, %c0_i32_0 : i32, i32, i32
  }
}

</mosaic_0001>

<bundles_post_ra>
// kernel: tpu_custom_call.1
= control target key start
LH: loop header
LB: loop body
LE: loop exit
PB: predicated region body
PF: predicated region fallthrough
CT: control target
= control target key end

     0   :  { %s7690_s0 = inlined_call_operand.hbm [shape: f32[2,16,128], index: 0, kind: input, shape index: {}]   ;;  %s7691_s1 = inlined_call_operand.hbm [shape: f32[11,3,144,128], index: 1, kind: input, shape index: {}]   ;;  %s7692_s2 = inlined_call_operand.hbm [shape: f32[11,1,128], index: 2, kind: input, shape index: {}]   ;;  %s7693_s3 = inlined_call_operand.vmem [shape: f32[4,128,4], index: 3, kind: input, shape index: {}]   ;;  %s7694_s4 = inlined_call_operand.hbm [shape: f32[4,1,4], index: 4, kind: input, shape index: {}]   ;;  %s7695_s5 = inlined_call_operand.hbm [shape: f32[4,4,128], index: 5, kind: input, shape index: {}]   ;;  %s7696_s6 = inlined_call_operand.hbm [shape: f32[4,1,128], index: 6, kind: input, shape index: {}]   ;;  %s7697_s7 = inlined_call_operand.hbm [shape: f32[2,16,128], index: 7, kind: output, shape index: {}]  }
   0x1   :  { %7704 = sst [smem:[#allocation20_spill]] %s7691_s1 }
   0x2   :  { %12 = vsyncpa [#allocation4], 0 }
   0x3   :  { %14 = vsyncpa [#allocation4 + $0x1], 0 }
   0x4   :  { %15 = vsyncpa [#allocation7], 0 }
   0x5   :  { %16 = vsyncpa [#allocation10], 0 }
   0x6   :  { %17 = vsyncpa [#allocation13], 0 }
   0x7   :  { %18 = vsyncpa [#allocation5], 0 }
   0x8   :  { %20 = vsyncpa [#allocation5 + $0x1], 0  ;;  %s5994_s24 = smov 0   ;;  %s5996_s25 = smov 0  }
   0x9   :  { %s5998_s26 = smov 0   ;;  %s6000_s27 = smov 0  }
   0xa LB: > { %s5937_s28 = smov [#allocation6]   ;;  %s6015_s30 = sadd.s32 4294967295, %s5935_s27   ;;  %s5935_s27 = sphi %s6000_s27, %s7729_s27   ;;  %s5931_s26 = sphi %s5998_s26, %s7728_s26   ;;  %s5927_s25 = sphi %s5996_s25, %s7727_s25   ;;  %s5923_s24 = sphi %s5994_s24, %s7726_s24  }
   0xb   : > { %s221_s29 = sshll.u32 %s5937_s28, 4  ;;  %p5178_p0 = scmp.ge.s32.totalorder %s5935_s27, 1  ;;  %s222_s29 = int_to_ptr.vmem [resolvable:$true] %s221_s29 }
   0xc   : > { %p7699_p1 = scmp.eq.s32.totalorder %s6015_s30, 0  ;;  %p209_p2 = scmp.lt.s32.totalorder %s5935_s27, 3 }
   0xd   : > { %s5938_s10 = smov [#allocation9]   ;;  %s5939_s12 = smov [#allocation8]  }
   0xe   : > { %p6020_p3 = pnand %p5178_p0, %p209_p2  ;;  %s250_s11 = sshll.u32 %s5938_s10, 4  ;;  %s6033_s11 = int_to_ptr.vmem [resolvable:$true] %s250_s11 }
   0xf   : > { %s6035_s13 = sshll.u32 %s5939_s12, 4  ;;  %s5712_s15 = scalar_lea.vmem %s222_s29, 76032  ;;  %s235_s13 = int_to_ptr.vmem [resolvable:$true] %s6035_s13 }
  0x10   : > { %s7705_s8 = scalar_select %p6020_p3, 1, 0 }
  0x11   : > { %p5596_p5 = pneg %p6020_p3  ;;  %p5713_p8 = scmp.ne.s32.totalorder %s222_s29, %s5712_s15 }
  0x12   : > { %p5720_p11 = scmp.lt.s32.totalorder %s222_s29, %s222_s29  ;;  %p5721_p12 = scmp.lt.s32.totalorder %s5712_s15, %s5712_s15 }
  0x13   : > { %p6029_p6 = pnand %p5596_p5, %p7699_p1 }
  0x14   : > { %p5722_p13 = por %p5721_p12, %p5720_p11 }
  0x15   : > { %p6039_p7 = pneg %p6029_p6 }
  0x17   : > { %p5715_p9 = pnand %p5713_p8, %p6039_p7 }
  0x19   : > { %p5716_p10 = pneg %p5715_p9 }
  0x1b   : > { %p5723_p0 = pnand %p5722_p13, %p5716_p10 }
  0x1d   : > { %5726 = shalt.err (!%p5723_p0)
}
  0x1e   : > { %s7698_s16 = smov 128   ;;  %s7700_s17 = smov 8  }
  0x1f   : > { %s7708_s1 = sld [smem:[#allocation20_spill]]  ;;  %s5738_s20 = scalar_lea.vmem %s6033_s11, 64 }
  0x20   : > { %p5739_p2 = scmp.ne.s32.totalorder %s6033_s11, %s5738_s20  ;;  %p5746_p9 = scmp.lt.s32.totalorder %s6033_s11, %s6033_s11 }
  0x21   : > { %p5747_p10 = scmp.lt.s32.totalorder %s5738_s20, %s5738_s20 }
  0x22   : > { %p5741_p5 = pnand %p5739_p2, %p6039_p7 }
  0x23   : > { %p5748_p11 = por %p5747_p10, %p5746_p9 }
  0x24   : > { %p5742_p8 = pneg %p5741_p5 }
  0x25   : > { %5599 = dma.hbm_to_vmem [thread:$0]  (!%p6029_p6), %s7708_s1, 76032, %s222_s29, [#allocation7], %s7698_s16, %s7698_s16, %s7700_s17  }
  0x26   : > { %p5749_p12 = pnand %p5748_p11, %p5742_p8 }
  0x28   : > { %5752 = shalt.err (!%p5749_p12)
}
  0x29   : > { %s5942_s21 = smov 16   ;;  %s5943_s22 = smov 1  }
  0x2a   : > { %5605 = dma.hbm_to_vmem [thread:$0]  (!%p6029_p6), %s7694_s4, 64, %s6033_s11, [#allocation10], %s5942_s21, %s5942_s21, %s5943_s22  }
  0x2b   : > { %s5764_s29 = scalar_lea.vmem %s235_s13, 176  ;;  %s5771_s10 = scalar_lea.vmem %s235_s13, 192 }
  0x2c   : > { %p5765_p13 = scmp.ne.s32.totalorder %s235_s13, %s5764_s29  ;;  %p5772_p5 = scmp.lt.s32.totalorder %s235_s13, %s235_s13 }
  0x2d   : > { %p5773_p8 = scmp.lt.s32.totalorder %s5771_s10, %s5764_s29 }
  0x2e   : > { %p5767_p0 = pnand %p5765_p13, %p6039_p7 }
  0x2f   : > { %p5774_p9 = por %p5773_p8, %p5772_p5 }
  0x30   : > { %p5768_p2 = pneg %p5767_p0 }
  0x32   : > { %p5775_p10 = pnand %p5774_p9, %p5768_p2 }
  0x34   : > { %5778 = shalt.err (!%p5775_p10)
}
  0x35   : > { %5602 = dma.hbm_to_vmem [thread:$0]  (!%p6029_p6), %s7692_s2, 176, %s235_s13, [#allocation7], %s5942_s21, %s5942_s21, %s5943_s22  }
  0x36   : > { %s5944_s11 = smov [#allocation11]  }
  0x37   : > { %s263_s18 = sshll.u32 %s5944_s11, 4  ;;  %s264_s18 = int_to_ptr.vmem [resolvable:$true] %s263_s18 }
  0x38   : > { %s5790_s19 = scalar_lea.vmem %s264_s18, 256  ;;  %p5798_p0 = scmp.lt.s32.totalorder %s264_s18, %s264_s18 }
  0x39   : > { %p5791_p11 = scmp.ne.s32.totalorder %s264_s18, %s5790_s19  ;;  %p5799_p2 = scmp.lt.s32.totalorder %s5790_s19, %s5790_s19 }
  0x3b   : > { %p5793_p12 = pnand %p5791_p11, %p6039_p7  ;;  %p5800_p5 = por %p5799_p2, %p5798_p0 }
  0x3d   : > { %p5794_p13 = pneg %p5793_p12 }
  0x3f   : > { %p5801_p8 = pnand %p5800_p5, %p5794_p13 }
  0x41   : > { %5804 = shalt.err (!%p5801_p8)
}
  0x42   : > { %s5945_s20 = smov 64   ;;  %s5946_s23 = smov 4  }
  0x43   : > { %5608 = dma.hbm_to_vmem [thread:$0]  (!%p6029_p6), %s7695_s5, 256, %s264_s18, [#allocation10], %s5945_s20, %s5945_s20, %s5946_s23  }
  0x44   : > { %s5947_s29 = smov [#allocation12]  }
  0x45   : > { %s276_s10 = sshll.u32 %s5947_s29, 4  ;;  %s277_s10 = int_to_ptr.vmem [resolvable:$true] %s276_s10 }
  0x46   : > { %s5816_s12 = scalar_lea.vmem %s277_s10, 64  ;;  %p5824_p12 = scmp.lt.s32.totalorder %s277_s10, %s277_s10 }
  0x47   : > { %p5817_p9 = scmp.ne.s32.totalorder %s277_s10, %s5816_s12  ;;  %p5825_p13 = scmp.lt.s32.totalorder %s5816_s12, %s5816_s12 }
  0x49   : > { %p5819_p10 = pnand %p5817_p9, %p6039_p7  ;;  %p5826_p0 = por %p5825_p13, %p5824_p12 }
  0x4b   : > { %p5820_p11 = pneg %p5819_p10 }
  0x4d   : > { %p5827_p2 = pnand %p5826_p0, %p5820_p11 }
  0x4f   : > { %5830 = shalt.err (!%p5827_p2)
}
  0x50   : > { %5611 = dma.hbm_to_vmem [thread:$0]  (!%p6029_p6), %s7696_s6, 64, %s277_s10, [#allocation13], %s5942_s21, %s5942_s21, %s5943_s22  }
  0x51   : > { %s5177_s9 = sadd.s32 4294967294, %s5935_s27   ;;  %s6098_s14 = sadd.s32 1, %s5935_s27  }
  0x52   : > { %s33_s18 = sadd.s32 1, %s5931_s26  ;;  %s30_s19 = ssub.s32 %s5935_s27, %s6098_s14 }
  0x53   : > { %p40_p7 = scmp.ne.s32.totalorder %s5931_s26, %s5927_s25  ;;  %p31_p5 = scmp.eq.s32.totalorder %s30_s19, 0 }
  0x54   : > { %p41_p8 = scmp.eq.s32.totalorder %s5935_s27, 0  ;;  %p46_p9 = scmp.ne.s32.totalorder %s5927_s25, %s5923_s24 }
  0x55   : > { %p196_p10 = scmp.eq.s32.totalorder %s6015_s30, 1  ;;  %p202_p13 = scmp.eq.s32.totalorder %s5177_s9, 1 }
  0x56   : > { %s6110_s20 = scalar_select %p31_p5, %s5931_s26, %s33_s18  }
  0x57   : > { %p42_p11 = por %p41_p8, %p40_p7  ;;  %p6114_p12 = por %p7699_p1, %p46_p9 }
  0x58   : > { %p6118_p6 = por %p196_p10, %p40_p7  ;;  %p5625_p0 = scmp.lt.s32.totalorder %s5935_s27, 2 }
  0x59   : > { %s7709_s23 = scalar_select %p6114_p12, 1, 0 }
  0x5a   : > { %s7710_s21 = scalar_select %p6118_p6, 1, 0 }
  0x5b   : > { %s290_s22 = sand.u32 1, %s5931_s26   ;;  %p6124_p2 = por %p202_p13, %p46_p9 }
  0x5c   : > { %s5185_s13 = sshll.u32 %s290_s22, 4  ;;  %s5334_s29 = sshll.u32 %s5935_s27, 8 }
  0x5d   : > { %s7711_s28 = scalar_select %p6124_p2, 1, 0 }
  0x5e   : > { %s6132_s15 = scalar_lea.hbm %s7690_s0, %s5334_s29  ;;  %s294_s11 = scalar_lea.vmem [#allocation3], %s5185_s13 }
  0x5f   : > { %s301_s18 = sshll.u32 %s294_s11, 4  ;;  %p6134_p7 = pnand %p5625_p0, %p42_p11  ;;  %s6138_s18 = int_to_ptr.vmem [resolvable:$true] %s301_s18 }
  0x60   : > { %s6140_s19 = scalar_lea.sflag [#allocation4], %s290_s22  ;;  %s5831_s16 = scalar_lea.hbm %s6132_s15, 256 }
  0x61   : > { %p5832_p5 = scmp.ne.s32.totalorder %s6132_s15, %s5831_s16  ;;  %p5833_p8 = pneg %p6134_p7 }
  0x62   : > { %s5836_s13 = scalar_lea.hbm %s7690_s0, 512  ;;  %p5837_p11 = scmp.lt.s32.totalorder %s6132_s15, %s7690_s0 }
  0x63   : > { %p5834_p9 = pnand %p5833_p8, %p5832_p5  ;;  %p5838_p13 = scmp.lt.s32.totalorder %s5836_s13, %s5831_s16 }
  0x65   : > { %p5835_p10 = pneg %p5834_p9  ;;  %p5839_p0 = por %p5838_p13, %p5837_p11 }
  0x67   : > { %p5840_p4 = pnand %p5839_p0, %p5835_p10 }
  0x69   : > { %5843 = shalt.err (!%p5840_p4)
}
  0x6a   : > { %s5844_s22 = scalar_lea.vmem %s6138_s18, 256  ;;  %s5948_s17 = smov [#allocation3]  }
  0x6b   : > { %p5845_p1 = scmp.ne.s32.totalorder %s6138_s18, %s5844_s22  ;;  %s5849_s1 = sshll.u32 %s5948_s17, 4  ;;  %s5850_s1 = int_to_ptr.vmem [resolvable:$false] %s5849_s1 }
  0x6c   : > { %s5851_s29 = scalar_lea.vmem %s5850_s1, 512  ;;  %p5852_p9 = scmp.lt.s32.totalorder %s6138_s18, %s5850_s1 }
  0x6d   : > { %p5847_p2 = pnand %p5845_p1, %p5833_p8  ;;  %p5853_p6 = scmp.lt.s32.totalorder %s5851_s29, %s5844_s22 }
  0x6f   : > { %p5848_p5 = pneg %p5847_p2  ;;  %p5854_p12 = por %p5853_p6, %p5852_p9 }
  0x71   : > { %p5855_p3 = pnand %p5854_p12, %p5848_p5 }
  0x73   : > { %5858 = shalt.err (!%p5855_p3)
}
  0x74   : > { %s7713_s16 = smov 8   ;;  %s7714_s10 = smov 128  }
  0x75   : > { %5615 = dma.hbm_to_vmem [thread:$0]  (!%p6134_p7), %s6132_s15, 256, %s6138_s18, %s6140_s19, %s7714_s10, %s7714_s10, %s7713_s16  }
  0x76   : > { %p7715_p1 = scmp.ne.s32.totalorder %s7705_s8, 0 }
  0x77   : > { %s6167_s17 = sand.u32 (!%p7715_p1), 1, %s5927_s25   ;;  %p7716_p3 = scmp.ne.s32.totalorder (!%p7715_p1), %s7709_s23, 0 }
  0x78   : > { %313 = sbr.rel (%p7715_p1) target bundleno = 4699 (0x125b), region = 48  ;;  %s5189_s1 = sshll.u32 (!%p7715_p1), %s6167_s17, 4 }
  0x79   : > { %s316_s13 = scalar_lea.sflag (!%p7715_p1), [#allocation4], %s6167_s17  ;;  %s6173_s9 = scalar_lea.vmem (!%p7715_p1), [#allocation3], %s5189_s1 }
  0x7d   : > { %5902 = dma.done.wait (%p7716_p3), %s316_s13, 256  }
  0x7e   : > { %5904 = vsyncadd (%p7716_p3), %s316_s13, 4294967040  ;;  %p7717_p4 = scmp.eq.s32.totalorder %s6015_s30, 0 }
  0x80   : > { %5906 = dma.done.wait (%p7717_p4), [#allocation7], 76208   ;;  %p7718_p12 = pmov %p7717_p4 }
  0x81   : > { %p7719_p6 = pmov %p7717_p4 }
  0x82   : > { %5908 = vsyncadd (%p7718_p12), [#allocation7], 4294891088 }
  0x83   : > { %5910 = dma.done.wait (%p7719_p6), [#allocation10], 320   ;;  %p7720_p2 = pmov %p7717_p4 }
  0x85   : > { %5912 = vsyncadd (%p7720_p2), [#allocation10], 4294966976  ;;  %p7721_p7 = pmov %p7720_p2 }
  0x86   : > { %p7722_p8 = pmov %p7720_p2 }
  0x87   : > { %5914 = dma.done.wait (%p7721_p7), [#allocation13], 64  }
  0x88   : > { %5916 = vsyncadd (%p7722_p8), [#allocation13], 4294967232  ;;  %vm371_vm0 = vcmask 130048   ;;  %v5949_v0 = vmov 0.0   ;;  %vm376_vm1 = vcmask 123904   ;;  %v432_v1 = vld [vmem:[#allocation6 + $0x108] sm:$0xff] }
  0x89   : > { %458 = vmatprep.subr.mxu0 %v5949_v0  ;;  %370 = vst [vmem:[#allocation2] sm:$0xff] %v5949_v0  ;;  %375 = vst [vmem:[#allocation2 + $0x20] sm:$0x3] %v5949_v0  ;;  %537 = vmatprep.subr.mxu1 %v5949_v0  ;;  %v413_v2 = vld [vmem:[#allocation6 + $0x78] sm:$0xff]  ;;  %v431_v3 = vld [vmem:[#allocation6 + $0x100] sm:$0xff]  ;;  %vm382_vm2 = vcmask 1040384  }
  0x8a   : > { %372 = vst.msk [vmem:[#allocation2 + $0x8] sm:$0xff] %vm371_vm0, %v5949_v0  ;;  %374 = vst.msk [vmem:[#allocation2 + $0x18] sm:$0xff] %vm371_vm0, %v5949_v0  ;;  %459 = vmatpush1.msra.mxu0 %v432_v1  ;;  %538 = vmatpush1.msra.mxu1 %v413_v2  ;;  %v412_v4 = vld [vmem:[#allocation6 + $0x70] sm:$0xff]  ;;  %v430_v5 = vld [vmem:[#allocation6 + $0xf8] sm:$0xff]  ;;  %vm441_vm3 = vcmask 1046528   ;;  %vm631_vm4 = vcmask 1045504  }
  0x8b   : > { %377 = vst.msk [vmem:[#allocation2 + $0x28] sm:$0x3] %vm376_vm1, %v5949_v0  ;;  %460 = vmatprep.subr.mxu0 %v5949_v0  ;;  %539 = vmatprep.subr.mxu1 %v5949_v0  ;;  %v411_v6 = vld [vmem:[#allocation6 + $0x68] sm:$0xff]  ;;  %v429_v7 = vld [vmem:[#allocation6 + $0xf0] sm:$0xff]  ;;  %v410_v8 = vld [vmem:[#allocation6 + $0x60] sm:$0xff]  ;;  %vm5950_vm5 = vmmov 0  }
  0x8c   : > { %461 = vmatpush1.msra.mxu0 %v431_v3  ;;  %540 = vmatpush1.msra.mxu1 %v412_v4  ;;  %v428_v9 = vld [vmem:[#allocation6 + $0xe8] sm:$0xff]  ;;  %v409_v10 = vld [vmem:[#allocation6 + $0x58] sm:$0xff]  ;;  %v427_v11 = vld [vmem:[#allocation6 + $0xe0] sm:$0xff]  ;;  %vm1190_vm6 = vcmask 1043456   ;;  %vm1186_vm7 = vcmask 31744   ;;  %s369_s29 = scalar_lea.vmem [#allocation14], %s5189_s1 }
  0x8d   : > { %462 = vmatprep.subr.mxu0 %v5949_v0  ;;  %541 = vmatprep.subr.mxu1 %v5949_v0  ;;  %v408_v12 = vld [vmem:[#allocation6 + $0x50] sm:$0xff]  ;;  %v426_v13 = vld [vmem:[#allocation6 + $0xd8] sm:$0xff]  ;;  %v407_v14 = vld [vmem:[#allocation6 + $0x48] sm:$0xff]  ;;  %s5056_s16 = sshll.u32 %s369_s29, 4  ;;  %s5335_s10 = sshll.u32 %s6015_s30, 8  ;;  %s7641_s16 = int_to_ptr.vmem [resolvable:$true] %s5056_s16 }
  0x8e   : > { %463 = vmatpush1.msra.mxu0 %v430_v5  ;;  %542 = vmatpush1.msra.mxu1 %v411_v6  ;;  %v425_v15 = vld [vmem:[#allocation6 + $0xd0] sm:$0xff]  ;;  %v406_v16 = vld [vmem:[#allocation6 + $0x40] sm:$0xff]  ;;  %v379_v18 = vld [vmem:[%s6173_s9 + $0x8] sm:$0xff]  ;;  %s7646_s23 = scalar_lea.hbm %s7697_s7, %s5335_s10  ;;  %s5043_s1 = scalar_lea.sflag [#allocation5], %s6167_s17 }
  0x8f   : > { %464 = vmatprep.subr.mxu0 %v5949_v0  ;;  %543 = vmatprep.subr.mxu1 %v5949_v0  ;;  %v378_v17 = vld [vmem:[%s6173_s9] sm:$0xff]  ;;  %v384_v20 = vrot.slane %v379_v18, 7  ;;  %v424_v21 = vld [vmem:[#allocation6 + $0xc8] sm:$0xff]  ;;  %v405_v22 = vld [vmem:[#allocation6 + $0x38] sm:$0xff]  ;;  %s5859_s15 = scalar_lea.vmem %s7641_s16, 256  ;;  %p7723_p11 = scmp.ne.s32.totalorder %s7710_s21, 0 }
  0x90   : > { %465 = vmatpush1.msra.mxu0 %v429_v7  ;;  %544 = vmatpush1.msra.mxu1 %v410_v8  ;;  %v383_v19 = vrot.slane %v378_v17, 7  ;;  %v423_v23 = vld [vmem:[#allocation6 + $0xc0] sm:$0xff]  ;;  %v404_v24 = vld [vmem:[#allocation6 + $0x30] sm:$0xff]  ;;  %v422_v25 = vld [vmem:[#allocation6 + $0xb8] sm:$0xff]  ;;  %p5860_p10 = scmp.ne.s32.totalorder %s7641_s16, %s5859_s15  ;;  %s5951_s30 = smov [#allocation14]  }
  0x91   : > { %466 = vmatprep.subr.mxu0 %v5949_v0  ;;  %545 = vmatprep.subr.mxu1 %v5949_v0  ;;  %391 = vst [vmem:[#allocation2 + $0x20] sm:$0x1] %v384_v20  ;;  %v403_v26 = vld [vmem:[#allocation6 + $0x28] sm:$0xff]  ;;  %v421_v27 = vld [vmem:[#allocation6 + $0xb0] sm:$0xff]  ;;  %v402_v28 = vld [vmem:[#allocation6 + $0x20] sm:$0xff]  ;;  %s5863_s18 = sshll.u32 %s5951_s30, 4  ;;  %s5864_s18 = int_to_ptr.vmem [resolvable:$false] %s5863_s18 }
  0x92   : > { %467 = vmatpush1.msra.mxu0 %v428_v9  ;;  %546 = vmatpush1.msra.mxu1 %v409_v10  ;;  %389 = vst [vmem:[#allocation2] sm:$0xfe] %v383_v19  ;;  %v420_v29 = vld [vmem:[#allocation6 + $0xa8] sm:$0xff]  ;;  %v401_v30 = vld [vmem:[#allocation6 + $0x18] sm:$0xff]  ;;  %v419_v31 = vld [vmem:[#allocation6 + $0xa0] sm:$0xff]  ;;  %v6233_v37 = vsel %vm382_vm2, %v383_v19, %v384_v20  ;;  %p5861_p13 = pnand %p5860_p10, %p7723_p11  ;;  %s5865_s19 = scalar_lea.vmem %s5864_s18, 512 }
  0x93   : > { %468 = vmatprep.subr.mxu0 %v5949_v0  ;;  %547 = vmatprep.subr.mxu1 %v5949_v0  ;;  %v400_v32 = vld [vmem:[#allocation6 + $0x10] sm:$0xff]  ;;  %v6226_v33 = vld [vmem:[#allocation2 + $0x8] sm:$0xff]  ;;  %v6228_v34 = vld [vmem:[#allocation2 + $0x18] sm:$0xff]  ;;  %v443_v44 = vrot.slane %v6233_v37, 1  ;;  %p5866_p5 = scmp.lt.s32.totalorder %s7641_s16, %s5864_s18  ;;  %p5867_p9 = scmp.lt.s32.totalorder %s5865_s19, %s5859_s15 }
  0x94   : > { %469 = vmatpush1.msra.mxu0 %v427_v11  ;;  %548 = vmatpush1.msra.mxu1 %v408_v12  ;;  %v418_v35 = vld [vmem:[#allocation6 + $0x98] sm:$0xff]  ;;  %v399_v36 = vld [vmem:[#allocation6 + $0x8] sm:$0xff]  ;;  %v445_v39 = vrot.slane %v6226_v33, 1  ;;  %v6239_v40 = vrot.slane %v6228_v34, 1  ;;  %v417_v41 = vld [vmem:[#allocation6 + $0x90] sm:$0xff]  ;;  %v635_v57 = vrot.slane %v6226_v33, 2  ;;  %p5862_p0 = pneg %p5861_p13 }
  0x95   : > { %470 = vmatprep.subr.mxu0 %v5949_v0  ;;  %549 = vmatprep.subr.mxu1 %v5949_v0  ;;  %v398_v42 = vld [vmem:[#allocation6] sm:$0xff]  ;;  %v6245_v45 = vld [vmem:[#allocation2 + $0x28] sm:$0x3]  ;;  %v415_v47 = vld [vmem:[#allocation6 + $0x88] sm:$0xff]  ;;  %v6265_v58 = vrot.slane %v6228_v34, 2  ;;  %p5868_p1 = por %p5867_p9, %p5866_p5 }
  0x96   : > { %471 = vmatpush1.msra.mxu0 %v426_v13  ;;  %550 = vmatpush1.msra.mxu1 %v407_v14  ;;  %v434_v46 = vld [vmem:[#allocation6 + $0x118] sm:$0xff]  ;;  %v447_v48 = vsel %vm441_vm3, %v445_v39, %v6239_v40  ;;  %v433_v50 = vld [vmem:[#allocation6 + $0x110] sm:$0xff]  ;;  %v450_v51 = vrot.slane %v6245_v45, 1  ;;  %v414_v53 = vld [vmem:[#allocation6 + $0x80] sm:$0xff]  ;;  %v633_v14 = vrot.slane %v6233_v37, 2 }
  0x97   : > { %472 = vmatprep.subr.mxu0 %v5949_v0  ;;  %551 = vmatprep.subr.mxu1 %v5949_v0  ;;  %v628_v55 = vld [vmem:[#allocation6 + $0x198] sm:$0xff]  ;;  %v627_v59 = vld [vmem:[#allocation6 + $0x190] sm:$0xff]  ;;  %v626_v61 = vld [vmem:[#allocation6 + $0x188] sm:$0xff]  ;;  %v6278_v62 = vsel %vm631_vm4, %v635_v57, %v6265_v58  ;;  %p5869_p3 = pnand %p5868_p1, %p5862_p0 }
  0x98   : > { %473 = vmatpush1.msra.mxu0 %v425_v15  ;;  %552 = vmatpush1.msra.mxu1 %v406_v16  ;;  %v6251_v49 = vld [vmem:[#allocation2 + $0x20] sm:$0x3]  ;;  %v451_v56 = vsel %vm441_vm3, %v6239_v40, %v450_v51  ;;  %v625_v63 = vld [vmem:[#allocation6 + $0x180] sm:$0xff]  ;;  %v624_v1 = vld [vmem:[#allocation6 + $0x178] sm:$0xff]  ;;  %v640_v16 = vrot.slane %v6245_v45, 2 }
  0x99   : > { %474 = vmatprep.subr.mxu0 %v5949_v0  ;;  %553 = vmatprep.subr.mxu1 %v5949_v0  ;;  %v6235_v38 = vld [vmem:[#allocation2] sm:$0xff]  ;;  %v448_v54 = vrot.slane %v6251_v49, 1  ;;  %v622_v3 = vld [vmem:[#allocation6 + $0x168] sm:$0xff]  ;;  %v621_v4 = vld [vmem:[#allocation6 + $0x160] sm:$0xff]  ;;  %v638_v19 = vrot.slane %v6251_v49, 2 }
  0x9a   : > { %475 = vmatpush1.msra.mxu0 %v424_v21  ;;  %554 = vmatpush1.msra.mxu1 %v405_v22  ;;  %v442_v43 = vrot.slane %v6235_v38, 1  ;;  %v623_v2 = vld [vmem:[#allocation6 + $0x170] sm:$0xff]  ;;  %v620_v5 = vld [vmem:[#allocation6 + $0x158] sm:$0xff]  ;;  %v618_v7 = vld [vmem:[#allocation6 + $0x148] sm:$0xff]  ;;  %v632_v13 = vrot.slane %v6235_v38, 2  ;;  %v641_v20 = vsel %vm631_vm4, %v6265_v58, %v640_v16 }
  0x9b   : > { %476 = vmatprep.subr.mxu0 %v5949_v0  ;;  %555 = vmatprep.subr.mxu1 %v5949_v0  ;;  %v449_v60 = vsel %vm441_vm3, %v443_v44, %v448_v54  ;;  %v619_v6 = vld [vmem:[#allocation6 + $0x150] sm:$0xff]  ;;  %v617_v8 = vld [vmem:[#allocation6 + $0x140] sm:$0xff]  ;;  %v616_v9 = vld [vmem:[#allocation6 + $0x138] sm:$0xff]  ;;  %v639_v21 = vsel %vm631_vm4, %v633_v14, %v638_v19 }
  0x9c   : > { %477 = vmatpush1.msra.mxu0 %v423_v23  ;;  %556 = vmatpush1.msra.mxu1 %v404_v24  ;;  %v444_v52 = vsel %vm441_vm3, %v442_v43, %v443_v44  ;;  %v615_v10 = vld [vmem:[#allocation6 + $0x130] sm:$0xff]  ;;  %v614_v11 = vld [vmem:[#allocation6 + $0x128] sm:$0xff]  ;;  %v613_v12 = vld [vmem:[#allocation6 + $0x120] sm:$0xff]  ;;  %v634_v18 = vsel %vm631_vm4, %v632_v13, %v633_v14 }
  0x9d   : > { %478 = vmatprep.subr.mxu0 %v5949_v0  ;;  %557 = vmatprep.subr.mxu1 %v5949_v0  ;;  %v630_v15 = vld [vmem:[#allocation6 + $0x1a8] sm:$0xff]  ;;  %v629_v17 = vld [vmem:[#allocation6 + $0x1a0] sm:$0xff]  ;;  %v788_v24 = vld [vmem:[#allocation6 + $0x2b8] sm:$0xff] }
  0x9e   : > { %479 = vmatpush1.msra.mxu0 %v422_v25  ;;  %558 = vmatpush1.msra.mxu1 %v403_v26  ;;  %v769_v22 = vld [vmem:[#allocation6 + $0x228] sm:$0xff]  ;;  %v768_v23 = vld [vmem:[#allocation6 + $0x220] sm:$0xff]  ;;  %v767_v25 = vld [vmem:[#allocation6 + $0x218] sm:$0xff] }
  0x9f   : > { %480 = vmatprep.subr.mxu0 %v5949_v0  ;;  %559 = vmatprep.subr.mxu1 %v5949_v0  ;;  %v787_v26 = vld [vmem:[#allocation6 + $0x2b0] sm:$0xff]  ;;  %v781_v39 = vld [vmem:[#allocation6 + $0x280] sm:$0xff]  ;;  %v759_v43 = vld [vmem:[#allocation6 + $0x1d8] sm:$0xff] }
  0xa0   : > { %481 = vmatpush1.msra.mxu0 %v421_v27  ;;  %560 = vmatpush1.msra.mxu1 %v402_v28  ;;  %v786_v27 = vld [vmem:[#allocation6 + $0x2a8] sm:$0xff]  ;;  %v766_v28 = vld [vmem:[#allocation6 + $0x210] sm:$0xff]  ;;  %v756_v49 = vld [vmem:[#allocation6 + $0x1c0] sm:$0xff] }
  0xa1   : > { %482 = vmatprep.subr.mxu0 %v5949_v0  ;;  %561 = vmatprep.subr.mxu1 %v5949_v0  ;;  %v779_v44 = vld [vmem:[#allocation6 + $0x270] sm:$0xff]  ;;  %v755_v51 = vld [vmem:[#allocation6 + $0x1b8] sm:$0xff]  ;;  %v774_v54 = vld [vmem:[#allocation6 + $0x248] sm:$0xff] }
  0xa2   : > { %483 = vmatpush1.msra.mxu0 %v420_v29  ;;  %562 = vmatpush1.msra.mxu1 %v401_v30  ;;  %v785_v29 = vld [vmem:[#allocation6 + $0x2a0] sm:$0xff]  ;;  %v765_v30 = vld [vmem:[#allocation6 + $0x208] sm:$0xff]  ;;  %v758_v45 = vld [vmem:[#allocation6 + $0x1d0] sm:$0xff] }
  0xa3   : > { %484 = vmatprep.subr.mxu0 %v5949_v0  ;;  %563 = vmatprep.subr.mxu1 %v5949_v0  ;;  %v773_v57 = vld [vmem:[#allocation6 + $0x240] sm:$0xff] }
  0xa4   : > { %485 = vmatpush1.msra.mxu0 %v419_v31  ;;  %564 = vmatpush1.msra.mxu1 %v400_v32  ;;  %v784_v31 = vld [vmem:[#allocation6 + $0x298] sm:$0xff]  ;;  %v764_v32 = vld [vmem:[#allocation6 + $0x200] sm:$0xff] }
  0xa5   : > { %486 = vmatprep.subr.mxu0 %v5949_v0  ;;  %565 = vmatprep.subr.mxu1 %v5949_v0 }
  0xa6   : > { %487 = vmatpush1.msra.mxu0 %v418_v35  ;;  %566 = vmatpush1.msra.mxu1 %v399_v36  ;;  %v763_v35 = vld [vmem:[#allocation6 + $0x1f8] sm:$0xff]  ;;  %v762_v36 = vld [vmem:[#allocation6 + $0x1f0] sm:$0xff] }
  0xa7   : > { %488 = vmatprep.subr.mxu0 %v5949_v0  ;;  %567 = vmatprep.subr.mxu1 %v5949_v0 }
  0xa8   : > { %489 = vmatpush1.msra.mxu0 %v417_v41  ;;  %568 = vmatpush1.msra.mxu1 %v398_v42  ;;  %v760_v41 = vld [vmem:[#allocation6 + $0x1e0] sm:$0xff]  ;;  %v780_v42 = vld [vmem:[#allocation6 + $0x278] sm:$0xff] }
  0xa9   : > { %518 = vmatprep.subr.mxu0 %v5949_v0  ;;  %597 = vmatprep.subr.mxu1 %v5949_v0 }
  0xaa   : > { %519 = vmatpush2.msra.mxu0 %v434_v46  ;;  %598 = vmatpush2.msra.mxu1 %v415_v47  ;;  %v778_v46 = vld [vmem:[#allocation6 + $0x268] sm:$0xff] }
  0xab   : > { %520 = vmatprep.subr.mxu0 %v5949_v0  ;;  %5196 = vmatprep.mubr.msk.f32.mxu0 %vm371_vm0, %v447_v48  ;;  %v757_v47 = vld [vmem:[#allocation6 + $0x1c8] sm:$0xff] }
  0xac   : > { %521 = vmatpush2.msra.mxu0 %v433_v50  ;;  %599 = vmatprep.subr.mxu1 %v5949_v0  ;;  %v776_v50 = vld [vmem:[#allocation6 + $0x258] sm:$0xff] }
  0xad   : > { %523 = vmatmul.mubr.f32.vlgmr.msra.gmra.mxu0 %v444_v52  ;;  %600 = vmatpush2.msra.mxu1 %v414_v53  ;;  %v775_v52 = vld [vmem:[#allocation6 + $0x250] sm:$0xff] }
  0xae   : > { %5198 = vmatprep.mubr.msk.f32.mxu1 %vm371_vm0, %v6226_v33  ;;  %648 = vmatprep.subr.mxu0 %v5949_v0  ;;  %v754_v53 = vld [vmem:[#allocation6 + $0x1b0] sm:$0xff] }
  0xaf   : > { %602 = vmatmul.mubr.f32.vlgmr.msra.gmra.mxu1 %v6235_v38  ;;  %649 = vmatpush1.msra.mxu0 %v628_v55  ;;  %v782_v38 = vld [vmem:[#allocation6 + $0x288] sm:$0xff]  ;;  %v771_v55 = vld [vmem:[#allocation6 + $0x238] sm:$0xff] }
  0xb0   : > { %650 = vmatprep.subr.mxu0 %v5949_v0  ;;  %5197 = vmatprep.mubr.msk.f32.mxu0 %vm371_vm0, %v451_v56  ;;  %v770_v56 = vld [vmem:[#allocation6 + $0x230] sm:$0xff] }
  0xb1   : > { %651 = vmatpush1.msra.mxu0 %v627_v59  ;;  %5199 = vmatprep.mubr.msk.f32.mxu1 %vm371_vm0, %v6228_v34  ;;  %v790_v59 = vld [vmem:[#allocation6 + $0x2c8] sm:$0xff] }
  0xb2   : > { %652 = vmatprep.subr.mxu0 %v5949_v0  ;;  %528 = vmatmul.mubr.f32.gmra.mxu0 %v449_v60  ;;  %v789_v60 = vld [vmem:[#allocation6 + $0x2c0] sm:$0xff] }
  0xb3   : > { %653 = vmatpush1.msra.mxu0 %v626_v61  ;;  %607 = vmatmul.mubr.f32.gmra.mxu1 %v6233_v37  ;;  %v761_v37 = vld [vmem:[#allocation6 + $0x1e8] sm:$0xff] }
  0xb4   : > { %654 = vmatprep.subr.mxu0 %v5949_v0  ;;  %5200 = vmatprep.mubr.msk.f32.mxu0 %vm371_vm0, %v6278_v62 }
  0xb5   : > { %655 = vmatpush1.msra.mxu0 %v625_v63  ;;  %813 = vmatprep.subr.mxu1 %v5949_v0 }
  0xb6   : > { %656 = vmatprep.subr.mxu0 %v5949_v0  ;;  %5203 = vmatprep.mubr.msk.f32.mxu1 %vm371_vm0, %v447_v48  ;;  %v777_v48 = vld [vmem:[#allocation6 + $0x260] sm:$0xff] }
  0xb7   : > { %657 = vmatpush1.msra.mxu0 %v624_v1  ;;  %814 = vmatpush1.msra.mxu1 %v788_v24 }
  0xb8   : > { %658 = vmatprep.subr.mxu0 %v5949_v0  ;;  %815 = vmatprep.subr.mxu1 %v5949_v0 }
  0xb9   : > { %659 = vmatpush1.msra.mxu0 %v623_v2  ;;  %816 = vmatpush1.msra.mxu1 %v787_v26 }
  0xba   : > { %660 = vmatprep.subr.mxu0 %v5949_v0  ;;  %817 = vmatprep.subr.mxu1 %v5949_v0 }
  0xbb   : > { %661 = vmatpush1.msra.mxu0 %v622_v3  ;;  %818 = vmatpush1.msra.mxu1 %v786_v27 }
  0xbc   : > { %662 = vmatprep.subr.mxu0 %v5949_v0  ;;  %819 = vmatprep.subr.mxu1 %v5949_v0 }
  0xbd   : > { %663 = vmatpush1.msra.mxu0 %v621_v4  ;;  %820 = vmatpush1.msra.mxu1 %v785_v29 }
  0xbe   : > { %664 = vmatprep.subr.mxu0 %v5949_v0  ;;  %821 = vmatprep.subr.mxu1 %v5949_v0 }
  0xbf   : > { %665 = vmatpush1.msra.mxu0 %v620_v5  ;;  %822 = vmatpush1.msra.mxu1 %v784_v31  ;;  %v982_v31 = vld [vmem:[#allocation6 + $0x340] sm:$0xff] }
  0xc0   : > { %666 = vmatprep.subr.mxu0 %v5949_v0  ;;  %823 = vmatprep.subr.mxu1 %v5949_v0 }
  0xc1   : > { %667 = vmatpush1.msra.mxu0 %v619_v6 }
  0xc2   : > { %668 = vmatprep.subr.mxu0 %v5949_v0 }
  0xc3   : > { %669 = vmatpush1.msra.mxu0 %v618_v7 }
  0xc4   : > { %670 = vmatprep.subr.mxu0 %v5949_v0 }
  0xc5   : > { %671 = vmatpush1.msra.mxu0 %v617_v8 }
  0xc6   : > { %672 = vmatprep.subr.mxu0 %v5949_v0 }
  0xc7   : > { %673 = vmatpush1.msra.mxu0 %v616_v9  ;;  %v5202_v9 = vld [vmem:[#allocation8] ss:$0 sm:$0xff] }
  0xc8   : > { %674 = vmatprep.subr.mxu0 %v5949_v0 }
  0xc9   : > { %675 = vmatpush1.msra.mxu0 %v615_v10 }
  0xca   : > { %676 = vmatprep.subr.mxu0 %v5949_v0 }
  0xcb   : > { %677 = vmatpush1.msra.mxu0 %v614_v11 }
  0xcc   : > { %678 = vmatprep.subr.mxu0 %v5949_v0 }
  0xcd   : > { %679 = vmatpush1.msra.mxu0 %v613_v12 }
  0xce   : > { %708 = vmatprep.subr.mxu0 %v5949_v0 }
  0xcf   : > { %709 = vmatpush2.msra.mxu0 %v630_v15 }
  0xd0   : > { %710 = vmatprep.subr.mxu0 %v5949_v0 }
  0xd1   : > { %711 = vmatpush2.msra.mxu0 %v629_v17 }
  0xd2   : > { %713 = vmatmul.mubr.f32.vlgmr.msra.gmra.mxu0 %v634_v18  ;;  %892 = vmatprep.subr.mxu0 %v5949_v0 }
  0xd3   : > { %5201 = vmatprep.mubr.msk.f32.mxu0 %vm371_vm0, %v641_v20  ;;  %893 = vmatpush1.msra.mxu0 %v769_v22  ;;  %v6349_v22 = vld [vmem:[#allocation2 + $0x28] sm:$0x3] }
  0xd4   : > { %894 = vmatprep.subr.mxu0 %v5949_v0  ;;  %v805_v24 = vrot.slane %v6349_v22, 1 }
  0xd5   : > { %895 = vmatpush1.msra.mxu0 %v768_v23 }
  0xd6   : > { %718 = vmatmul.mubr.f32.gmra.mxu0 %v639_v21  ;;  %896 = vmatprep.subr.mxu0 %v5949_v0 }
  0xd7   : > { %5205 = vmatprep.mubr.msk.f32.mxu0 %vm371_vm0, %v6226_v33  ;;  %897 = vmatpush1.msra.mxu0 %v767_v25  ;;  %v783_v33 = vld [vmem:[#allocation6 + $0x290] sm:$0xff] }
  0xd8   : > { %898 = vmatprep.subr.mxu0 %v5949_v0  ;;  %824 = vmatpush1.msra.mxu1 %v783_v33 }
  0xd9   : > { %899 = vmatpush1.msra.mxu0 %v766_v28  ;;  %825 = vmatprep.subr.mxu1 %v5949_v0  ;;  %v983_v28 = vld [vmem:[#allocation6 + $0x348] sm:$0xff] }
  0xda   : > { %900 = vmatprep.subr.mxu0 %v5949_v0  ;;  %826 = vmatpush1.msra.mxu1 %v782_v38  ;;  %v977_v38 = vld [vmem:[#allocation6 + $0x318] sm:$0xff] }
  0xdb   : > { %901 = vmatpush1.msra.mxu0 %v765_v30  ;;  %827 = vmatprep.subr.mxu1 %v5949_v0  ;;  %v806_v30 = vsel %vm441_vm3, %v6239_v40, %v805_v24  ;;  %v980_v40 = vld [vmem:[#allocation6 + $0x330] sm:$0xff] }
  0xdc   : > { %902 = vmatprep.subr.mxu0 %v5949_v0  ;;  %828 = vmatpush1.msra.mxu1 %v781_v39  ;;  %v976_v39 = vld [vmem:[#allocation6 + $0x310] sm:$0xff] }
  0xdd   : > { %903 = vmatpush1.msra.mxu0 %v764_v32  ;;  %829 = vmatprep.subr.mxu1 %v5949_v0 }
  0xde   : > { %904 = vmatprep.subr.mxu0 %v5949_v0  ;;  %830 = vmatpush1.msra.mxu1 %v780_v42  ;;  %v973_v42 = vld [vmem:[#allocation6 + $0x2f8] sm:$0xff] }
  0xdf   : > { %905 = vmatpush1.msra.mxu0 %v763_v35  ;;  %831 = vmatprep.subr.mxu1 %v5949_v0 }
  0xe0   : > { %906 = vmatprep.subr.mxu0 %v5949_v0  ;;  %832 = vmatpush1.msra.mxu1 %v779_v44  ;;  %v971_v44 = vld [vmem:[#allocation6 + $0x2e8] sm:$0xff] }
  0xe1   : > { %907 = vmatpush1.msra.mxu0 %v762_v36  ;;  %833 = vmatprep.subr.mxu1 %v5949_v0  ;;  %v979_v36 = vld [vmem:[#allocation6 + $0x328] sm:$0xff] }
  0xe2   : > { %908 = vmatprep.subr.mxu0 %v5949_v0  ;;  %834 = vmatpush1.msra.mxu1 %v778_v46  ;;  %v969_v46 = vld [vmem:[#allocation6 + $0x2d8] sm:$0xff] }
  0xe3   : > { %909 = vmatpush1.msra.mxu0 %v761_v37  ;;  %835 = vmatprep.subr.mxu1 %v5949_v0  ;;  %v978_v37 = vld [vmem:[#allocation6 + $0x320] sm:$0xff] }
  0xe4   : > { %910 = vmatprep.subr.mxu0 %v5949_v0  ;;  %836 = vmatpush1.msra.mxu1 %v777_v48  ;;  %v985_v48 = vld [vmem:[#allocation6 + $0x358] sm:$0xff] }
  0xe5   : > { %911 = vmatpush1.msra.mxu0 %v760_v41  ;;  %837 = vmatprep.subr.mxu1 %v5949_v0  ;;  %v975_v41 = vld [vmem:[#allocation6 + $0x308] sm:$0xff] }
  0xe6   : > { %912 = vmatprep.subr.mxu0 %v5949_v0  ;;  %838 = vmatpush1.msra.mxu1 %v776_v50 }
  0xe7   : > { %913 = vmatpush1.msra.mxu0 %v759_v43  ;;  %839 = vmatprep.subr.mxu1 %v5949_v0  ;;  %v972_v43 = vld [vmem:[#allocation6 + $0x2f0] sm:$0xff] }
  0xe8   : > { %914 = vmatprep.subr.mxu0 %v5949_v0  ;;  %840 = vmatpush1.msra.mxu1 %v775_v52 }
  0xe9   : > { %915 = vmatpush1.msra.mxu0 %v758_v45  ;;  %841 = vmatprep.subr.mxu1 %v5949_v0  ;;  %v970_v45 = vld [vmem:[#allocation6 + $0x2e0] sm:$0xff] }
  0xea   : > { %916 = vmatprep.subr.mxu0 %v5949_v0  ;;  %842 = vmatpush1.msra.mxu1 %v774_v54 }
  0xeb   : > { %917 = vmatpush1.msra.mxu0 %v757_v47  ;;  %843 = vmatprep.subr.mxu1 %v5949_v0  ;;  %v968_v47 = vld [vmem:[#allocation6 + $0x2d0] sm:$0xff] }
  0xec   : > { %918 = vmatprep.subr.mxu0 %v5949_v0  ;;  %844 = vmatpush1.msra.mxu1 %v773_v57  ;;  %v1111_v57 = vld [vmem:[%s7693_s3 + $0x78] sm:$0xff] }
  0xed   : > { %919 = vmatpush1.msra.mxu0 %v756_v49  ;;  %873 = vmatprep.subr.mxu1 %v5949_v0  ;;  %v994_v49 = vrot.slane %v6349_v22, 2 }
  0xee   : > { %920 = vmatprep.subr.mxu0 %v5949_v0  ;;  %874 = vmatpush2.msra.mxu1 %v790_v59  ;;  %v1109_v59 = vld [vmem:[%s7693_s3 + $0x68] sm:$0xff] }
  0xef   : > { %921 = vmatpush1.msra.mxu0 %v755_v51  ;;  %875 = vmatprep.subr.mxu1 %v5949_v0  ;;  %v984_v51 = vld [vmem:[#allocation6 + $0x350] sm:$0xff] }
  0xf0   : > { %922 = vmatprep.subr.mxu0 %v5949_v0  ;;  %876 = vmatpush2.msra.mxu1 %v789_v60  ;;  %v1108_v60 = vld [vmem:[%s7693_s3 + $0x60] sm:$0xff] }
  0xf1   : > { %923 = vmatpush1.msra.mxu0 %v754_v53  ;;  %1002 = vmatprep.subr.mxu1 %v5949_v0  ;;  %v995_v53 = vsel %vm631_vm4, %v6265_v58, %v994_v49  ;;  %v1110_v58 = vld [vmem:[%s7693_s3 + $0x70] sm:$0xff]  ;;  %v1307_v49 = vld [vmem:[#allocation6 + $0x3b8] sm:$0xff] }
  0xf2   : > { %952 = vmatprep.subr.mxu0 %v5949_v0 }
  0xf3   : > { %953 = vmatpush2.msra.mxu0 %v771_v55 }
  0xf4   : > { %954 = vmatprep.subr.mxu0 %v5949_v0 }
  0xf5   : > { %955 = vmatpush2.msra.mxu0 %v770_v56 }
  0xf6   : > { %5412 = vmatprep.subr.mxu0 %v5949_v0 }
 0x16d   : > { %v524_v61 = vpop.f32.mrf.mxu0 }
 0x16f   : > { %v603_v63 = vpop.f32.mrf.mxu1  ;;  %v526_v1 = vpop.f32.mrf.mxu0 }
 0x170   : > { %v604_v7 = vadd.f32 %v603_v63, %v524_v61  ;;  %v1107_v61 = vld [vmem:[%s7693_s3 + $0x58] sm:$0xff]  ;;  %v1106_v63 = vld [vmem:[%s7693_s3 + $0x50] sm:$0xff]  ;;  %v1105_v1 = vld [vmem:[%s7693_s3 + $0x48] sm:$0xff] }
 0x171   : > { %v605_v2 = vpop.f32.mrf.mxu1 }
 0x172   : > { %v529_v3 = vpop.f32.mrf.mxu0  ;;  %v1104_v2 = vld [vmem:[%s7693_s3 + $0x40] sm:$0xff] }
 0x173   : > { %v608_v4 = vpop.f32.mrf.mxu1 }
 0x174   : > { %v531_v5 = vpop.f32.mrf.mxu0  ;;  %v609_v12 = vadd.f32 %v608_v4, %v529_v3  ;;  %v1103_v3 = vld [vmem:[%s7693_s3 + $0x38] sm:$0xff]  ;;  %v1102_v4 = vld [vmem:[%s7693_s3 + $0x30] sm:$0xff] }
 0x175   : > { %v610_v6 = vpop.f32.mrf.mxu1  ;;  %v1101_v5 = vld [vmem:[%s7693_s3 + $0x28] sm:$0xff] }
 0x176   : > { %v1100_v6 = vld [vmem:[%s7693_s3 + $0x20] sm:$0xff] }
 0x192   : > { %v714_v8 = vpop.f32.mrf.mxu0 }
 0x193   : > { %v723_v10 = vadd.f32 %v714_v8, %v604_v7  ;;  %v1099_v7 = vld [vmem:[%s7693_s3 + $0x18] sm:$0xff]  ;;  %v1098_v8 = vld [vmem:[%s7693_s3 + $0x10] sm:$0xff] }
 0x194   : > { %v716_v11 = vpop.f32.mrf.mxu0 }
 0x195   : > { %v732_v13 = vadd.f32 %v5202_v9, %v723_v10  ;;  %v1096_v10 = vld [vmem:[%s7693_s3] sm:$0xff]  ;;  %v1184_v11 = vld [vmem:[#allocation11] sm:$0xf] }
 0x196   : > { %v719_v14 = vpop.f32.mrf.mxu0 }
 0x197   : > { %v734_v15 = vmax.f32 %v732_v13, 0.0  ;;  %v724_v16 = vadd.f32 %v719_v14, %v609_v12 }
 0x198   : > { %v721_v17 = vpop.f32.mrf.mxu0 }
 0x199   : > { %v738_v18 = vrot.slane %v734_v15, 7  ;;  %v733_v19 = vadd.f32 %v5202_v9, %v724_v16  ;;  %v1097_v9 = vld [vmem:[%s7693_s3 + $0x8] sm:$0xff] }
 0x19b   : > { %744 = vst [vmem:[#allocation2] sm:$0xfe] %v738_v18  ;;  %v735_v20 = vmax.f32 %v733_v19, 0.0 }
 0x19d   : > { %v739_v21 = vrot.slane %v735_v20, 7 }
 0x19f   : > { %746 = vst [vmem:[#allocation2 + $0x20] sm:$0x1] %v739_v21  ;;  %v6352_v23 = vsel %vm382_vm2, %v738_v18, %v739_v21 }
 0x1a0   : > { %v798_v26 = vrot.slane %v6352_v23, 1  ;;  %v987_v52 = vrot.slane %v6352_v23, 2 }
 0x1a2   : > { %v6355_v25 = vld [vmem:[#allocation2] sm:$0xff] }
 0x1a3   : > { %957 = vmatmul.mubr.f32.vlgmr.msra.gmra.mxu0 %v6355_v25  ;;  %v797_v27 = vrot.slane %v6355_v25, 1  ;;  %v986_v50 = vrot.slane %v6355_v25, 2  ;;  %v5209_v25 = vld [vmem:[#allocation8 + $0x1] ss:$0 sm:$0xff] }
 0x1a4   : > { %5206 = vmatprep.mubr.msk.f32.mxu0 %vm371_vm0, %v6228_v34  ;;  %v981_v34 = vld [vmem:[#allocation6 + $0x338] sm:$0xff]  ;;  %5413 = vmatpush3.msra.mxu0 %v1111_v57 }
 0x1a5   : > { %v799_v29 = vsel %vm441_vm3, %v797_v27, %v798_v26  ;;  %v988_v54 = vsel %vm631_vm4, %v986_v50, %v987_v52  ;;  %5414 = vmatprep.subr.mxu0 %v5949_v0  ;;  %v1327_v50 = vld [vmem:[#allocation6 + $0x450] sm:$0xff]  ;;  %v1303_v57 = vld [vmem:[#allocation6 + $0x398] sm:$0xff] }
 0x1a6   : > { %878 = vmatmul.mubr.f32.vlgmr.msra.gmra.mxu1 %v799_v29  ;;  %v6365_v32 = vld [vmem:[#allocation2 + $0x20] sm:$0x3]  ;;  %5415 = vmatpush3.msra.mxu0 %v1110_v58 }
 0x1a7   : > { %962 = vmatmul.mubr.f32.gmra.mxu0 %v6352_v23  ;;  %1003 = vmatpush1.msra.mxu1 %v983_v28  ;;  %v803_v33 = vrot.slane %v6365_v32, 1  ;;  %v992_v55 = vrot.slane %v6365_v32, 2  ;;  %v1323_v58 = vld [vmem:[#allocation6 + $0x430] sm:$0xff] }
 0x1a8   : > { %1004 = vmatprep.subr.mxu1 %v5949_v0  ;;  %5204 = vmatprep.mubr.msk.f32.mxu1 %vm371_vm0, %v806_v30 }
 0x1a9   : > { %1005 = vmatpush1.msra.mxu1 %v982_v31  ;;  %v804_v35 = vsel %vm441_vm3, %v798_v26, %v803_v33  ;;  %v993_v56 = vsel %vm631_vm4, %v987_v52, %v992_v55  ;;  %5416 = vmatprep.subr.mxu0 %v5949_v0  ;;  %v1326_v52 = vld [vmem:[#allocation6 + $0x448] sm:$0xff]  ;;  %v1304_v55 = vld [vmem:[#allocation6 + $0x3a0] sm:$0xff] }
 0x1aa   : > { %1006 = vmatprep.subr.mxu1 %v5949_v0  ;;  %883 = vmatmul.mubr.f32.gmra.mxu1 %v804_v35 }
 0x1ab   : > { %1007 = vmatpush1.msra.mxu1 %v981_v34  ;;  %5207 = vmatprep.mubr.msk.f32.mxu1 %vm371_vm0, %v6278_v62  ;;  %v974_v62 = vld [vmem:[#allocation6 + $0x300] sm:$0xff] }
 0x1ac   : > { %1008 = vmatprep.subr.mxu1 %v5949_v0  ;;  %5417 = vmatpush3.msra.mxu0 %v1109_v59  ;;  %v1302_v59 = vld [vmem:[#allocation6 + $0x390] sm:$0xff] }
 0x1ad   : > { %1009 = vmatpush1.msra.mxu1 %v980_v40  ;;  %5418 = vmatprep.subr.mxu0 %v5949_v0 }
 0x1ae   : > { %1010 = vmatprep.subr.mxu1 %v5949_v0  ;;  %5419 = vmatpush3.msra.mxu0 %v1108_v60  ;;  %v1322_v60 = vld [vmem:[#allocation6 + $0x428] sm:$0xff] }
 0x1af   : > { %1011 = vmatpush1.msra.mxu1 %v979_v36  ;;  %5420 = vmatprep.subr.mxu0 %v5949_v0 }
 0x1b0   : > { %1012 = vmatprep.subr.mxu1 %v5949_v0  ;;  %5421 = vmatpush3.msra.mxu0 %v1107_v61  ;;  %v1301_v61 = vld [vmem:[#allocation6 + $0x388] sm:$0xff] }
 0x1b1   : > { %1013 = vmatpush1.msra.mxu1 %v978_v37  ;;  %5422 = vmatprep.subr.mxu0 %v5949_v0  ;;  %v1112_v37 = vld [vmem:[#allocation9] sm:$0x1] }
 0x1b2   : > { %1014 = vmatprep.subr.mxu1 %v5949_v0  ;;  %5423 = vmatpush3.msra.mxu0 %v1106_v63  ;;  %v1321_v63 = vld [vmem:[#allocation6 + $0x420] sm:$0xff] }
 0x1b3   : > { %1015 = vmatpush1.msra.mxu1 %v977_v38  ;;  %5424 = vmatprep.subr.mxu0 %v5949_v0 }
 0x1b4   : > { %1016 = vmatprep.subr.mxu1 %v5949_v0  ;;  %5425 = vmatpush3.msra.mxu0 %v1105_v1  ;;  %v1300_v1 = vld [vmem:[#allocation6 + $0x380] sm:$0xff] }
 0x1b5   : > { %1017 = vmatpush1.msra.mxu1 %v976_v39  ;;  %5426 = vmatprep.subr.mxu0 %v5949_v0 }
 0x1b6   : > { %1018 = vmatprep.subr.mxu1 %v5949_v0  ;;  %5427 = vmatpush3.msra.mxu0 %v1104_v2  ;;  %v1320_v2 = vld [vmem:[#allocation6 + $0x418] sm:$0xff] }
 0x1b7   : > { %1019 = vmatpush1.msra.mxu1 %v975_v41  ;;  %5428 = vmatprep.subr.mxu0 %v5949_v0 }
 0x1b8   : > { %1020 = vmatprep.subr.mxu1 %v5949_v0  ;;  %5429 = vmatpush3.msra.mxu0 %v1103_v3  ;;  %v1299_v3 = vld [vmem:[#allocation6 + $0x378] sm:$0xff] }
 0x1b9   : > { %1021 = vmatpush1.msra.mxu1 %v974_v62  ;;  %5430 = vmatprep.subr.mxu0 %v5949_v0 }
 0x1ba   : > { %1022 = vmatprep.subr.mxu1 %v5949_v0  ;;  %5431 = vmatpush3.msra.mxu0 %v1102_v4  ;;  %v1319_v4 = vld [vmem:[#allocation6 + $0x410] sm:$0xff] }
 0x1bb   : > { %1023 = vmatpush1.msra.mxu1 %v973_v42  ;;  %5432 = vmatprep.subr.mxu0 %v5949_v0  ;;  %v1311_v42 = vld [vmem:[#allocation6 + $0x3d8] sm:$0xff] }
 0x1bc   : > { %1024 = vmatprep.subr.mxu1 %v5949_v0  ;;  %5433 = vmatpush3.msra.mxu0 %v1101_v5  ;;  %v1298_v5 = vld [vmem:[#allocation6 + $0x370] sm:$0xff] }
 0x1bd   : > { %1025 = vmatpush1.msra.mxu1 %v972_v43  ;;  %5434 = vmatprep.subr.mxu0 %v5949_v0  ;;  %v1310_v43 = vld [vmem:[#allocation6 + $0x3d0] sm:$0xff] }
 0x1be   : > { %1026 = vmatprep.subr.mxu1 %v5949_v0  ;;  %5435 = vmatpush3.msra.mxu0 %v1100_v6  ;;  %v1318_v6 = vld [vmem:[#allocation6 + $0x408] sm:$0xff] }
 0x1bf   : > { %1027 = vmatpush1.msra.mxu1 %v971_v44  ;;  %5436 = vmatprep.subr.mxu0 %v5949_v0  ;;  %v1330_v44 = vld [vmem:[#allocation6 + $0x468] sm:$0xff] }
 0x1c0   : > { %1028 = vmatprep.subr.mxu1 %v5949_v0  ;;  %5437 = vmatpush3.msra.mxu0 %v1099_v7  ;;  %v1297_v7 = vld [vmem:[#allocation6 + $0x368] sm:$0xff] }
 0x1c1   : > { %1029 = vmatpush1.msra.mxu1 %v970_v45  ;;  %5438 = vmatprep.subr.mxu0 %v5949_v0  ;;  %v1309_v45 = vld [vmem:[#allocation6 + $0x3c8] sm:$0xff] }
 0x1c2   : > { %1030 = vmatprep.subr.mxu1 %v5949_v0  ;;  %5439 = vmatpush3.msra.mxu0 %v1098_v8  ;;  %v1317_v8 = vld [vmem:[#allocation6 + $0x400] sm:$0xff] }
 0x1c3   : > { %1031 = vmatpush1.msra.mxu1 %v969_v46  ;;  %5440 = vmatprep.subr.mxu0 %v5949_v0  ;;  %v1329_v46 = vld [vmem:[#allocation6 + $0x460] sm:$0xff] }
 0x1c4   : > { %1032 = vmatprep.subr.mxu1 %v5949_v0  ;;  %5441 = vmatpush3.msra.mxu0 %v1097_v9  ;;  %v1296_v9 = vld [vmem:[#allocation6 + $0x360] sm:$0xff] }
 0x1c5   : > { %1033 = vmatpush1.msra.mxu1 %v968_v47  ;;  %5442 = vmatprep.subr.mxu0 %v5949_v0  ;;  %v1308_v47 = vld [vmem:[#allocation6 + $0x3c0] sm:$0xff] }
 0x1c6   : > { %1062 = vmatprep.subr.mxu1 %v5949_v0  ;;  %5443 = vmatpush3.msra.mxu0 %v1096_v10  ;;  %v1316_v10 = vld [vmem:[#allocation6 + $0x3f8] sm:$0xff] }
 0x1c7   : > { %1063 = vmatpush2.msra.mxu1 %v985_v48  ;;  %5444 = vmatprep.mubr.msk.f32.mxu0 %vm5950_vm5, %v5949_v0  ;;  %v1328_v48 = vld [vmem:[#allocation6 + $0x458] sm:$0xff] }
 0x1c8   : > { %1064 = vmatprep.subr.mxu1 %v5949_v0  ;;  %1434 = vmatprep.subr.mxu0 %v5949_v0 }
 0x1c9   : > { %1065 = vmatpush2.msra.mxu1 %v984_v51  ;;  %v1306_v51 = vld [vmem:[#allocation6 + $0x3b0] sm:$0xff] }
 0x1ca   : > { %1067 = vmatmul.mubr.f32.vlgmr.msra.gmra.mxu1 %v988_v54  ;;  %5447 = vmatprep.subr.mxu1 %v5949_v0  ;;  %v1325_v54 = vld [vmem:[#allocation6 + $0x440] sm:$0xff] }
 0x1cb   : > { %5208 = vmatprep.mubr.msk.f32.mxu1 %vm371_vm0, %v995_v53  ;;  %5448 = vmatpush3.msk.msra.mxu1 %vm1190_vm6, %v1184_v11  ;;  %v1305_v53 = vld [vmem:[#allocation6 + $0x3a8] sm:$0xff] }
 0x1cc   : > { %1355 = vmatprep.subr.mxu1 %v5949_v0  ;;  %v1313_v11 = vld [vmem:[#allocation6 + $0x3e8] sm:$0xff] }
 0x1ce   : > { %1072 = vmatmul.mubr.f32.gmra.mxu1 %v993_v56  ;;  %v1324_v56 = vld [vmem:[#allocation6 + $0x438] sm:$0xff] }
 0x1cf   : > { %5449 = vmatprep.mubr.msk.f32.mxu1 %vm5950_vm5, %v5949_v0 }
 0x263   : > { %v958_v12 = vpop.f32.mrf.mxu0 }
 0x265   : > { %v960_v13 = vpop.f32.mrf.mxu0 }
 0x266   : > { %v879_v14 = vpop.f32.mrf.mxu1  ;;  %v6506_v13 = vld [vmem:[#allocation2 + $0x8] sm:$0xff] }
 0x267   : > { %v963_v15 = vpop.f32.mrf.mxu0  ;;  %v959_v21 = vadd.f32 %v958_v12, %v879_v14  ;;  %v1315_v12 = vld [vmem:[#allocation6 + $0x3f0] sm:$0xff]  ;;  %v1312_v14 = vld [vmem:[#allocation6 + $0x3e0] sm:$0xff] }
 0x268   : > { %v881_v16 = vpop.f32.mrf.mxu1 }
 0x269   : > { %v965_v17 = vpop.f32.mrf.mxu0  ;;  %v1332_v16 = vld [vmem:[#allocation6 + $0x478] sm:$0xff] }
 0x26a   : > { %v884_v18 = vpop.f32.mrf.mxu1  ;;  %v6513_v17 = vld [vmem:[#allocation2 + $0x18] sm:$0xff] }
 0x26b   : > { %v964_v23 = vadd.f32 %v963_v15, %v884_v18  ;;  %v1342_v15 = vrot.slane %v6506_v13, 1  ;;  %v6518_v18 = vrot.slane %v6513_v17, 1 }
 0x26c   : > { %v886_v19 = vpop.f32.mrf.mxu1 }
 0x26d   : > { %v1331_v19 = vld [vmem:[#allocation6 + $0x470] sm:$0xff] }
 0x28a   : > { %v1068_v20 = vpop.f32.mrf.mxu1 }
 0x28b   : > { %v1077_v24 = vadd.f32 %v1068_v20, %v959_v21  ;;  %v1344_v20 = vsel %vm441_vm3, %v1342_v15, %v6518_v18  ;;  %v1185_v21 = vld [vmem:[#allocation12] sm:$0x1] }
 0x28c   : > { %v1070_v22 = vpop.f32.mrf.mxu1 }
 0x28d   : > { %v6470_v29 = vadd.f32 %v5209_v25, %v1077_v24 }
 0x28e   : > { %v1073_v26 = vpop.f32.mrf.mxu1 }
 0x28f   : > { %v1078_v27 = vadd.f32 %v1073_v26, %v964_v23 }
 0x290   : > { %v1075_v28 = vpop.f32.mrf.mxu1 }
 0x291   : > { %v6472_v30 = vadd.f32 %v5209_v25, %v1078_v27 }
 0x293   : > { %v1089_v31 = vadd.f32 %v6472_v30, %v6470_v29 }
 0x295   : > { %v1090_v32 = vrot.slane %v1089_v31, 4 }
 0x297   : > { %v1091_v33 = vadd.f32 %v1090_v32, %v1089_v31  ;;  %v1270_v31 = vlaneseq }
 0x299   : > { %v1092_v34 = vrot.slane %v1091_v33, 2  ;;  %v1271_v32 = vshrl.u32 %v1270_v31, 7  ;;  %v1681_v31 = vld [vmem:[#allocation6 + $0x5f8] sm:$0xff] }
 0x29b   : > { %v1093_v35 = vadd.f32 %v1092_v34, %v1091_v33  ;;  %v6526_v33 = vsub.s32 0, %v1271_v32  ;;  %v1661_v32 = vld [vmem:[#allocation6 + $0x560] sm:$0xff] }
 0x29d   : > { %v1094_v40 = vrot.slane %v1093_v35, 1 }
 0x29f   : > { %v1095_v36 = vadd.f32 %v1094_v40, %v1093_v35 }
 0x2a1   : > { %5445 = vmatmul.mubr.f32.vlgmr.msra.gmra.mxu0 %v1095_v36 }
 0x2a2   : > { %1435 = vmatpush1.msra.mxu0 %v1311_v42  ;;  %5214 = vmatprep.mubr.msk.f32.mxu0 %vm371_vm0, %v6506_v13 }
 0x2a3   : > { %1436 = vmatprep.subr.mxu0 %v5949_v0 }
 0x2a4   : > { %1437 = vmatpush1.msra.mxu0 %v1310_v43  ;;  %v6539_v43 = vld [vmem:[#allocation2 + $0x28] sm:$0x3] }
 0x2a5   : > { %1438 = vmatprep.subr.mxu0 %v5949_v0 }
 0x2a6   : > { %1439 = vmatpush1.msra.mxu0 %v1309_v45 }
 0x2a7   : > { %1440 = vmatprep.subr.mxu0 %v5949_v0 }
 0x2a8   : > { %1441 = vmatpush1.msra.mxu0 %v1308_v47 }
 0x2a9   : > { %1442 = vmatprep.subr.mxu0 %v5949_v0 }
 0x2aa   : > { %1443 = vmatpush1.msra.mxu0 %v1307_v49  ;;  %v1525_v49 = vld [vmem:[#allocation6 + $0x4f8] sm:$0xff] }
 0x2ab   : > { %1444 = vmatprep.subr.mxu0 %v5949_v0 }
 0x2ac   : > { %1445 = vmatpush1.msra.mxu0 %v1306_v51 }
 0x2ad   : > { %1446 = vmatprep.subr.mxu0 %v5949_v0 }
 0x2ae   : > { %1447 = vmatpush1.msra.mxu0 %v1305_v53 }
 0x2af   : > { %1448 = vmatprep.subr.mxu0 %v5949_v0 }
 0x2b0   : > { %1449 = vmatpush1.msra.mxu0 %v1304_v55  ;;  %v1523_v55 = vld [vmem:[#allocation6 + $0x4e8] sm:$0xff] }
 0x2b1   : > { %1450 = vmatprep.subr.mxu0 %v5949_v0 }
 0x2b2   : > { %1451 = vmatpush1.msra.mxu0 %v1303_v57 }
 0x2b3   : > { %1452 = vmatprep.subr.mxu0 %v5949_v0 }
 0x2b4   : > { %1453 = vmatpush1.msra.mxu0 %v1302_v59  ;;  %v1521_v59 = vld [vmem:[#allocation6 + $0x4d8] sm:$0xff] }
 0x2b5   : > { %1454 = vmatprep.subr.mxu0 %v5949_v0 }
 0x2b6   : > { %1455 = vmatpush1.msra.mxu0 %v1301_v61  ;;  %v1519_v61 = vld [vmem:[#allocation6 + $0x4c8] sm:$0xff] }
 0x2b7   : > { %1456 = vmatprep.subr.mxu0 %v5949_v0 }
 0x2b8   : > { %1457 = vmatpush1.msra.mxu0 %v1300_v1  ;;  %v1517_v1 = vld [vmem:[#allocation6 + $0x4b8] sm:$0xff] }
 0x2b9   : > { %1458 = vmatprep.subr.mxu0 %v5949_v0 }
 0x2ba   : > { %1459 = vmatpush1.msra.mxu0 %v1299_v3  ;;  %v1515_v3 = vld [vmem:[#allocation6 + $0x4a8] sm:$0xff] }
 0x2bb   : > { %1460 = vmatprep.subr.mxu0 %v5949_v0 }
 0x2bc   : > { %1461 = vmatpush1.msra.mxu0 %v1298_v5  ;;  %v1513_v5 = vld [vmem:[#allocation6 + $0x498] sm:$0xff] }
 0x2bd   : > { %1462 = vmatprep.subr.mxu0 %v5949_v0 }
 0x2be   : > { %1463 = vmatpush1.msra.mxu0 %v1297_v7  ;;  %v1511_v7 = vld [vmem:[#allocation6 + $0x488] sm:$0xff] }
 0x2bf   : > { %1464 = vmatprep.subr.mxu0 %v5949_v0 }
 0x2c0   : > { %1465 = vmatpush1.msra.mxu0 %v1296_v9  ;;  %v1527_v9 = vld [vmem:[#allocation6 + $0x508] sm:$0xff] }
 0x2c1   : > { %1494 = vmatprep.subr.mxu0 %v5949_v0 }
 0x2c2   : > { %1495 = vmatpush2.msra.mxu0 %v1313_v11 }
 0x2c3   : > { %1496 = vmatprep.subr.mxu0 %v5949_v0 }
 0x2c4   : > { %1497 = vmatpush2.msra.mxu0 %v1312_v14 }
 0x2c5   : > { %1710 = vmatprep.subr.mxu0 %v5949_v0 }
 0x361   : > { %v1179_v38 = vpop.f32.mrf.mxu0 }
 0x362   : > { %v1180_v39 = vadd.f32 %v1179_v38, %v1112_v37  ;;  %v5695_v37 = vld [vmem:[%s6173_s9] sm:$0xff] }
 0x363   : > { %v5446_v41 = vpop.f32.mrf.mxu0 }
 0x364   : > { %v1183_v62 = vmax.f32 %v1180_v39, 0.0  ;;  %v5696_v39 = vld [vmem:[%s6173_s9 + $0x8] sm:$0xff] }
 0x366   : > { %5450 = vmatmul.mubr.msk.f32.vlgmr.msra.gmra.mxu1 %vm1186_vm7, %v1183_v62 }
 0x367   : > { %1356 = vmatpush1.msra.mxu1 %v1330_v44  ;;  %5212 = vmatprep.mubr.msk.f32.mxu1 %vm371_vm0, %v1344_v20 }
 0x368   : > { %1357 = vmatprep.subr.mxu1 %v5949_v0 }
 0x369   : > { %1358 = vmatpush1.msra.mxu1 %v1329_v46 }
 0x36a   : > { %1359 = vmatprep.subr.mxu1 %v5949_v0 }
 0x36b   : > { %1360 = vmatpush1.msra.mxu1 %v1328_v48  ;;  %v1531_v48 = vrot.slane %v6506_v13, 2 }
 0x36c   : > { %1361 = vmatprep.subr.mxu1 %v5949_v0 }
 0x36d   : > { %1362 = vmatpush1.msra.mxu1 %v1327_v50  ;;  %v6556_v50 = vrot.slane %v6513_v17, 2 }
 0x36e   : > { %1363 = vmatprep.subr.mxu1 %v5949_v0 }
 0x36f   : > { %1364 = vmatpush1.msra.mxu1 %v1326_v52 }
 0x370   : > { %1365 = vmatprep.subr.mxu1 %v5949_v0 }
 0x371   : > { %1366 = vmatpush1.msra.mxu1 %v1325_v54  ;;  %v1524_v54 = vld [vmem:[#allocation6 + $0x4f0] sm:$0xff] }
 0x372   : > { %1367 = vmatprep.subr.mxu1 %v5949_v0 }
 0x373   : > { %1368 = vmatpush1.msra.mxu1 %v1324_v56  ;;  %v6567_v56 = vsel %vm631_vm4, %v1531_v48, %v6556_v50  ;;  %v1673_v48 = vld [vmem:[#allocation6 + $0x5b8] sm:$0xff] }
 0x374   : > { %1369 = vmatprep.subr.mxu1 %v5949_v0 }
 0x375   : > { %1370 = vmatpush1.msra.mxu1 %v1323_v58  ;;  %v1522_v58 = vld [vmem:[#allocation6 + $0x4e0] sm:$0xff] }
 0x376   : > { %1371 = vmatprep.subr.mxu1 %v5949_v0 }
 0x377   : > { %1372 = vmatpush1.msra.mxu1 %v1322_v60  ;;  %v1520_v60 = vld [vmem:[#allocation6 + $0x4d0] sm:$0xff] }
 0x378   : > { %1373 = vmatprep.subr.mxu1 %v5949_v0 }
 0x379   : > { %1374 = vmatpush1.msra.mxu1 %v1321_v63  ;;  %v1518_v63 = vld [vmem:[#allocation6 + $0x4c0] sm:$0xff] }
 0x37a   : > { %1375 = vmatprep.subr.mxu1 %v5949_v0 }
 0x37b   : > { %1376 = vmatpush1.msra.mxu1 %v1320_v2  ;;  %v1516_v2 = vld [vmem:[#allocation6 + $0x4b0] sm:$0xff] }
 0x37c   : > { %1377 = vmatprep.subr.mxu1 %v5949_v0 }
 0x37d   : > { %1378 = vmatpush1.msra.mxu1 %v1319_v4  ;;  %v1514_v4 = vld [vmem:[#allocation6 + $0x4a0] sm:$0xff] }
 0x37e   : > { %1379 = vmatprep.subr.mxu1 %v5949_v0 }
 0x37f   : > { %1380 = vmatpush1.msra.mxu1 %v1318_v6  ;;  %v1512_v6 = vld [vmem:[#allocation6 + $0x490] sm:$0xff] }
 0x380   : > { %1381 = vmatprep.subr.mxu1 %v5949_v0 }
 0x381   : > { %1382 = vmatpush1.msra.mxu1 %v1317_v8  ;;  %v1510_v8 = vld [vmem:[#allocation6 + $0x480] sm:$0xff] }
 0x382   : > { %1383 = vmatprep.subr.mxu1 %v5949_v0 }
 0x383   : > { %1384 = vmatpush1.msra.mxu1 %v1316_v10  ;;  %v1536_v10 = vrot.slane %v6539_v43, 2 }
 0x384   : > { %1385 = vmatprep.subr.mxu1 %v5949_v0 }
 0x385   : > { %1386 = vmatpush1.msra.mxu1 %v1315_v12  ;;  %v1526_v12 = vld [vmem:[#allocation6 + $0x500] sm:$0xff]  ;;  %v1537_v15 = vsel %vm631_vm4, %v6556_v50, %v1536_v10 }
 0x386   : > { %1415 = vmatprep.subr.mxu1 %v5949_v0 }
 0x387   : > { %1416 = vmatpush2.msra.mxu1 %v1332_v16 }
 0x388   : > { %1417 = vmatprep.subr.mxu1 %v5949_v0 }
 0x389   : > { %1418 = vmatpush2.msra.mxu1 %v1331_v19 }
 0x38a   : > { %1544 = vmatprep.subr.mxu1 %v5949_v0 }
 0x426   : > { %v1260_v22 = vpop.f32.mrf.mxu1 }
 0x427   : > { %v1261_v23 = vadd.f32 %v1260_v22, %v1185_v21  ;;  %v1666_v21 = vld [vmem:[#allocation6 + $0x588] sm:$0xff]  ;;  %v1665_v22 = vld [vmem:[#allocation6 + $0x580] sm:$0xff] }
 0x428   : > { %v5451_v24 = vpop.f32.mrf.mxu1 }
 0x429   : > { %v1264_v25 = vsub.f32 0.0, %v1261_v23  ;;  %v1685_v23 = vld [vmem:[#allocation6 + $0x618] sm:$0xff] }
 0x42a   : > { %v1664_v24 = vld [vmem:[#allocation6 + $0x578] sm:$0xff] }
 0x42b   : > { %v1265_v26 = vmul.f32 1.442695, %v1264_v25  ;;  %v1684_v25 = vld [vmem:[#allocation6 + $0x610] sm:$0xff] }
 0x42d   : > { %5679 = vpow2.f32 %v1265_v26  ;;  %v1683_v26 = vld [vmem:[#allocation6 + $0x608] sm:$0xff] }
 0x43a   : > { %v5680_v27 = vpop.eup %5679 }
 0x43b   : > { %v1267_v28 = vadd.f32 1.0, %v5680_v27  ;;  %v1663_v27 = vld [vmem:[#allocation6 + $0x570] sm:$0xff] }
 0x43d   : > { %5681 = vrcp.f32 %v1267_v28  ;;  %v1662_v28 = vld [vmem:[#allocation6 + $0x568] sm:$0xff] }
 0x44a   : > { %v5682_v34 = vpop.eup %5681 }
 0x44b   : > { %v1273_v35 = vrot.slane %v5682_v34, %v6526_v33  ;;  %v1680_v34 = vld [vmem:[#allocation6 + $0x5f0] sm:$0xff] }
 0x44d   : > { %v1274_v40 = vmul.f32 %v1273_v35, %v6470_v29  ;;  %v1275_v36 = vmul.f32 %v1273_v35, %v6472_v30  ;;  %v1347_v29 = vrot.slane %v6539_v43, 1  ;;  %v1660_v35 = vld [vmem:[#allocation6 + $0x558] sm:$0xff] }
 0x44e   : > { %v1656_v43 = vld [vmem:[#allocation6 + $0x538] sm:$0xff] }
 0x44f   : > { %v6532_v38 = vadd.f32 %v5695_v37, %v1274_v40  ;;  %v6535_v41 = vadd.f32 %v5696_v39, %v1275_v36  ;;  %v1348_v52 = vsel %vm441_vm3, %v6518_v18, %v1347_v29  ;;  %v1659_v40 = vld [vmem:[#allocation6 + $0x550] sm:$0xff]  ;;  %v1658_v36 = vld [vmem:[#allocation6 + $0x548] sm:$0xff]  ;;  %v1678_v39 = vld [vmem:[#allocation6 + $0x5e0] sm:$0xff] }
 0x450   : > { %v1679_v37 = vld [vmem:[#allocation6 + $0x5e8] sm:$0xff]  ;;  %v1655_v29 = vld [vmem:[#allocation6 + $0x530] sm:$0xff] }
 0x451   : > { %v1280_v62 = vrot.slane %v6532_v38, 7  ;;  %v1281_v42 = vrot.slane %v6535_v41, 7 }
 0x453   : > { %1286 = vst [vmem:[#allocation2] sm:$0xfe] %v1280_v62  ;;  %1288 = vst [vmem:[#allocation2 + $0x20] sm:$0x1] %v1281_v42  ;;  %v6542_v44 = vsel %vm382_vm2, %v1280_v62, %v1281_v42  ;;  %v1657_v62 = vld [vmem:[#allocation6 + $0x540] sm:$0xff]  ;;  %v1677_v42 = vld [vmem:[#allocation6 + $0x5d8] sm:$0xff] }
 0x454   : > { %v1340_v47 = vrot.slane %v6542_v44, 1  ;;  %v1529_v14 = vrot.slane %v6542_v44, 2 }
 0x45a   : > { %v6545_v30 = vld [vmem:[#allocation2] sm:$0xff] }
 0x45b   : > { %v6547_v45 = vld [vmem:[#allocation2 + $0x20] sm:$0x3]  ;;  %1499 = vmatmul.mubr.f32.vlgmr.msra.gmra.mxu0 %v6545_v30  ;;  %v1339_v46 = vrot.slane %v6545_v30, 1  ;;  %v1528_v11 = vrot.slane %v6545_v30, 2  ;;  %v1675_v30 = vld [vmem:[#allocation6 + $0x5c8] sm:$0xff] }
 0x45c   : > { %5215 = vmatprep.mubr.msk.f32.mxu0 %vm371_vm0, %v6513_v17  ;;  %v1345_v53 = vrot.slane %v6547_v45, 1  ;;  %v1534_v19 = vrot.slane %v6547_v45, 2  ;;  %1711 = vmatpush1.msra.mxu0 %v1685_v23  ;;  %v1654_v45 = vld [vmem:[#allocation6 + $0x528] sm:$0xff] }
 0x45d   : > { %v1341_v51 = vsel %vm441_vm3, %v1339_v46, %v1340_v47  ;;  %v1530_v16 = vsel %vm631_vm4, %v1528_v11, %v1529_v14  ;;  %1712 = vmatprep.subr.mxu0 %v5949_v0  ;;  %v1674_v46 = vld [vmem:[#allocation6 + $0x5c0] sm:$0xff] }
 0x45e   : > { %1420 = vmatmul.mubr.f32.vlgmr.msra.gmra.mxu1 %v1341_v51  ;;  %v1346_v57 = vsel %vm441_vm3, %v1340_v47, %v1345_v53  ;;  %1713 = vmatpush1.msra.mxu0 %v1684_v25  ;;  %v1653_v47 = vld [vmem:[#allocation6 + $0x520] sm:$0xff]  ;;  %v1672_v51 = vld [vmem:[#allocation6 + $0x5b0] sm:$0xff]  ;;  %v1671_v53 = vld [vmem:[#allocation6 + $0x5a8] sm:$0xff] }
 0x45f   : > { %1504 = vmatmul.mubr.f32.gmra.mxu0 %v6542_v44  ;;  %1545 = vmatpush1.msra.mxu1 %v1525_v49  ;;  %v1676_v44 = vld [vmem:[#allocation6 + $0x5d0] sm:$0xff]  ;;  %v1652_v49 = vld [vmem:[#allocation6 + $0x518] sm:$0xff] }
 0x460   : > { %1546 = vmatprep.subr.mxu1 %v5949_v0  ;;  %5213 = vmatprep.mubr.msk.f32.mxu1 %vm371_vm0, %v1348_v52  ;;  %v1651_v52 = vld [vmem:[#allocation6 + $0x510] sm:$0xff] }
 0x461   : > { %1547 = vmatpush1.msra.mxu1 %v1524_v54  ;;  %5219 = vmatprep.mubr.msk.f32.mxu0 %vm371_vm0, %v1344_v20  ;;  %v1535_v20 = vsel %vm631_vm4, %v1529_v14, %v1534_v19  ;;  %v1668_v54 = vld [vmem:[#allocation6 + $0x598] sm:$0xff] }
 0x462   : > { %1548 = vmatprep.subr.mxu1 %v5949_v0  ;;  %1425 = vmatmul.mubr.f32.gmra.mxu1 %v1346_v57  ;;  %v1670_v57 = vld [vmem:[#allocation6 + $0x5a0] sm:$0xff] }
 0x463   : > { %1549 = vmatpush1.msra.mxu1 %v1523_v55  ;;  %5216 = vmatprep.mubr.msk.f32.mxu1 %vm371_vm0, %v6567_v56  ;;  %v1667_v55 = vld [vmem:[#allocation6 + $0x590] sm:$0xff] }
 0x464   : > { %1550 = vmatprep.subr.mxu1 %v5949_v0  ;;  %1714 = vmatprep.subr.mxu0 %v5949_v0 }
 0x465   : > { %1551 = vmatpush1.msra.mxu1 %v1522_v58  ;;  %1715 = vmatpush1.msra.mxu0 %v1683_v26  ;;  %v1687_v58 = vld [vmem:[#allocation6 + $0x628] sm:$0xff] }
 0x466   : > { %1552 = vmatprep.subr.mxu1 %v5949_v0  ;;  %1716 = vmatprep.subr.mxu0 %v5949_v0 }
 0x467   : > { %1553 = vmatpush1.msra.mxu1 %v1521_v59  ;;  %v1686_v59 = vld [vmem:[#allocation6 + $0x620] sm:$0xff] }
 0x468   : > { %1554 = vmatprep.subr.mxu1 %v5949_v0 }
 0x469   : > { %1555 = vmatpush1.msra.mxu1 %v1520_v60 }
 0x46a   : > { %1556 = vmatprep.subr.mxu1 %v5949_v0 }
 0x46b   : > { %1557 = vmatpush1.msra.mxu1 %v1519_v61 }
 0x46c   : > { %1558 = vmatprep.subr.mxu1 %v5949_v0 }
 0x46d   : > { %1559 = vmatpush1.msra.mxu1 %v1518_v63 }
 0x46e   : > { %1560 = vmatprep.subr.mxu1 %v5949_v0 }
 0x46f   : > { %1561 = vmatpush1.msra.mxu1 %v1517_v1 }
 0x470   : > { %1562 = vmatprep.subr.mxu1 %v5949_v0 }
 0x471   : > { %1563 = vmatpush1.msra.mxu1 %v1516_v2 }
 0x472   : > { %1564 = vmatprep.subr.mxu1 %v5949_v0 }
 0x473   : > { %1565 = vmatpush1.msra.mxu1 %v1515_v3 }
 0x474   : > { %1566 = vmatprep.subr.mxu1 %v5949_v0 }
 0x475   : > { %1567 = vmatpush1.msra.mxu1 %v1514_v4 }
 0x476   : > { %1568 = vmatprep.subr.mxu1 %v5949_v0 }
 0x477   : > { %1569 = vmatpush1.msra.mxu1 %v1513_v5 }
 0x478   : > { %1570 = vmatprep.subr.mxu1 %v5949_v0 }
 0x479   : > { %1571 = vmatpush1.msra.mxu1 %v1512_v6 }
 0x47a   : > { %1572 = vmatprep.subr.mxu1 %v5949_v0 }
 0x47b   : > { %1573 = vmatpush1.msra.mxu1 %v1511_v7 }
 0x47c   : > { %1574 = vmatprep.subr.mxu1 %v5949_v0 }
 0x47d   : > { %1575 = vmatpush1.msra.mxu1 %v1510_v8  ;;  %v5218_v8 = vld [vmem:[#allocation8 + $0x2] ss:$0 sm:$0xff] }
 0x47e   : > { %1604 = vmatprep.subr.mxu1 %v5949_v0 }
 0x47f   : > { %1605 = vmatpush2.msra.mxu1 %v1527_v9 }
 0x480   : > { %1606 = vmatprep.subr.mxu1 %v5949_v0 }
 0x481   : > { %1607 = vmatpush2.msra.mxu1 %v1526_v12 }
 0x482   : > { %1609 = vmatmul.mubr.f32.vlgmr.msra.gmra.mxu1 %v1530_v16  ;;  %1789 = vmatprep.subr.mxu1 %v5949_v0 }
 0x483   : > { %5217 = vmatprep.mubr.msk.f32.mxu1 %vm371_vm0, %v1537_v15  ;;  %1790 = vmatpush1.msra.mxu1 %v1666_v21 }
 0x484   : > { %1791 = vmatprep.subr.mxu1 %v5949_v0 }
 0x485   : > { %1792 = vmatpush1.msra.mxu1 %v1665_v22 }
 0x486   : > { %1614 = vmatmul.mubr.f32.gmra.mxu1 %v1535_v20  ;;  %1793 = vmatprep.subr.mxu1 %v5949_v0 }
 0x487   : > { %5221 = vmatprep.mubr.msk.f32.mxu1 %vm371_vm0, %v6506_v13  ;;  %1794 = vmatpush1.msra.mxu1 %v1664_v24  ;;  %v1682_v13 = vld [vmem:[#allocation6 + $0x600] sm:$0xff]  ;;  %v6637_v24 = vld [vmem:[#allocation2 + $0x28] sm:$0x3] }
 0x488   : > { %1795 = vmatprep.subr.mxu1 %v5949_v0  ;;  %1717 = vmatpush1.msra.mxu0 %v1682_v13  ;;  %v1702_v26 = vrot.slane %v6637_v24, 1 }
 0x489   : > { %1796 = vmatpush1.msra.mxu1 %v1663_v27  ;;  %1718 = vmatprep.subr.mxu0 %v5949_v0 }
 0x48a   : > { %1797 = vmatprep.subr.mxu1 %v5949_v0  ;;  %1719 = vmatpush1.msra.mxu0 %v1681_v31  ;;  %v1880_v31 = vld [vmem:[#allocation6 + $0x6a8] sm:$0xff] }
 0x48b   : > { %1798 = vmatpush1.msra.mxu1 %v1662_v28  ;;  %1720 = vmatprep.subr.mxu0 %v5949_v0 }
 0x48c   : > { %1799 = vmatprep.subr.mxu1 %v5949_v0  ;;  %1721 = vmatpush1.msra.mxu0 %v1680_v34  ;;  %v1703_v34 = vsel %vm441_vm3, %v6518_v18, %v1702_v26  ;;  %v1877_v18 = vld [vmem:[#allocation6 + $0x690] sm:$0xff] }
 0x48d   : > { %1800 = vmatpush1.msra.mxu1 %v1661_v32  ;;  %1722 = vmatprep.subr.mxu0 %v5949_v0 }
 0x48e   : > { %1801 = vmatprep.subr.mxu1 %v5949_v0  ;;  %1723 = vmatpush1.msra.mxu0 %v1679_v37 }
 0x48f   : > { %1802 = vmatpush1.msra.mxu1 %v1660_v35  ;;  %1724 = vmatprep.subr.mxu0 %v5949_v0  ;;  %v1879_v35 = vld [vmem:[#allocation6 + $0x6a0] sm:$0xff] }
 0x490   : > { %1803 = vmatprep.subr.mxu1 %v5949_v0  ;;  %1725 = vmatpush1.msra.mxu0 %v1678_v39  ;;  %v1876_v39 = vld [vmem:[#allocation6 + $0x688] sm:$0xff] }
 0x491   : > { %1804 = vmatpush1.msra.mxu1 %v1659_v40  ;;  %1726 = vmatprep.subr.mxu0 %v5949_v0 }
 0x492   : > { %1805 = vmatprep.subr.mxu1 %v5949_v0  ;;  %1727 = vmatpush1.msra.mxu0 %v1677_v42  ;;  %v1874_v42 = vld [vmem:[#allocation6 + $0x678] sm:$0xff] }
 0x493   : > { %1806 = vmatpush1.msra.mxu1 %v1658_v36  ;;  %1728 = vmatprep.subr.mxu0 %v5949_v0 }
 0x494   : > { %1807 = vmatprep.subr.mxu1 %v5949_v0  ;;  %1729 = vmatpush1.msra.mxu0 %v1676_v44  ;;  %v1872_v44 = vld [vmem:[#allocation6 + $0x668] sm:$0xff] }
 0x495   : > { %1808 = vmatpush1.msra.mxu1 %v1657_v62  ;;  %1730 = vmatprep.subr.mxu0 %v5949_v0  ;;  %v1875_v62 = vld [vmem:[#allocation6 + $0x680] sm:$0xff] }
 0x496   : > { %1809 = vmatprep.subr.mxu1 %v5949_v0  ;;  %1731 = vmatpush1.msra.mxu0 %v1675_v30  ;;  %v1869_v30 = vld [vmem:[#allocation6 + $0x650] sm:$0xff] }
 0x497   : > { %1810 = vmatpush1.msra.mxu1 %v1656_v43  ;;  %1732 = vmatprep.subr.mxu0 %v5949_v0  ;;  %v1873_v43 = vld [vmem:[#allocation6 + $0x670] sm:$0xff] }
 0x498   : > { %1811 = vmatprep.subr.mxu1 %v5949_v0  ;;  %1733 = vmatpush1.msra.mxu0 %v1674_v46  ;;  %v1867_v46 = vld [vmem:[#allocation6 + $0x640] sm:$0xff] }
 0x499   : > { %1812 = vmatpush1.msra.mxu1 %v1655_v29  ;;  %1734 = vmatprep.subr.mxu0 %v5949_v0  ;;  %v1870_v29 = vld [vmem:[#allocation6 + $0x658] sm:$0xff] }
 0x49a   : > { %1813 = vmatprep.subr.mxu1 %v5949_v0  ;;  %1735 = vmatpush1.msra.mxu0 %v1673_v48  ;;  %v1865_v48 = vld [vmem:[#allocation6 + $0x630] sm:$0xff] }
 0x49b   : > { %1814 = vmatpush1.msra.mxu1 %v1654_v45  ;;  %1736 = vmatprep.subr.mxu0 %v5949_v0  ;;  %v1868_v45 = vld [vmem:[#allocation6 + $0x648] sm:$0xff] }
 0x49c   : > { %1815 = vmatprep.subr.mxu1 %v5949_v0  ;;  %1737 = vmatpush1.msra.mxu0 %v1672_v51  ;;  %v1891_v51 = vrot.slane %v6637_v24, 2 }
 0x49d   : > { %1816 = vmatpush1.msra.mxu1 %v1653_v47  ;;  %1738 = vmatprep.subr.mxu0 %v5949_v0  ;;  %v1866_v47 = vld [vmem:[#allocation6 + $0x638] sm:$0xff] }
 0x49e   : > { %1817 = vmatprep.subr.mxu1 %v5949_v0  ;;  %1739 = vmatpush1.msra.mxu0 %v1671_v53  ;;  %v1881_v53 = vld [vmem:[#allocation6 + $0x6b0] sm:$0xff] }
 0x49f   : > { %1818 = vmatpush1.msra.mxu1 %v1652_v49  ;;  %1740 = vmatprep.subr.mxu0 %v5949_v0  ;;  %v1882_v49 = vld [vmem:[#allocation6 + $0x6b8] sm:$0xff] }
 0x4a0   : > { %1819 = vmatprep.subr.mxu1 %v5949_v0  ;;  %1741 = vmatpush1.msra.mxu0 %v1670_v57 }
 0x4a1   : > { %1820 = vmatpush1.msra.mxu1 %v1651_v52  ;;  %1770 = vmatprep.subr.mxu0 %v5949_v0 }
 0x4a2   : > { %1849 = vmatprep.subr.mxu1 %v5949_v0  ;;  %1771 = vmatpush2.msra.mxu0 %v1687_v58 }
 0x4a3   : > { %1850 = vmatpush2.msra.mxu1 %v1668_v54  ;;  %1772 = vmatprep.subr.mxu0 %v5949_v0 }
 0x4a4   : > { %1851 = vmatprep.subr.mxu1 %v5949_v0  ;;  %1773 = vmatpush2.msra.mxu0 %v1686_v59 }
 0x4a5   : > { %1852 = vmatpush2.msra.mxu1 %v1667_v55  ;;  %1899 = vmatprep.subr.mxu0 %v5949_v0  ;;  %v1892_v55 = vsel %vm631_vm4, %v6556_v50, %v1891_v51  ;;  %v5240_v50 = vld [vmem:[%s7693_s3 + $0xf0] sm:$0xff] }
 0x4a6   : > { %5452 = vmatprep.subr.mxu1 %v5949_v0  ;;  %v2228_v51 = vld [vmem:[#allocation6 + $0x7c0] sm:$0xff] }
 0x51b   : > { %v1500_v60 = vpop.f32.mrf.mxu0 }
 0x51d   : > { %v1502_v61 = vpop.f32.mrf.mxu0 }
 0x51e   : > { %v1421_v63 = vpop.f32.mrf.mxu1  ;;  %v5239_v61 = vld [vmem:[%s7693_s3 + $0xe8] sm:$0xff] }
 0x51f   : > { %v1505_v1 = vpop.f32.mrf.mxu0  ;;  %v1501_v6 = vadd.f32 %v1500_v60, %v1421_v63  ;;  %v5241_v60 = vld [vmem:[%s7693_s3 + $0xf8] sm:$0xff]  ;;  %v5238_v63 = vld [vmem:[%s7693_s3 + $0xe0] sm:$0xff] }
 0x520   : > { %v1423_v2 = vpop.f32.mrf.mxu1 }
 0x521   : > { %v1507_v3 = vpop.f32.mrf.mxu0  ;;  %v5236_v2 = vld [vmem:[%s7693_s3 + $0xd0] sm:$0xff] }
 0x522   : > { %v1426_v4 = vpop.f32.mrf.mxu1  ;;  %v5235_v3 = vld [vmem:[%s7693_s3 + $0xc8] sm:$0xff] }
 0x523   : > { %v1506_v11 = vadd.f32 %v1505_v1, %v1426_v4  ;;  %v5237_v1 = vld [vmem:[%s7693_s3 + $0xd8] sm:$0xff]  ;;  %v5234_v4 = vld [vmem:[%s7693_s3 + $0xc0] sm:$0xff] }
 0x524   : > { %v1428_v5 = vpop.f32.mrf.mxu1 }
 0x525   : > { %v5233_v5 = vld [vmem:[%s7693_s3 + $0xb8] sm:$0xff] }
 0x542   : > { %v1610_v7 = vpop.f32.mrf.mxu1 }
 0x543   : > { %v1619_v9 = vadd.f32 %v1610_v7, %v1501_v6  ;;  %v5232_v6 = vld [vmem:[%s7693_s3 + $0xb0] sm:$0xff]  ;;  %v5231_v7 = vld [vmem:[%s7693_s3 + $0xa8] sm:$0xff] }
 0x544   : > { %v1612_v10 = vpop.f32.mrf.mxu1 }
 0x545   : > { %v1629_v12 = vadd.f32 %v5218_v8, %v1619_v9  ;;  %v5229_v9 = vld [vmem:[%s7693_s3 + $0x98] sm:$0xff]  ;;  %v5228_v10 = vld [vmem:[%s7693_s3 + $0x90] sm:$0xff] }
 0x546   : > { %v1615_v14 = vpop.f32.mrf.mxu1 }
 0x547   : > { %v1631_v15 = vmax.f32 %v1629_v12, 0.0  ;;  %v1620_v16 = vadd.f32 %v1615_v14, %v1506_v11  ;;  %v5227_v11 = vld [vmem:[%s7693_s3 + $0x88] sm:$0xff]  ;;  %v5226_v12 = vld [vmem:[%s7693_s3 + $0x80] sm:$0xff] }
 0x548   : > { %v1617_v19 = vpop.f32.mrf.mxu1 }
 0x549   : > { %v1635_v20 = vrot.slane %v1631_v15, 7  ;;  %v1630_v21 = vadd.f32 %v5218_v8, %v1620_v16  ;;  %v5230_v8 = vld [vmem:[%s7693_s3 + $0xa0] sm:$0xff] }
 0x54b   : > { %1641 = vst [vmem:[#allocation2] sm:$0xfe] %v1635_v20  ;;  %v1632_v22 = vmax.f32 %v1630_v21, 0.0 }
 0x54d   : > { %v1636_v23 = vrot.slane %v1632_v22, 7 }
 0x54f   : > { %1643 = vst [vmem:[#allocation2 + $0x20] sm:$0x1] %v1636_v23  ;;  %v6640_v25 = vsel %vm382_vm2, %v1635_v20, %v1636_v23 }
 0x550   : > { %v1695_v13 = vrot.slane %v6640_v25, 1  ;;  %v1884_v54 = vrot.slane %v6640_v25, 2 }
 0x552   : > { %v6643_v27 = vld [vmem:[#allocation2] sm:$0xff] }
 0x553   : > { %1854 = vmatmul.mubr.f32.vlgmr.msra.gmra.mxu1 %v6643_v27  ;;  %v1694_v28 = vrot.slane %v6643_v27, 1  ;;  %v1883_v52 = vrot.slane %v6643_v27, 2 }
 0x554   : > { %5222 = vmatprep.mubr.msk.f32.mxu1 %vm371_vm0, %v6513_v17  ;;  %v1878_v17 = vld [vmem:[#allocation6 + $0x698] sm:$0xff]  ;;  %5453 = vmatpush3.msra.mxu1 %v5241_v60  ;;  %v2224_v60 = vld [vmem:[#allocation6 + $0x7a0] sm:$0xff] }
 0x555   : > { %v1696_v32 = vsel %vm441_vm3, %v1694_v28, %v1695_v13  ;;  %v1885_v57 = vsel %vm631_vm4, %v1883_v52, %v1884_v54  ;;  %5454 = vmatprep.subr.mxu1 %v5949_v0  ;;  %v5225_v28 = vld [vmem:[#allocation8 + $0x3] ss:$0 sm:$0xff]  ;;  %v2207_v52 = vld [vmem:[#allocation6 + $0x720] sm:$0xff] }
 0x556   : > { %1775 = vmatmul.mubr.f32.vlgmr.msra.gmra.mxu0 %v1696_v32  ;;  %v6653_v40 = vld [vmem:[#allocation2 + $0x20] sm:$0x3]  ;;  %5455 = vmatpush3.msra.mxu1 %v5240_v50  ;;  %v2203_v50 = vld [vmem:[#allocation6 + $0x700] sm:$0xff] }
 0x557   : > { %1859 = vmatmul.mubr.f32.gmra.mxu1 %v6640_v25  ;;  %1900 = vmatpush1.msra.mxu0 %v1880_v31  ;;  %v1700_v36 = vrot.slane %v6653_v40, 1  ;;  %v1889_v58 = vrot.slane %v6653_v40, 2 }
 0x558   : > { %1901 = vmatprep.subr.mxu0 %v5949_v0  ;;  %5220 = vmatprep.mubr.msk.f32.mxu0 %vm371_vm0, %v1703_v34 }
 0x559   : > { %1902 = vmatpush1.msra.mxu0 %v1879_v35  ;;  %v1701_v37 = vsel %vm441_vm3, %v1695_v13, %v1700_v36  ;;  %5484 = vmatprep.mubr.msk.f32.mxu1 %vm5950_vm5, %v5949_v0  ;;  %v1890_v59 = vsel %vm631_vm4, %v1884_v54, %v1889_v58  ;;  %v2206_v54 = vld [vmem:[#allocation6 + $0x718] sm:$0xff]  ;;  %v2225_v58 = vld [vmem:[#allocation6 + $0x7a8] sm:$0xff] }
 0x55a   : > { %1903 = vmatprep.subr.mxu0 %v5949_v0  ;;  %1780 = vmatmul.mubr.f32.gmra.mxu0 %v1701_v37 }
 0x55b   : > { %1904 = vmatpush1.msra.mxu0 %v1878_v17  ;;  %5223 = vmatprep.mubr.msk.f32.mxu0 %vm371_vm0, %v6567_v56  ;;  %v1871_v56 = vld [vmem:[#allocation6 + $0x660] sm:$0xff] }
 0x55c   : > { %1905 = vmatprep.subr.mxu0 %v5949_v0  ;;  %5456 = vmatprep.subr.mxu1 %v5949_v0 }
 0x55d   : > { %1906 = vmatpush1.msra.mxu0 %v1877_v18  ;;  %5457 = vmatpush3.msra.mxu1 %v5239_v61  ;;  %v2223_v61 = vld [vmem:[#allocation6 + $0x798] sm:$0xff] }
 0x55e   : > { %1907 = vmatprep.subr.mxu0 %v5949_v0  ;;  %5458 = vmatprep.subr.mxu1 %v5949_v0 }
 0x55f   : > { %1908 = vmatpush1.msra.mxu0 %v1876_v39  ;;  %5459 = vmatpush3.msra.mxu1 %v5238_v63  ;;  %v2202_v63 = vld [vmem:[#allocation6 + $0x6f8] sm:$0xff] }
 0x560   : > { %1909 = vmatprep.subr.mxu0 %v5949_v0  ;;  %5460 = vmatprep.subr.mxu1 %v5949_v0 }
 0x561   : > { %1910 = vmatpush1.msra.mxu0 %v1875_v62  ;;  %5461 = vmatpush3.msra.mxu1 %v5237_v1  ;;  %v2222_v1 = vld [vmem:[#allocation6 + $0x790] sm:$0xff] }
 0x562   : > { %1911 = vmatprep.subr.mxu0 %v5949_v0  ;;  %5462 = vmatprep.subr.mxu1 %v5949_v0 }
 0x563   : > { %1912 = vmatpush1.msra.mxu0 %v1874_v42  ;;  %5463 = vmatpush3.msra.mxu1 %v5236_v2  ;;  %v2201_v2 = vld [vmem:[#allocation6 + $0x6f0] sm:$0xff] }
 0x564   : > { %1913 = vmatprep.subr.mxu0 %v5949_v0  ;;  %5464 = vmatprep.subr.mxu1 %v5949_v0 }
 0x565   : > { %1914 = vmatpush1.msra.mxu0 %v1873_v43  ;;  %5465 = vmatpush3.msra.mxu1 %v5235_v3  ;;  %v2084_v43 = vld [vmem:[#allocation11 + $0x4] sm:$0xf]  ;;  %v2221_v3 = vld [vmem:[#allocation6 + $0x788] sm:$0xff] }
 0x566   : > { %1915 = vmatprep.subr.mxu0 %v5949_v0  ;;  %5466 = vmatprep.subr.mxu1 %v5949_v0 }
 0x567   : > { %1916 = vmatpush1.msra.mxu0 %v1872_v44  ;;  %5467 = vmatpush3.msra.mxu1 %v5234_v4  ;;  %v2011_v44 = vld [vmem:[#allocation9 + $0x1] sm:$0x1]  ;;  %v2200_v4 = vld [vmem:[#allocation6 + $0x6e8] sm:$0xff] }
 0x568   : > { %1917 = vmatprep.subr.mxu0 %v5949_v0  ;;  %5468 = vmatprep.subr.mxu1 %v5949_v0 }
 0x569   : > { %1918 = vmatpush1.msra.mxu0 %v1871_v56  ;;  %5469 = vmatpush3.msra.mxu1 %v5233_v5  ;;  %v2220_v5 = vld [vmem:[#allocation6 + $0x780] sm:$0xff] }
 0x56a   : > { %1919 = vmatprep.subr.mxu0 %v5949_v0  ;;  %5470 = vmatprep.subr.mxu1 %v5949_v0 }
 0x56b   : > { %1920 = vmatpush1.msra.mxu0 %v1870_v29  ;;  %5471 = vmatpush3.msra.mxu1 %v5232_v6  ;;  %v2199_v6 = vld [vmem:[#allocation6 + $0x6e0] sm:$0xff] }
 0x56c   : > { %1921 = vmatprep.subr.mxu0 %v5949_v0  ;;  %5472 = vmatprep.subr.mxu1 %v5949_v0 }
 0x56d   : > { %1922 = vmatpush1.msra.mxu0 %v1869_v30  ;;  %5473 = vmatpush3.msra.mxu1 %v5231_v7  ;;  %v2219_v7 = vld [vmem:[#allocation6 + $0x778] sm:$0xff] }
 0x56e   : > { %1923 = vmatprep.subr.mxu0 %v5949_v0  ;;  %5474 = vmatprep.subr.mxu1 %v5949_v0 }
 0x56f   : > { %1924 = vmatpush1.msra.mxu0 %v1868_v45  ;;  %5475 = vmatpush3.msra.mxu1 %v5230_v8  ;;  %v2198_v8 = vld [vmem:[#allocation6 + $0x6d8] sm:$0xff] }
 0x570   : > { %1925 = vmatprep.subr.mxu0 %v5949_v0  ;;  %5476 = vmatprep.subr.mxu1 %v5949_v0 }
 0x571   : > { %1926 = vmatpush1.msra.mxu0 %v1867_v46  ;;  %5477 = vmatpush3.msra.mxu1 %v5229_v9  ;;  %v2210_v46 = vld [vmem:[#allocation6 + $0x738] sm:$0xff]  ;;  %v2218_v9 = vld [vmem:[#allocation6 + $0x770] sm:$0xff] }
 0x572   : > { %1927 = vmatprep.subr.mxu0 %v5949_v0  ;;  %5478 = vmatprep.subr.mxu1 %v5949_v0 }
 0x573   : > { %1928 = vmatpush1.msra.mxu0 %v1866_v47  ;;  %5479 = vmatpush3.msra.mxu1 %v5228_v10  ;;  %v2209_v47 = vld [vmem:[#allocation6 + $0x730] sm:$0xff] }
 0x574   : > { %1929 = vmatprep.subr.mxu0 %v5949_v0  ;;  %5480 = vmatprep.subr.mxu1 %v5949_v0  ;;  %v2197_v10 = vld [vmem:[#allocation6 + $0x6d0] sm:$0xff] }
 0x575   : > { %1930 = vmatpush1.msra.mxu0 %v1865_v48  ;;  %5481 = vmatpush3.msra.mxu1 %v5227_v11  ;;  %v2229_v48 = vld [vmem:[#allocation6 + $0x7c8] sm:$0xff] }
 0x576   : > { %1959 = vmatprep.subr.mxu0 %v5949_v0  ;;  %5482 = vmatprep.subr.mxu1 %v5949_v0  ;;  %v2217_v11 = vld [vmem:[#allocation6 + $0x768] sm:$0xff] }
 0x577   : > { %1960 = vmatpush2.msra.mxu0 %v1882_v49  ;;  %5483 = vmatpush3.msra.mxu1 %v5226_v12  ;;  %v2208_v49 = vld [vmem:[#allocation6 + $0x728] sm:$0xff] }
 0x578   : > { %1961 = vmatprep.subr.mxu0 %v5949_v0  ;;  %5487 = vmatprep.subr.mxu1 %v5949_v0  ;;  %v2196_v12 = vld [vmem:[#allocation6 + $0x6c8] sm:$0xff] }
 0x579   : > { %1962 = vmatpush2.msra.mxu0 %v1881_v53  ;;  %v2227_v53 = vld [vmem:[#allocation6 + $0x7b8] sm:$0xff] }
 0x57a   : > { %1964 = vmatmul.mubr.f32.vlgmr.msra.gmra.mxu0 %v1885_v57  ;;  %2254 = vmatprep.subr.mxu0 %v5949_v0  ;;  %v2205_v57 = vld [vmem:[#allocation6 + $0x710] sm:$0xff] }
 0x57b   : > { %5224 = vmatprep.mubr.msk.f32.mxu0 %vm371_vm0, %v1892_v55  ;;  %2255 = vmatpush1.msra.mxu0 %v2229_v48  ;;  %v2226_v55 = vld [vmem:[#allocation6 + $0x7b0] sm:$0xff] }
 0x57c   : > { %2256 = vmatprep.subr.mxu0 %v5949_v0 }
 0x57d   : > { %2257 = vmatpush1.msra.mxu0 %v2228_v51 }
 0x57e   : > { %1969 = vmatmul.mubr.f32.gmra.mxu0 %v1890_v59  ;;  %2258 = vmatprep.subr.mxu0 %v5949_v0  ;;  %v2204_v59 = vld [vmem:[#allocation6 + $0x708] sm:$0xff] }
 0x57f   : > { %2259 = vmatpush1.msra.mxu0 %v2227_v53 }
 0x580   : > { %2260 = vmatprep.subr.mxu0 %v5949_v0 }
 0x581   : > { %2261 = vmatpush1.msra.mxu0 %v2226_v55  ;;  %v2423_v55 = vld [vmem:[#allocation6 + $0x850] sm:$0xff] }
 0x582   : > { %2262 = vmatprep.subr.mxu0 %v5949_v0 }
 0x583   : > { %2263 = vmatpush1.msra.mxu0 %v2225_v58 }
 0x584   : > { %2264 = vmatprep.subr.mxu0 %v5949_v0 }
 0x585   : > { %2265 = vmatpush1.msra.mxu0 %v2224_v60  ;;  %v2421_v60 = vld [vmem:[#allocation6 + $0x840] sm:$0xff] }
 0x586   : > { %2266 = vmatprep.subr.mxu0 %v5949_v0 }
 0x587   : > { %2267 = vmatpush1.msra.mxu0 %v2223_v61  ;;  %v2419_v61 = vld [vmem:[#allocation6 + $0x830] sm:$0xff] }
 0x588   : > { %2268 = vmatprep.subr.mxu0 %v5949_v0 }
 0x589   : > { %2269 = vmatpush1.msra.mxu0 %v2222_v1  ;;  %v2417_v1 = vld [vmem:[#allocation6 + $0x820] sm:$0xff] }
 0x58a   : > { %2270 = vmatprep.subr.mxu0 %v5949_v0 }
 0x58b   : > { %2271 = vmatpush1.msra.mxu0 %v2221_v3  ;;  %v2415_v3 = vld [vmem:[#allocation6 + $0x810] sm:$0xff] }
 0x58c   : > { %2272 = vmatprep.subr.mxu0 %v5949_v0 }
 0x58d   : > { %2273 = vmatpush1.msra.mxu0 %v2220_v5  ;;  %v2413_v5 = vld [vmem:[#allocation6 + $0x800] sm:$0xff] }
 0x58e   : > { %2274 = vmatprep.subr.mxu0 %v5949_v0 }
 0x58f   : > { %2275 = vmatpush1.msra.mxu0 %v2219_v7  ;;  %v2411_v7 = vld [vmem:[#allocation6 + $0x7f0] sm:$0xff] }
 0x590   : > { %2276 = vmatprep.subr.mxu0 %v5949_v0 }
 0x591   : > { %2277 = vmatpush1.msra.mxu0 %v2218_v9  ;;  %v2409_v9 = vld [vmem:[#allocation6 + $0x7e0] sm:$0xff] }
 0x592   : > { %2278 = vmatprep.subr.mxu0 %v5949_v0 }
 0x593   : > { %2279 = vmatpush1.msra.mxu0 %v2217_v11 }
 0x594   : > { %2280 = vmatprep.subr.mxu0 %v5949_v0 }
 0x613   : > { %v1855_v14 = vpop.f32.mrf.mxu1 }
 0x615   : > { %v1857_v15 = vpop.f32.mrf.mxu1 }
 0x616   : > { %v1776_v16 = vpop.f32.mrf.mxu0  ;;  %v2195_v15 = vld [vmem:[#allocation6 + $0x6c0] sm:$0xff] }
 0x617   : > { %v1860_v19 = vpop.f32.mrf.mxu1  ;;  %v1856_v25 = vadd.f32 %v1855_v14, %v1776_v16  ;;  %v2216_v14 = vld [vmem:[#allocation6 + $0x760] sm:$0xff]  ;;  %v2215_v16 = vld [vmem:[#allocation6 + $0x758] sm:$0xff] }
 0x618   : > { %v1778_v20 = vpop.f32.mrf.mxu0  ;;  %2281 = vmatpush1.msra.mxu0 %v2216_v14  ;;  %v2425_v14 = vld [vmem:[#allocation6 + $0x860] sm:$0xff] }
 0x619   : > { %v1862_v21 = vpop.f32.mrf.mxu1  ;;  %2282 = vmatprep.subr.mxu0 %v5949_v0  ;;  %v2214_v20 = vld [vmem:[#allocation6 + $0x750] sm:$0xff] }
 0x61a   : > { %v1781_v22 = vpop.f32.mrf.mxu0  ;;  %v6794_v21 = vld [vmem:[#allocation2 + $0x8] sm:$0xff]  ;;  %2283 = vmatpush1.msra.mxu0 %v2215_v16 }
 0x61b   : > { %v1861_v27 = vadd.f32 %v1860_v19, %v1781_v22  ;;  %v2212_v19 = vld [vmem:[#allocation6 + $0x748] sm:$0xff]  ;;  %2284 = vmatprep.subr.mxu0 %v5949_v0  ;;  %v2211_v22 = vld [vmem:[#allocation6 + $0x740] sm:$0xff] }
 0x61c   : > { %v1783_v23 = vpop.f32.mrf.mxu0  ;;  %2285 = vmatpush1.msra.mxu0 %v2214_v20 }
 0x61d   : > { %v2241_v23 = vrot.slane %v6794_v21, 1  ;;  %2314 = vmatprep.subr.mxu0 %v5949_v0 }
 0x63a   : > { %v1965_v24 = vpop.f32.mrf.mxu0 }
 0x63b   : > { %v1974_v13 = vadd.f32 %v1965_v24, %v1856_v25  ;;  %v2231_v24 = vld [vmem:[#allocation6 + $0x7d8] sm:$0xff]  ;;  %v6801_v25 = vld [vmem:[#allocation2 + $0x18] sm:$0xff] }
 0x63c   : > { %v1967_v26 = vpop.f32.mrf.mxu0  ;;  %2315 = vmatpush2.msra.mxu0 %v2231_v24  ;;  %v6839_v51 = vrot.slane %v6801_v25, 2  ;;  %v2564_v24 = vld [vmem:[#allocation6 + $0x8e0] sm:$0xff] }
 0x63d   : > { %v6754_v35 = vadd.f32 %v5225_v28, %v1974_v13  ;;  %v6806_v26 = vrot.slane %v6801_v25, 1  ;;  %2316 = vmatprep.subr.mxu0 %v5949_v0 }
 0x63e   : > { %v1970_v31 = vpop.f32.mrf.mxu0 }
 0x63f   : > { %v1975_v32 = vadd.f32 %v1970_v31, %v1861_v27  ;;  %v2230_v27 = vld [vmem:[#allocation6 + $0x7d0] sm:$0xff]  ;;  %v6812_v13 = vsel %vm441_vm3, %v2241_v23, %v6806_v26  ;;  %v2565_v23 = vld [vmem:[#allocation6 + $0x8e8] sm:$0xff] }
 0x640   : > { %v1972_v34 = vpop.f32.mrf.mxu0  ;;  %2317 = vmatpush2.msra.mxu0 %v2230_v27  ;;  %5244 = vmatprep.mubr.msk.f32.mxu0 %vm371_vm0, %v6812_v13  ;;  %v2584_v27 = vld [vmem:[#allocation6 + $0x978] sm:$0xff] }
 0x641   : > { %v6756_v40 = vadd.f32 %v5225_v28, %v1975_v32  ;;  %2443 = vmatprep.subr.mxu0 %v5949_v0  ;;  %v2086_v28 = vld [vmem:[#allocation12 + $0x1] sm:$0x1] }
 0x643   : > { %v1986_v36 = vadd.f32 %v6756_v40, %v6754_v35 }
 0x645   : > { %v1987_v17 = vrot.slane %v1986_v36, 4 }
 0x647   : > { %v1988_v37 = vadd.f32 %v1987_v17, %v1986_v36 }
 0x649   : > { %v1989_v18 = vrot.slane %v1988_v37, 2 }
 0x64b   : > { %v1990_v39 = vadd.f32 %v1989_v18, %v1988_v37 }
 0x64d   : > { %v1991_v62 = vrot.slane %v1990_v39, 1 }
 0x64f   : > { %v1992_v42 = vadd.f32 %v1991_v62, %v1990_v39 }
 0x651   : > { %5485 = vmatmul.mubr.f32.vlgmr.msra.gmra.mxu1 %v1992_v42 }
 0x652   : > { %5489 = vmatprep.mubr.msk.f32.mxu1 %vm5950_vm5, %v5949_v0  ;;  %5488 = vmatpush3.msk.msra.mxu1 %vm1190_vm6, %v2084_v43 }
 0x653   : > { %2333 = vmatprep.subr.mxu1 %v5949_v0 }
 0x711   : > { %v2078_v56 = vpop.f32.mrf.mxu1 }
 0x712   : > { %v2079_v29 = vadd.f32 %v2078_v56, %v2011_v44 }
 0x713   : > { %v5486_v30 = vpop.f32.mrf.mxu1 }
 0x714   : > { %v2082_v45 = vmax.f32 %v2079_v29, 0.0 }
 0x716   : > { %5490 = vmatmul.mubr.msk.f32.vlgmr.msra.gmra.mxu1 %vm1186_vm7, %v2082_v45  ;;  %v6822_v45 = vld [vmem:[#allocation2 + $0x28] sm:$0x3] }
 0x717   : > { %2334 = vmatpush1.msra.mxu1 %v2210_v46  ;;  %5246 = vmatprep.mubr.msk.f32.mxu1 %vm371_vm0, %v6794_v21  ;;  %v2435_v11 = vrot.slane %v6822_v45, 2 }
 0x718   : > { %2335 = vmatprep.subr.mxu1 %v5949_v0 }
 0x719   : > { %2336 = vmatpush1.msra.mxu1 %v2209_v47  ;;  %v2246_v47 = vrot.slane %v6822_v45, 1  ;;  %v2436_v16 = vsel %vm631_vm4, %v6839_v51, %v2435_v11  ;;  %v2555_v45 = vld [vmem:[#allocation6 + $0x898] sm:$0xff] }
 0x71a   : > { %2337 = vmatprep.subr.mxu1 %v5949_v0 }
 0x71b   : > { %2338 = vmatpush1.msra.mxu1 %v2208_v49  ;;  %v2424_v49 = vld [vmem:[#allocation6 + $0x858] sm:$0xff]  ;;  %v2247_v53 = vsel %vm441_vm3, %v6806_v26, %v2246_v47  ;;  %v2554_v47 = vld [vmem:[#allocation6 + $0x890] sm:$0xff] }
 0x71c   : > { %2339 = vmatprep.subr.mxu1 %v5949_v0 }
 0x71d   : > { %2340 = vmatpush1.msra.mxu1 %v2207_v52 }
 0x71e   : > { %2341 = vmatprep.subr.mxu1 %v5949_v0 }
 0x71f   : > { %2342 = vmatpush1.msra.mxu1 %v2206_v54 }
 0x720   : > { %2343 = vmatprep.subr.mxu1 %v5949_v0 }
 0x721   : > { %2344 = vmatpush1.msra.mxu1 %v2205_v57  ;;  %v2422_v57 = vld [vmem:[#allocation6 + $0x848] sm:$0xff] }
 0x722   : > { %2345 = vmatprep.subr.mxu1 %v5949_v0 }
 0x723   : > { %2346 = vmatpush1.msra.mxu1 %v2204_v59 }
 0x724   : > { %2347 = vmatprep.subr.mxu1 %v5949_v0 }
 0x725   : > { %2348 = vmatpush1.msra.mxu1 %v2203_v50  ;;  %v2420_v50 = vld [vmem:[#allocation6 + $0x838] sm:$0xff] }
 0x726   : > { %2349 = vmatprep.subr.mxu1 %v5949_v0 }
 0x727   : > { %2350 = vmatpush1.msra.mxu1 %v2202_v63  ;;  %v2418_v63 = vld [vmem:[#allocation6 + $0x828] sm:$0xff] }
 0x728   : > { %2351 = vmatprep.subr.mxu1 %v5949_v0 }
 0x729   : > { %2352 = vmatpush1.msra.mxu1 %v2201_v2  ;;  %v2416_v2 = vld [vmem:[#allocation6 + $0x818] sm:$0xff] }
 0x72a   : > { %2353 = vmatprep.subr.mxu1 %v5949_v0 }
 0x72b   : > { %2354 = vmatpush1.msra.mxu1 %v2200_v4  ;;  %v2414_v4 = vld [vmem:[#allocation6 + $0x808] sm:$0xff] }
 0x72c   : > { %2355 = vmatprep.subr.mxu1 %v5949_v0 }
 0x72d   : > { %2356 = vmatpush1.msra.mxu1 %v2199_v6  ;;  %v2412_v6 = vld [vmem:[#allocation6 + $0x7f8] sm:$0xff] }
 0x72e   : > { %2357 = vmatprep.subr.mxu1 %v5949_v0 }
 0x72f   : > { %2358 = vmatpush1.msra.mxu1 %v2198_v8  ;;  %v2410_v8 = vld [vmem:[#allocation6 + $0x7e8] sm:$0xff] }
 0x730   : > { %2359 = vmatprep.subr.mxu1 %v5949_v0 }
 0x731   : > { %2360 = vmatpush1.msra.mxu1 %v2197_v10  ;;  %v2426_v10 = vld [vmem:[#allocation6 + $0x868] sm:$0xff] }
 0x732   : > { %2361 = vmatprep.subr.mxu1 %v5949_v0 }
 0x733   : > { %2362 = vmatpush1.msra.mxu1 %v2196_v12 }
 0x734   : > { %2363 = vmatprep.subr.mxu1 %v5949_v0 }
 0x735   : > { %2364 = vmatpush1.msra.mxu1 %v2195_v15 }
 0x736   : > { %2393 = vmatprep.subr.mxu1 %v5949_v0 }
 0x737   : > { %2394 = vmatpush2.msra.mxu1 %v2212_v19 }
 0x738   : > { %2395 = vmatprep.subr.mxu1 %v5949_v0 }
 0x739   : > { %2396 = vmatpush2.msra.mxu1 %v2211_v22 }
 0x73a   : > { %2609 = vmatprep.subr.mxu1 %v5949_v0 }
 0x7d6   : > { %v2159_v31 = vpop.f32.mrf.mxu1 }
 0x7d7   : > { %v2160_v32 = vadd.f32 %v2159_v31, %v2086_v28  ;;  %v2563_v28 = vld [vmem:[#allocation6 + $0x8d8] sm:$0xff]  ;;  %v2583_v31 = vld [vmem:[#allocation6 + $0x970] sm:$0xff] }
 0x7d8   : > { %v5491_v34 = vpop.f32.mrf.mxu1 }
 0x7d9   : > { %v2163_v36 = vsub.f32 0.0, %v2160_v32  ;;  %v2582_v32 = vld [vmem:[#allocation6 + $0x968] sm:$0xff]  ;;  %v2562_v34 = vld [vmem:[#allocation6 + $0x8d0] sm:$0xff] }
 0x7db   : > { %v2164_v17 = vmul.f32 1.442695, %v2163_v36  ;;  %v2581_v36 = vld [vmem:[#allocation6 + $0x960] sm:$0xff] }
 0x7dd   : > { %5683 = vpow2.f32 %v2164_v17  ;;  %v2561_v17 = vld [vmem:[#allocation6 + $0x8c8] sm:$0xff] }
 0x7ea   : > { %v5684_v37 = vpop.eup %5683 }
 0x7eb   : > { %v2166_v18 = vadd.f32 1.0, %v5684_v37  ;;  %v2580_v37 = vld [vmem:[#allocation6 + $0x958] sm:$0xff] }
 0x7ed   : > { %5685 = vrcp.f32 %v2166_v18  ;;  %v2560_v18 = vld [vmem:[#allocation6 + $0x8c0] sm:$0xff] }
 0x7fa   : > { %v5686_v39 = vpop.eup %5685 }
 0x7fb   : > { %v2172_v62 = vrot.slane %v5686_v39, %v6526_v33  ;;  %v2579_v39 = vld [vmem:[#allocation6 + $0x950] sm:$0xff] }
 0x7fd   : > { %v2173_v42 = vmul.f32 %v2172_v62, %v6754_v35  ;;  %v2174_v43 = vmul.f32 %v2172_v62, %v6756_v40  ;;  %v2430_v40 = vrot.slane %v6794_v21, 2  ;;  %v2559_v62 = vld [vmem:[#allocation6 + $0x8b8] sm:$0xff] }
 0x7ff   : > { %v2175_v44 = vadd.f32 %v2173_v42, %v6532_v38  ;;  %v2176_v56 = vadd.f32 %v2174_v43, %v6535_v41  ;;  %v6850_v58 = vsel %vm631_vm4, %v2430_v40, %v6839_v51  ;;  %v2558_v42 = vld [vmem:[#allocation6 + $0x8b0] sm:$0xff]  ;;  %v2557_v43 = vld [vmem:[#allocation6 + $0x8a8] sm:$0xff]  ;;  %v2572_v40 = vld [vmem:[#allocation6 + $0x918] sm:$0xff] }
 0x801   : > { %v2179_v29 = vrot.slane %v2175_v44, 7  ;;  %v2180_v30 = vrot.slane %v2176_v56, 7  ;;  %v2578_v44 = vld [vmem:[#allocation6 + $0x948] sm:$0xff]  ;;  %v2577_v56 = vld [vmem:[#allocation6 + $0x940] sm:$0xff] }
 0x803   : > { %2185 = vst [vmem:[#allocation2] sm:$0xfe] %v2179_v29  ;;  %2187 = vst [vmem:[#allocation2 + $0x20] sm:$0x1] %v2180_v30  ;;  %v6825_v46 = vsel %vm382_vm2, %v2179_v29, %v2180_v30  ;;  %v2556_v29 = vld [vmem:[#allocation6 + $0x8a0] sm:$0xff]  ;;  %v2576_v30 = vld [vmem:[#allocation6 + $0x938] sm:$0xff] }
 0x804   : > { %v2239_v41 = vrot.slane %v6825_v46, 1  ;;  %v2428_v15 = vrot.slane %v6825_v46, 2 }
 0x80a   : > { %v6828_v48 = vld [vmem:[#allocation2] sm:$0xff] }
 0x80b   : > { %v6830_v35 = vld [vmem:[#allocation2 + $0x20] sm:$0x3]  ;;  %2398 = vmatmul.mubr.f32.vlgmr.msra.gmra.mxu1 %v6828_v48  ;;  %v2238_v38 = vrot.slane %v6828_v48, 1  ;;  %v2427_v12 = vrot.slane %v6828_v48, 2  ;;  %v2574_v48 = vld [vmem:[#allocation6 + $0x928] sm:$0xff] }
 0x80c   : > { %5247 = vmatprep.mubr.msk.f32.mxu1 %vm371_vm0, %v6801_v25  ;;  %v2244_v54 = vrot.slane %v6830_v35, 1  ;;  %v2433_v20 = vrot.slane %v6830_v35, 2  ;;  %2610 = vmatpush1.msra.mxu1 %v2584_v27  ;;  %v2553_v35 = vld [vmem:[#allocation6 + $0x888] sm:$0xff] }
 0x80d   : > { %v2240_v52 = vsel %vm441_vm3, %v2238_v38, %v2239_v41  ;;  %v2429_v19 = vsel %vm631_vm4, %v2427_v12, %v2428_v15  ;;  %2611 = vmatprep.subr.mxu1 %v5949_v0  ;;  %v2573_v38 = vld [vmem:[#allocation6 + $0x920] sm:$0xff]  ;;  %v5698_v27 = vld [vmem:[%s6173_s9 + $0x8] sm:$0xff] }
 0x80e   : > { %2319 = vmatmul.mubr.f32.vlgmr.msra.gmra.mxu0 %v2240_v52  ;;  %v2245_v59 = vsel %vm441_vm3, %v2239_v41, %v2244_v54  ;;  %v2434_v22 = vsel %vm631_vm4, %v2428_v15, %v2433_v20  ;;  %2612 = vmatpush1.msra.mxu1 %v2583_v31  ;;  %v2552_v41 = vld [vmem:[#allocation6 + $0x880] sm:$0xff]  ;;  %v2571_v52 = vld [vmem:[#allocation6 + $0x910] sm:$0xff]  ;;  %v2570_v54 = vld [vmem:[#allocation6 + $0x908] sm:$0xff] }
 0x80f   : > { %2403 = vmatmul.mubr.f32.gmra.mxu1 %v6825_v46  ;;  %2444 = vmatpush1.msra.mxu0 %v2424_v49  ;;  %v2575_v46 = vld [vmem:[#allocation6 + $0x930] sm:$0xff]  ;;  %v2551_v49 = vld [vmem:[#allocation6 + $0x878] sm:$0xff] }
 0x810   : > { %2445 = vmatprep.subr.mxu0 %v5949_v0  ;;  %5245 = vmatprep.mubr.msk.f32.mxu0 %vm371_vm0, %v2247_v53  ;;  %v2550_v53 = vld [vmem:[#allocation6 + $0x870] sm:$0xff] }
 0x811   : > { %2446 = vmatpush1.msra.mxu0 %v2423_v55  ;;  %5251 = vmatprep.mubr.msk.f32.mxu1 %vm371_vm0, %v6812_v13  ;;  %v2567_v55 = vld [vmem:[#allocation6 + $0x8f8] sm:$0xff] }
 0x812   : > { %2447 = vmatprep.subr.mxu0 %v5949_v0  ;;  %2324 = vmatmul.mubr.f32.gmra.mxu0 %v2245_v59  ;;  %v2569_v59 = vld [vmem:[#allocation6 + $0x900] sm:$0xff] }
 0x813   : > { %2448 = vmatpush1.msra.mxu0 %v2422_v57  ;;  %5248 = vmatprep.mubr.msk.f32.mxu0 %vm371_vm0, %v6850_v58  ;;  %v2566_v57 = vld [vmem:[#allocation6 + $0x8f0] sm:$0xff] }
 0x814   : > { %2449 = vmatprep.subr.mxu0 %v5949_v0  ;;  %2613 = vmatprep.subr.mxu1 %v5949_v0 }
 0x815   : > { %2450 = vmatpush1.msra.mxu0 %v2421_v60  ;;  %2614 = vmatpush1.msra.mxu1 %v2582_v32  ;;  %v2586_v60 = vld [vmem:[#allocation6 + $0x988] sm:$0xff]  ;;  %v6929_v32 = vld [vmem:[#allocation2 + $0x28] sm:$0x3] }
 0x816   : > { %2451 = vmatprep.subr.mxu0 %v5949_v0  ;;  %2615 = vmatprep.subr.mxu1 %v5949_v0 }
 0x817   : > { %2452 = vmatpush1.msra.mxu0 %v2420_v50  ;;  %2616 = vmatpush1.msra.mxu1 %v2581_v36  ;;  %v2585_v50 = vld [vmem:[#allocation6 + $0x980] sm:$0xff]  ;;  %v2601_v36 = vrot.slane %v6929_v32, 1 }
 0x818   : > { %2453 = vmatprep.subr.mxu0 %v5949_v0  ;;  %2617 = vmatprep.subr.mxu1 %v5949_v0 }
 0x819   : > { %2454 = vmatpush1.msra.mxu0 %v2419_v61  ;;  %2618 = vmatpush1.msra.mxu1 %v2580_v37 }
 0x81a   : > { %2455 = vmatprep.subr.mxu0 %v5949_v0  ;;  %2619 = vmatprep.subr.mxu1 %v5949_v0 }
 0x81b   : > { %2456 = vmatpush1.msra.mxu0 %v2418_v63  ;;  %2620 = vmatpush1.msra.mxu1 %v2579_v39  ;;  %v2779_v39 = vld [vmem:[#allocation6 + $0xa08] sm:$0xff] }
 0x81c   : > { %2457 = vmatprep.subr.mxu0 %v5949_v0  ;;  %2621 = vmatprep.subr.mxu1 %v5949_v0 }
 0x81d   : > { %2458 = vmatpush1.msra.mxu0 %v2417_v1  ;;  %2622 = vmatpush1.msra.mxu1 %v2578_v44 }
 0x81e   : > { %2459 = vmatprep.subr.mxu0 %v5949_v0  ;;  %2623 = vmatprep.subr.mxu1 %v5949_v0 }
 0x81f   : > { %2460 = vmatpush1.msra.mxu0 %v2416_v2  ;;  %2624 = vmatpush1.msra.mxu1 %v2577_v56 }
 0x820   : > { %2461 = vmatprep.subr.mxu0 %v5949_v0  ;;  %2625 = vmatprep.subr.mxu1 %v5949_v0 }
 0x821   : > { %2462 = vmatpush1.msra.mxu0 %v2415_v3  ;;  %2626 = vmatpush1.msra.mxu1 %v2576_v30 }
 0x822   : > { %2463 = vmatprep.subr.mxu0 %v5949_v0  ;;  %2627 = vmatprep.subr.mxu1 %v5949_v0 }
 0x823   : > { %2464 = vmatpush1.msra.mxu0 %v2414_v4  ;;  %2628 = vmatpush1.msra.mxu1 %v2575_v46  ;;  %v2775_v46 = vld [vmem:[#allocation6 + $0x9e8] sm:$0xff] }
 0x824   : > { %2465 = vmatprep.subr.mxu0 %v5949_v0  ;;  %2629 = vmatprep.subr.mxu1 %v5949_v0 }
 0x825   : > { %2466 = vmatpush1.msra.mxu0 %v2413_v5  ;;  %2630 = vmatpush1.msra.mxu1 %v2574_v48  ;;  %v2773_v48 = vld [vmem:[#allocation6 + $0x9d8] sm:$0xff] }
 0x826   : > { %2467 = vmatprep.subr.mxu0 %v5949_v0  ;;  %2631 = vmatprep.subr.mxu1 %v5949_v0 }
 0x827   : > { %2468 = vmatpush1.msra.mxu0 %v2412_v6  ;;  %2632 = vmatpush1.msra.mxu1 %v2573_v38  ;;  %v2770_v38 = vld [vmem:[#allocation6 + $0x9c0] sm:$0xff] }
 0x828   : > { %2469 = vmatprep.subr.mxu0 %v5949_v0  ;;  %2633 = vmatprep.subr.mxu1 %v5949_v0 }
 0x829   : > { %2470 = vmatpush1.msra.mxu0 %v2411_v7  ;;  %2634 = vmatpush1.msra.mxu1 %v2572_v40  ;;  %v2768_v40 = vld [vmem:[#allocation6 + $0x9b0] sm:$0xff] }
 0x82a   : > { %2471 = vmatprep.subr.mxu0 %v5949_v0  ;;  %2635 = vmatprep.subr.mxu1 %v5949_v0 }
 0x82b   : > { %2472 = vmatpush1.msra.mxu0 %v2410_v8  ;;  %2636 = vmatpush1.msra.mxu1 %v2571_v52  ;;  %v2766_v52 = vld [vmem:[#allocation6 + $0x9a0] sm:$0xff] }
 0x82c   : > { %2473 = vmatprep.subr.mxu0 %v5949_v0  ;;  %2637 = vmatprep.subr.mxu1 %v5949_v0 }
 0x82d   : > { %2474 = vmatpush1.msra.mxu0 %v2409_v9  ;;  %2638 = vmatpush1.msra.mxu1 %v2570_v54  ;;  %v5250_v9 = vld [vmem:[#allocation8 + $0x4] ss:$0 sm:$0xff] }
 0x82e   : > { %2503 = vmatprep.subr.mxu0 %v5949_v0  ;;  %2639 = vmatprep.subr.mxu1 %v5949_v0  ;;  %v2764_v54 = vld [vmem:[#allocation6 + $0x990] sm:$0xff] }
 0x82f   : > { %2504 = vmatpush2.msra.mxu0 %v2426_v10  ;;  %2640 = vmatpush1.msra.mxu1 %v2569_v59 }
 0x830   : > { %2505 = vmatprep.subr.mxu0 %v5949_v0  ;;  %2669 = vmatprep.subr.mxu1 %v5949_v0 }
 0x831   : > { %2506 = vmatpush2.msra.mxu0 %v2425_v14  ;;  %2670 = vmatpush2.msra.mxu1 %v2586_v60  ;;  %v2780_v60 = vld [vmem:[#allocation6 + $0xa10] sm:$0xff] }
 0x832   : > { %2508 = vmatmul.mubr.f32.vlgmr.msra.gmra.mxu0 %v2429_v19  ;;  %2688 = vmatprep.subr.mxu0 %v5949_v0 }
 0x833   : > { %5249 = vmatprep.mubr.msk.f32.mxu0 %vm371_vm0, %v2436_v16  ;;  %2689 = vmatpush1.msra.mxu0 %v2565_v23  ;;  %v5697_v16 = vld [vmem:[%s6173_s9] sm:$0xff] }
 0x834   : > { %2690 = vmatprep.subr.mxu0 %v5949_v0  ;;  %2671 = vmatprep.subr.mxu1 %v5949_v0 }
 0x835   : > { %2691 = vmatpush1.msra.mxu0 %v2564_v24  ;;  %2672 = vmatpush2.msra.mxu1 %v2585_v50 }
 0x836   : > { %2513 = vmatmul.mubr.f32.gmra.mxu0 %v2434_v22  ;;  %2692 = vmatprep.subr.mxu0 %v5949_v0 }
 0x837   : > { %5253 = vmatprep.mubr.msk.f32.mxu0 %vm371_vm0, %v6794_v21  ;;  %2693 = vmatpush1.msra.mxu0 %v2563_v28 }
 0x838   : > { %2694 = vmatprep.subr.mxu0 %v5949_v0  ;;  %2798 = vmatprep.subr.mxu1 %v5949_v0 }
 0x839   : > { %2695 = vmatpush1.msra.mxu0 %v2562_v34 }
 0x83a   : > { %2696 = vmatprep.subr.mxu0 %v5949_v0 }
 0x83b   : > { %2697 = vmatpush1.msra.mxu0 %v2561_v17 }
 0x83c   : > { %2698 = vmatprep.subr.mxu0 %v5949_v0 }
 0x83d   : > { %2699 = vmatpush1.msra.mxu0 %v2560_v18 }
 0x83e   : > { %2700 = vmatprep.subr.mxu0 %v5949_v0 }
 0x83f   : > { %2701 = vmatpush1.msra.mxu0 %v2559_v62 }
 0x840   : > { %2702 = vmatprep.subr.mxu0 %v5949_v0 }
 0x841   : > { %2703 = vmatpush1.msra.mxu0 %v2558_v42  ;;  %v2602_v42 = vsel %vm441_vm3, %v6806_v26, %v2601_v36  ;;  %v2929_v36 = vld [vmem:[#allocation6 + $0xad8] sm:$0xff] }
 0x842   : > { %2704 = vmatprep.subr.mxu0 %v5949_v0 }
 0x843   : > { %2705 = vmatpush1.msra.mxu0 %v2557_v43  ;;  %v2778_v43 = vld [vmem:[#allocation6 + $0xa00] sm:$0xff] }
 0x844   : > { %2706 = vmatprep.subr.mxu0 %v5949_v0 }
 0x845   : > { %2707 = vmatpush1.msra.mxu0 %v2556_v29  ;;  %v2777_v29 = vld [vmem:[#allocation6 + $0x9f8] sm:$0xff] }
 0x846   : > { %2708 = vmatprep.subr.mxu0 %v5949_v0 }
 0x847   : > { %2709 = vmatpush1.msra.mxu0 %v2555_v45  ;;  %v2776_v45 = vld [vmem:[#allocation6 + $0x9f0] sm:$0xff] }
 0x848   : > { %2710 = vmatprep.subr.mxu0 %v5949_v0 }
 0x849   : > { %2711 = vmatpush1.msra.mxu0 %v2554_v47  ;;  %v2774_v47 = vld [vmem:[#allocation6 + $0x9e0] sm:$0xff] }
 0x84a   : > { %2712 = vmatprep.subr.mxu0 %v5949_v0 }
 0x84b   : > { %2713 = vmatpush1.msra.mxu0 %v2553_v35  ;;  %v2771_v35 = vld [vmem:[#allocation6 + $0x9c8] sm:$0xff] }
 0x84c   : > { %2714 = vmatprep.subr.mxu0 %v5949_v0 }
 0x84d   : > { %2715 = vmatpush1.msra.mxu0 %v2552_v41  ;;  %v2769_v41 = vld [vmem:[#allocation6 + $0x9b8] sm:$0xff] }
 0x84e   : > { %2716 = vmatprep.subr.mxu0 %v5949_v0 }
 0x84f   : > { %2717 = vmatpush1.msra.mxu0 %v2551_v49  ;;  %v2767_v49 = vld [vmem:[#allocation6 + $0x9a8] sm:$0xff] }
 0x850   : > { %2718 = vmatprep.subr.mxu0 %v5949_v0 }
 0x851   : > { %2719 = vmatpush1.msra.mxu0 %v2550_v53  ;;  %v2765_v53 = vld [vmem:[#allocation6 + $0x998] sm:$0xff] }
 0x852   : > { %2748 = vmatprep.subr.mxu0 %v5949_v0 }
 0x853   : > { %2749 = vmatpush2.msra.mxu0 %v2567_v55  ;;  %v2781_v55 = vld [vmem:[#allocation6 + $0xa18] sm:$0xff] }
 0x854   : > { %2750 = vmatprep.subr.mxu0 %v5949_v0 }
 0x855   : > { %2751 = vmatpush2.msra.mxu0 %v2566_v57  ;;  %v2790_v57 = vrot.slane %v6929_v32, 2  ;;  %v2930_v32 = vld [vmem:[#allocation6 + $0xae0] sm:$0xff] }
 0x856   : > { %2964 = vmatprep.subr.mxu0 %v5949_v0 }
 0x8cb   : > { %v2399_v61 = vpop.f32.mrf.mxu1 }
 0x8cd   : > { %v2401_v63 = vpop.f32.mrf.mxu1 }
 0x8ce   : > { %v2320_v1 = vpop.f32.mrf.mxu0 }
 0x8cf   : > { %v2404_v2 = vpop.f32.mrf.mxu1  ;;  %v2400_v7 = vadd.f32 %v2399_v61, %v2320_v1  ;;  %v2791_v61 = vsel %vm631_vm4, %v6839_v51, %v2790_v57 }
 0x8d0   : > { %v2322_v3 = vpop.f32.mrf.mxu0 }
 0x8d1   : > { %v2406_v4 = vpop.f32.mrf.mxu1  ;;  %v2920_v3 = vld [vmem:[#allocation6 + $0xa98] sm:$0xff] }
 0x8d2   : > { %v2325_v5 = vpop.f32.mrf.mxu0  ;;  %v2919_v4 = vld [vmem:[#allocation6 + $0xa90] sm:$0xff] }
 0x8d3   : > { %v2405_v12 = vadd.f32 %v2404_v2, %v2325_v5  ;;  %v2939_v5 = vld [vmem:[#allocation6 + $0xb28] sm:$0xff] }
 0x8d4   : > { %v2327_v6 = vpop.f32.mrf.mxu0 }
 0x8d5   : > { %v2918_v6 = vld [vmem:[#allocation6 + $0xa88] sm:$0xff] }
 0x8f2   : > { %v2509_v8 = vpop.f32.mrf.mxu0 }
 0x8f3   : > { %v2518_v10 = vadd.f32 %v2509_v8, %v2400_v7  ;;  %v2938_v7 = vld [vmem:[#allocation6 + $0xb20] sm:$0xff]  ;;  %v2937_v8 = vld [vmem:[#allocation6 + $0xb18] sm:$0xff] }
 0x8f4   : > { %v2511_v11 = vpop.f32.mrf.mxu0 }
 0x8f5   : > { %v2528_v14 = vadd.f32 %v5250_v9, %v2518_v10  ;;  %v2916_v10 = vld [vmem:[#allocation6 + $0xa78] sm:$0xff]  ;;  %v2935_v11 = vld [vmem:[#allocation6 + $0xb08] sm:$0xff] }
 0x8f6   : > { %v2514_v15 = vpop.f32.mrf.mxu0 }
 0x8f7   : > { %v6922_v19 = vadd.f32 %v5697_v16, %v2528_v14  ;;  %v2519_v20 = vadd.f32 %v2514_v15, %v2405_v12  ;;  %v2915_v12 = vld [vmem:[#allocation6 + $0xa70] sm:$0xff]  ;;  %v2934_v14 = vld [vmem:[#allocation6 + $0xb00] sm:$0xff]  ;;  %v2914_v15 = vld [vmem:[#allocation6 + $0xa68] sm:$0xff] }
 0x8f8   : > { %v2516_v22 = vpop.f32.mrf.mxu0  ;;  %v2913_v16 = vld [vmem:[#allocation6 + $0xa60] sm:$0xff] }
 0x8f9   : > { %v2534_v23 = vrot.slane %v6922_v19, 7  ;;  %v2529_v24 = vadd.f32 %v5250_v9, %v2519_v20  ;;  %v2917_v9 = vld [vmem:[#allocation6 + $0xa80] sm:$0xff]  ;;  %v2912_v20 = vld [vmem:[#allocation6 + $0xa58] sm:$0xff] }
 0x8fa   : > { %v2933_v22 = vld [vmem:[#allocation6 + $0xaf8] sm:$0xff] }
 0x8fb   : > { %2540 = vst [vmem:[#allocation2] sm:$0xfe] %v2534_v23  ;;  %v6926_v28 = vadd.f32 %v5698_v27, %v2529_v24  ;;  %v2911_v24 = vld [vmem:[#allocation6 + $0xa50] sm:$0xff]  ;;  %v2931_v27 = vld [vmem:[#allocation6 + $0xae8] sm:$0xff] }
 0x8fd   : > { %v2535_v31 = vrot.slane %v6926_v28, 7 }
 0x8ff   : > { %2542 = vst [vmem:[#allocation2 + $0x20] sm:$0x1] %v2535_v31  ;;  %v6932_v34 = vsel %vm382_vm2, %v2534_v23, %v2535_v31  ;;  %v2932_v23 = vld [vmem:[#allocation6 + $0xaf0] sm:$0xff]  ;;  %v2910_v31 = vld [vmem:[#allocation6 + $0xa48] sm:$0xff] }
 0x900   : > { %v2594_v37 = vrot.slane %v6932_v34, 1  ;;  %v2783_v50 = vrot.slane %v6932_v34, 2 }
 0x902   : > { %v6935_v17 = vld [vmem:[#allocation2] sm:$0xff] }
 0x903   : > { %2753 = vmatmul.mubr.f32.vlgmr.msra.gmra.mxu0 %v6935_v17  ;;  %v2593_v18 = vrot.slane %v6935_v17, 1  ;;  %v2782_v59 = vrot.slane %v6935_v17, 2  ;;  %v2908_v17 = vld [vmem:[#allocation6 + $0xa38] sm:$0xff] }
 0x904   : > { %5254 = vmatprep.mubr.msk.f32.mxu0 %vm371_vm0, %v6801_v25  ;;  %2965 = vmatpush1.msra.mxu0 %v2939_v5 }
 0x905   : > { %v2595_v62 = vsel %vm441_vm3, %v2593_v18, %v2594_v37  ;;  %v2784_v63 = vsel %vm631_vm4, %v2782_v59, %v2783_v50  ;;  %2966 = vmatprep.subr.mxu0 %v5949_v0  ;;  %v2907_v18 = vld [vmem:[#allocation6 + $0xa30] sm:$0xff] }
 0x906   : > { %2674 = vmatmul.mubr.f32.vlgmr.msra.gmra.mxu1 %v2595_v62  ;;  %v6945_v44 = vld [vmem:[#allocation2 + $0x20] sm:$0x3]  ;;  %2967 = vmatpush1.msra.mxu0 %v2938_v7  ;;  %v2906_v62 = vld [vmem:[#allocation6 + $0xa28] sm:$0xff] }
 0x907   : > { %2758 = vmatmul.mubr.f32.gmra.mxu0 %v6932_v34  ;;  %2799 = vmatpush1.msra.mxu1 %v2779_v39  ;;  %v2599_v56 = vrot.slane %v6945_v44, 1  ;;  %v2788_v1 = vrot.slane %v6945_v44, 2  ;;  %v2909_v34 = vld [vmem:[#allocation6 + $0xa40] sm:$0xff]  ;;  %v2927_v39 = vld [vmem:[#allocation6 + $0xac8] sm:$0xff]  ;;  %v2925_v44 = vld [vmem:[#allocation6 + $0xab8] sm:$0xff] }
 0x908   : > { %2800 = vmatprep.subr.mxu1 %v5949_v0  ;;  %5252 = vmatprep.mubr.msk.f32.mxu1 %vm371_vm0, %v2602_v42  ;;  %v2926_v42 = vld [vmem:[#allocation6 + $0xac0] sm:$0xff] }
 0x909   : > { %2801 = vmatpush1.msra.mxu1 %v2778_v43  ;;  %v2600_v30 = vsel %vm441_vm3, %v2594_v37, %v2599_v56  ;;  %5258 = vmatprep.mubr.msk.f32.mxu0 %vm371_vm0, %v6812_v13  ;;  %v2772_v13 = vld [vmem:[#allocation6 + $0x9d0] sm:$0xff]  ;;  %v2789_v2 = vsel %vm631_vm4, %v2783_v50, %v2788_v1  ;;  %v2905_v43 = vld [vmem:[#allocation6 + $0xa20] sm:$0xff]  ;;  %v2922_v56 = vld [vmem:[#allocation6 + $0xaa8] sm:$0xff] }
 0x90a   : > { %2802 = vmatprep.subr.mxu1 %v5949_v0  ;;  %2679 = vmatmul.mubr.f32.gmra.mxu1 %v2600_v30  ;;  %v2928_v37 = vld [vmem:[#allocation6 + $0xad0] sm:$0xff] }
 0x90b   : > { %2803 = vmatpush1.msra.mxu1 %v2777_v29  ;;  %5255 = vmatprep.mubr.msk.f32.mxu1 %vm371_vm0, %v6850_v58  ;;  %v2921_v29 = vld [vmem:[#allocation6 + $0xaa0] sm:$0xff]  ;;  %v2924_v30 = vld [vmem:[#allocation6 + $0xab0] sm:$0xff] }
 0x90c   : > { %2804 = vmatprep.subr.mxu1 %v5949_v0  ;;  %2968 = vmatprep.subr.mxu0 %v5949_v0 }
 0x90d   : > { %2805 = vmatpush1.msra.mxu1 %v2776_v45  ;;  %2969 = vmatpush1.msra.mxu0 %v2937_v8  ;;  %v2941_v45 = vld [vmem:[#allocation6 + $0xb38] sm:$0xff] }
 0x90e   : > { %2806 = vmatprep.subr.mxu1 %v5949_v0  ;;  %2970 = vmatprep.subr.mxu0 %v5949_v0 }
 0x90f   : > { %2807 = vmatpush1.msra.mxu1 %v2775_v46  ;;  %v2940_v46 = vld [vmem:[#allocation6 + $0xb30] sm:$0xff] }
 0x910   : > { %2808 = vmatprep.subr.mxu1 %v5949_v0 }
 0x911   : > { %2809 = vmatpush1.msra.mxu1 %v2774_v47 }
 0x912   : > { %2810 = vmatprep.subr.mxu1 %v5949_v0 }
 0x913   : > { %2811 = vmatpush1.msra.mxu1 %v2773_v48 }
 0x914   : > { %2812 = vmatprep.subr.mxu1 %v5949_v0 }
 0x915   : > { %2813 = vmatpush1.msra.mxu1 %v2772_v13 }
 0x916   : > { %2814 = vmatprep.subr.mxu1 %v5949_v0 }
 0x917   : > { %2815 = vmatpush1.msra.mxu1 %v2771_v35 }
 0x918   : > { %2816 = vmatprep.subr.mxu1 %v5949_v0 }
 0x919   : > { %2817 = vmatpush1.msra.mxu1 %v2770_v38 }
 0x91a   : > { %2818 = vmatprep.subr.mxu1 %v5949_v0 }
 0x91b   : > { %2819 = vmatpush1.msra.mxu1 %v2769_v41 }
 0x91c   : > { %2820 = vmatprep.subr.mxu1 %v5949_v0 }
 0x91d   : > { %2821 = vmatpush1.msra.mxu1 %v2768_v40 }
 0x91e   : > { %2822 = vmatprep.subr.mxu1 %v5949_v0 }
 0x91f   : > { %2823 = vmatpush1.msra.mxu1 %v2767_v49 }
 0x920   : > { %2824 = vmatprep.subr.mxu1 %v5949_v0 }
 0x921   : > { %2825 = vmatpush1.msra.mxu1 %v2766_v52 }
 0x922   : > { %2826 = vmatprep.subr.mxu1 %v5949_v0 }
 0x923   : > { %2827 = vmatpush1.msra.mxu1 %v2765_v53 }
 0x924   : > { %2828 = vmatprep.subr.mxu1 %v5949_v0 }
 0x925   : > { %2829 = vmatpush1.msra.mxu1 %v2764_v54  ;;  %v5257_v54 = vld [vmem:[#allocation8 + $0x5] ss:$0 sm:$0xff] }
 0x926   : > { %2858 = vmatprep.subr.mxu1 %v5949_v0 }
 0x927   : > { %2859 = vmatpush2.msra.mxu1 %v2781_v55 }
 0x928   : > { %2860 = vmatprep.subr.mxu1 %v5949_v0 }
 0x929   : > { %2861 = vmatpush2.msra.mxu1 %v2780_v60 }
 0x92a   : > { %2863 = vmatmul.mubr.f32.vlgmr.msra.gmra.mxu1 %v2784_v63  ;;  %3043 = vmatprep.subr.mxu1 %v5949_v0 }
 0x92b   : > { %5256 = vmatprep.mubr.msk.f32.mxu1 %vm371_vm0, %v2791_v61  ;;  %3044 = vmatpush1.msra.mxu1 %v2920_v3 }
 0x92c   : > { %3045 = vmatprep.subr.mxu1 %v5949_v0 }
 0x92d   : > { %3046 = vmatpush1.msra.mxu1 %v2919_v4 }
 0x92e   : > { %2868 = vmatmul.mubr.f32.gmra.mxu1 %v2789_v2  ;;  %3047 = vmatprep.subr.mxu1 %v5949_v0 }
 0x92f   : > { %5260 = vmatprep.mubr.msk.f32.mxu1 %vm371_vm0, %v6794_v21  ;;  %3048 = vmatpush1.msra.mxu1 %v2918_v6  ;;  %v2936_v21 = vld [vmem:[#allocation6 + $0xb10] sm:$0xff]  ;;  %v7020_v6 = vld [vmem:[#allocation2 + $0x28] sm:$0x3] }
 0x930   : > { %3049 = vmatprep.subr.mxu1 %v5949_v0  ;;  %2971 = vmatpush1.msra.mxu0 %v2936_v21  ;;  %v2956_v8 = vrot.slane %v7020_v6, 1 }
 0x931   : > { %3050 = vmatpush1.msra.mxu1 %v2917_v9  ;;  %2972 = vmatprep.subr.mxu0 %v5949_v0 }
 0x932   : > { %3051 = vmatprep.subr.mxu1 %v5949_v0  ;;  %2973 = vmatpush1.msra.mxu0 %v2935_v11  ;;  %v3134_v11 = vld [vmem:[#allocation6 + $0xbb8] sm:$0xff] }
 0x933   : > { %3052 = vmatpush1.msra.mxu1 %v2916_v10  ;;  %2974 = vmatprep.subr.mxu0 %v5949_v0 }
 0x934   : > { %3053 = vmatprep.subr.mxu1 %v5949_v0  ;;  %2975 = vmatpush1.msra.mxu0 %v2934_v14  ;;  %v2957_v14 = vsel %vm441_vm3, %v6806_v26, %v2956_v8  ;;  %v3131_v26 = vld [vmem:[#allocation6 + $0xba0] sm:$0xff] }
 0x935   : > { %3054 = vmatpush1.msra.mxu1 %v2915_v12  ;;  %2976 = vmatprep.subr.mxu0 %v5949_v0 }
 0x936   : > { %3055 = vmatprep.subr.mxu1 %v5949_v0  ;;  %2977 = vmatpush1.msra.mxu0 %v2933_v22 }
 0x937   : > { %3056 = vmatpush1.msra.mxu1 %v2914_v15  ;;  %2978 = vmatprep.subr.mxu0 %v5949_v0  ;;  %v3133_v15 = vld [vmem:[#allocation6 + $0xbb0] sm:$0xff] }
 0x938   : > { %3057 = vmatprep.subr.mxu1 %v5949_v0  ;;  %2979 = vmatpush1.msra.mxu0 %v2932_v23  ;;  %v3130_v23 = vld [vmem:[#allocation6 + $0xb98] sm:$0xff] }
 0x939   : > { %3058 = vmatpush1.msra.mxu1 %v2913_v16  ;;  %2980 = vmatprep.subr.mxu0 %v5949_v0 }
 0x93a   : > { %3059 = vmatprep.subr.mxu1 %v5949_v0  ;;  %2981 = vmatpush1.msra.mxu0 %v2931_v27  ;;  %v3128_v27 = vld [vmem:[#allocation6 + $0xb88] sm:$0xff] }
 0x93b   : > { %3060 = vmatpush1.msra.mxu1 %v2912_v20  ;;  %2982 = vmatprep.subr.mxu0 %v5949_v0 }
 0x93c   : > { %3061 = vmatprep.subr.mxu1 %v5949_v0  ;;  %2983 = vmatpush1.msra.mxu0 %v2930_v32  ;;  %v3126_v32 = vld [vmem:[#allocation6 + $0xb78] sm:$0xff] }
 0x93d   : > { %3062 = vmatpush1.msra.mxu1 %v2911_v24  ;;  %2984 = vmatprep.subr.mxu0 %v5949_v0  ;;  %v3129_v24 = vld [vmem:[#allocation6 + $0xb90] sm:$0xff] }
 0x93e   : > { %3063 = vmatprep.subr.mxu1 %v5949_v0  ;;  %2985 = vmatpush1.msra.mxu0 %v2929_v36  ;;  %v3123_v36 = vld [vmem:[#allocation6 + $0xb60] sm:$0xff] }
 0x93f   : > { %3064 = vmatpush1.msra.mxu1 %v2910_v31  ;;  %2986 = vmatprep.subr.mxu0 %v5949_v0  ;;  %v3127_v31 = vld [vmem:[#allocation6 + $0xb80] sm:$0xff] }
 0x940   : > { %3065 = vmatprep.subr.mxu1 %v5949_v0  ;;  %2987 = vmatpush1.msra.mxu0 %v2928_v37  ;;  %v3121_v37 = vld [vmem:[#allocation6 + $0xb50] sm:$0xff] }
 0x941   : > { %3066 = vmatpush1.msra.mxu1 %v2909_v34  ;;  %2988 = vmatprep.subr.mxu0 %v5949_v0  ;;  %v3124_v34 = vld [vmem:[#allocation6 + $0xb68] sm:$0xff] }
 0x942   : > { %3067 = vmatprep.subr.mxu1 %v5949_v0  ;;  %2989 = vmatpush1.msra.mxu0 %v2927_v39  ;;  %v3119_v39 = vld [vmem:[#allocation6 + $0xb40] sm:$0xff] }
 0x943   : > { %3068 = vmatpush1.msra.mxu1 %v2908_v17  ;;  %2990 = vmatprep.subr.mxu0 %v5949_v0  ;;  %v3122_v17 = vld [vmem:[#allocation6 + $0xb58] sm:$0xff] }
 0x944   : > { %3069 = vmatprep.subr.mxu1 %v5949_v0  ;;  %2991 = vmatpush1.msra.mxu0 %v2926_v42  ;;  %v3145_v42 = vrot.slane %v7020_v6, 2 }
 0x945   : > { %3070 = vmatpush1.msra.mxu1 %v2907_v18  ;;  %2992 = vmatprep.subr.mxu0 %v5949_v0  ;;  %v3120_v18 = vld [vmem:[#allocation6 + $0xb48] sm:$0xff] }
 0x946   : > { %3071 = vmatprep.subr.mxu1 %v5949_v0  ;;  %2993 = vmatpush1.msra.mxu0 %v2925_v44  ;;  %v3135_v44 = vld [vmem:[#allocation6 + $0xbc0] sm:$0xff] }
 0x947   : > { %3072 = vmatpush1.msra.mxu1 %v2906_v62  ;;  %2994 = vmatprep.subr.mxu0 %v5949_v0  ;;  %v3136_v62 = vld [vmem:[#allocation6 + $0xbc8] sm:$0xff] }
 0x948   : > { %3073 = vmatprep.subr.mxu1 %v5949_v0  ;;  %2995 = vmatpush1.msra.mxu0 %v2924_v30 }
 0x949   : > { %3074 = vmatpush1.msra.mxu1 %v2905_v43  ;;  %3024 = vmatprep.subr.mxu0 %v5949_v0 }
 0x94a   : > { %3103 = vmatprep.subr.mxu1 %v5949_v0  ;;  %3025 = vmatpush2.msra.mxu0 %v2941_v45 }
 0x94b   : > { %3104 = vmatpush2.msra.mxu1 %v2922_v56  ;;  %3026 = vmatprep.subr.mxu0 %v5949_v0 }
 0x94c   : > { %3105 = vmatprep.subr.mxu1 %v5949_v0  ;;  %3027 = vmatpush2.msra.mxu0 %v2940_v46 }
 0x94d   : > { %3106 = vmatpush2.msra.mxu1 %v2921_v29  ;;  %3153 = vmatprep.subr.mxu0 %v5949_v0  ;;  %v3146_v29 = vsel %vm631_vm4, %v6839_v51, %v3145_v42  ;;  %v5279_v51 = vld [vmem:[%s7693_s3 + $0x170] sm:$0xff]  ;;  %v3482_v42 = vld [vmem:[#allocation6 + $0xcd0] sm:$0xff] }
 0x94e   : > { %5492 = vmatprep.subr.mxu1 %v5949_v0 }
 0x9c3   : > { %v2754_v47 = vpop.f32.mrf.mxu0 }
 0x9c5   : > { %v2756_v48 = vpop.f32.mrf.mxu0 }
 0x9c6   : > { %v2675_v13 = vpop.f32.mrf.mxu1  ;;  %v5278_v48 = vld [vmem:[%s7693_s3 + $0x168] sm:$0xff] }
 0x9c7   : > { %v2759_v35 = vpop.f32.mrf.mxu0  ;;  %v2755_v52 = vadd.f32 %v2754_v47, %v2675_v13  ;;  %v5280_v47 = vld [vmem:[%s7693_s3 + $0x178] sm:$0xff]  ;;  %v5277_v13 = vld [vmem:[%s7693_s3 + $0x160] sm:$0xff] }
 0x9c8   : > { %v2677_v38 = vpop.f32.mrf.mxu1 }
 0x9c9   : > { %v2761_v41 = vpop.f32.mrf.mxu0  ;;  %v5275_v38 = vld [vmem:[%s7693_s3 + $0x150] sm:$0xff] }
 0x9ca   : > { %v2680_v40 = vpop.f32.mrf.mxu1  ;;  %v5274_v41 = vld [vmem:[%s7693_s3 + $0x148] sm:$0xff] }
 0x9cb   : > { %v2760_v59 = vadd.f32 %v2759_v35, %v2680_v40  ;;  %v5276_v35 = vld [vmem:[%s7693_s3 + $0x158] sm:$0xff]  ;;  %v5273_v40 = vld [vmem:[%s7693_s3 + $0x140] sm:$0xff] }
 0x9cc   : > { %v2682_v49 = vpop.f32.mrf.mxu1 }
 0x9cd   : > { %v5272_v49 = vld [vmem:[%s7693_s3 + $0x138] sm:$0xff] }
 0x9ea   : > { %v2864_v53 = vpop.f32.mrf.mxu1 }
 0x9eb   : > { %v2873_v55 = vadd.f32 %v2864_v53, %v2755_v52  ;;  %v5271_v52 = vld [vmem:[%s7693_s3 + $0x130] sm:$0xff]  ;;  %v5270_v53 = vld [vmem:[%s7693_s3 + $0x128] sm:$0xff] }
 0x9ec   : > { %v2866_v57 = vpop.f32.mrf.mxu1 }
 0x9ed   : > { %v2883_v60 = vadd.f32 %v5257_v54, %v2873_v55  ;;  %v5268_v55 = vld [vmem:[%s7693_s3 + $0x118] sm:$0xff]  ;;  %v5267_v57 = vld [vmem:[%s7693_s3 + $0x110] sm:$0xff] }
 0x9ee   : > { %v2869_v50 = vpop.f32.mrf.mxu1 }
 0x9ef   : > { %v2885_v61 = vmax.f32 %v2883_v60, 0.0  ;;  %v2874_v63 = vadd.f32 %v2869_v50, %v2760_v59  ;;  %v5266_v59 = vld [vmem:[%s7693_s3 + $0x108] sm:$0xff]  ;;  %v5265_v60 = vld [vmem:[%s7693_s3 + $0x100] sm:$0xff] }
 0x9f0   : > { %v2871_v1 = vpop.f32.mrf.mxu1 }
 0x9f1   : > { %v2889_v2 = vrot.slane %v2885_v61, 7  ;;  %v2884_v3 = vadd.f32 %v5257_v54, %v2874_v63  ;;  %v5269_v54 = vld [vmem:[%s7693_s3 + $0x120] sm:$0xff] }
 0x9f3   : > { %2895 = vst [vmem:[#allocation2] sm:$0xfe] %v2889_v2  ;;  %v2886_v4 = vmax.f32 %v2884_v3, 0.0 }
 0x9f5   : > { %v2890_v5 = vrot.slane %v2886_v4, 7 }
 0x9f7   : > { %2897 = vst [vmem:[#allocation2 + $0x20] sm:$0x1] %v2890_v5  ;;  %v7023_v7 = vsel %vm382_vm2, %v2889_v2, %v2890_v5 }
 0x9f8   : > { %v2949_v21 = vrot.slane %v7023_v7, 1  ;;  %v3138_v56 = vrot.slane %v7023_v7, 2 }
 0x9fa   : > { %v7026_v9 = vld [vmem:[#allocation2] sm:$0xff] }
 0x9fb   : > { %3108 = vmatmul.mubr.f32.vlgmr.msra.gmra.mxu1 %v7026_v9  ;;  %v2948_v10 = vrot.slane %v7026_v9, 1  ;;  %v3137_v43 = vrot.slane %v7026_v9, 2 }
 0x9fc   : > { %5261 = vmatprep.mubr.msk.f32.mxu1 %vm371_vm0, %v6801_v25  ;;  %v3132_v25 = vld [vmem:[#allocation6 + $0xba8] sm:$0xff]  ;;  %5493 = vmatpush3.msra.mxu1 %v5280_v47  ;;  %v3478_v47 = vld [vmem:[#allocation6 + $0xcb0] sm:$0xff] }
 0x9fd   : > { %v2950_v12 = vsel %vm441_vm3, %v2948_v10, %v2949_v21  ;;  %v3139_v30 = vsel %vm631_vm4, %v3137_v43, %v3138_v56  ;;  %5494 = vmatprep.subr.mxu1 %v5949_v0  ;;  %v5264_v10 = vld [vmem:[#allocation8 + $0x6] ss:$0 sm:$0xff] }
 0x9fe   : > { %3029 = vmatmul.mubr.f32.vlgmr.msra.gmra.mxu0 %v2950_v12  ;;  %v7036_v16 = vld [vmem:[#allocation2 + $0x20] sm:$0x3]  ;;  %5495 = vmatpush3.msra.mxu1 %v5279_v51 }
 0x9ff   : > { %3113 = vmatmul.mubr.f32.gmra.mxu1 %v7023_v7  ;;  %3154 = vmatpush1.msra.mxu0 %v3134_v11  ;;  %v2954_v20 = vrot.slane %v7036_v16, 1  ;;  %v3143_v45 = vrot.slane %v7036_v16, 2  ;;  %v3461_v43 = vld [vmem:[#allocation6 + $0xc30] sm:$0xff] }
 0xa00   : > { %3155 = vmatprep.subr.mxu0 %v5949_v0  ;;  %5259 = vmatprep.mubr.msk.f32.mxu0 %vm371_vm0, %v2957_v14  ;;  %v3457_v51 = vld [vmem:[#allocation6 + $0xc10] sm:$0xff] }
 0xa01   : > { %3156 = vmatpush1.msra.mxu0 %v3133_v15  ;;  %v2955_v22 = vsel %vm441_vm3, %v2949_v21, %v2954_v20  ;;  %5524 = vmatprep.mubr.msk.f32.mxu1 %vm5950_vm5, %v5949_v0  ;;  %v3144_v46 = vsel %vm631_vm4, %v3138_v56, %v3143_v45  ;;  %v3460_v56 = vld [vmem:[#allocation6 + $0xc28] sm:$0xff]  ;;  %v3479_v45 = vld [vmem:[#allocation6 + $0xcb8] sm:$0xff] }
 0xa02   : > { %3157 = vmatprep.subr.mxu0 %v5949_v0  ;;  %3034 = vmatmul.mubr.f32.gmra.mxu0 %v2955_v22 }
 0xa03   : > { %3158 = vmatpush1.msra.mxu0 %v3132_v25  ;;  %5262 = vmatprep.mubr.msk.f32.mxu0 %vm371_vm0, %v6850_v58  ;;  %v3125_v58 = vld [vmem:[#allocation6 + $0xb70] sm:$0xff] }
 0xa04   : > { %3159 = vmatprep.subr.mxu0 %v5949_v0  ;;  %5496 = vmatprep.subr.mxu1 %v5949_v0 }
 0xa05   : > { %3160 = vmatpush1.msra.mxu0 %v3131_v26  ;;  %5497 = vmatpush3.msra.mxu1 %v5278_v48  ;;  %v3477_v48 = vld [vmem:[#allocation6 + $0xca8] sm:$0xff] }
 0xa06   : > { %3161 = vmatprep.subr.mxu0 %v5949_v0  ;;  %5498 = vmatprep.subr.mxu1 %v5949_v0 }
 0xa07   : > { %3162 = vmatpush1.msra.mxu0 %v3130_v23  ;;  %5499 = vmatpush3.msra.mxu1 %v5277_v13  ;;  %v3456_v13 = vld [vmem:[#allocation6 + $0xc08] sm:$0xff] }
 0xa08   : > { %3163 = vmatprep.subr.mxu0 %v5949_v0  ;;  %5500 = vmatprep.subr.mxu1 %v5949_v0 }
 0xa09   : > { %3164 = vmatpush1.msra.mxu0 %v3129_v24  ;;  %5501 = vmatpush3.msra.mxu1 %v5276_v35  ;;  %v3476_v35 = vld [vmem:[#allocation6 + $0xca0] sm:$0xff] }
 0xa0a   : > { %3165 = vmatprep.subr.mxu0 %v5949_v0  ;;  %5502 = vmatprep.subr.mxu1 %v5949_v0 }
 0xa0b   : > { %3166 = vmatpush1.msra.mxu0 %v3128_v27  ;;  %5503 = vmatpush3.msra.mxu1 %v5275_v38  ;;  %v3455_v38 = vld [vmem:[#allocation6 + $0xc00] sm:$0xff] }
 0xa0c   : > { %3167 = vmatprep.subr.mxu0 %v5949_v0  ;;  %5504 = vmatprep.subr.mxu1 %v5949_v0 }
 0xa0d   : > { %3168 = vmatpush1.msra.mxu0 %v3127_v31  ;;  %5505 = vmatpush3.msra.mxu1 %v5274_v41  ;;  %v3338_v31 = vld [vmem:[#allocation11 + $0x8] sm:$0xf]  ;;  %v3475_v41 = vld [vmem:[#allocation6 + $0xc98] sm:$0xff] }
 0xa0e   : > { %3169 = vmatprep.subr.mxu0 %v5949_v0  ;;  %5506 = vmatprep.subr.mxu1 %v5949_v0 }
 0xa0f   : > { %3170 = vmatpush1.msra.mxu0 %v3126_v32  ;;  %5507 = vmatpush3.msra.mxu1 %v5273_v40  ;;  %v3265_v32 = vld [vmem:[#allocation9 + $0x2] sm:$0x1] }
 0xa10   : > { %3171 = vmatprep.subr.mxu0 %v5949_v0  ;;  %5508 = vmatprep.subr.mxu1 %v5949_v0  ;;  %v3454_v40 = vld [vmem:[#allocation6 + $0xbf8] sm:$0xff] }
 0xa11   : > { %3172 = vmatpush1.msra.mxu0 %v3125_v58  ;;  %5509 = vmatpush3.msra.mxu1 %v5272_v49  ;;  %v3474_v49 = vld [vmem:[#allocation6 + $0xc90] sm:$0xff] }
 0xa12   : > { %3173 = vmatprep.subr.mxu0 %v5949_v0  ;;  %5510 = vmatprep.subr.mxu1 %v5949_v0 }
 0xa13   : > { %3174 = vmatpush1.msra.mxu0 %v3124_v34  ;;  %5511 = vmatpush3.msra.mxu1 %v5271_v52  ;;  %v3453_v52 = vld [vmem:[#allocation6 + $0xbf0] sm:$0xff] }
 0xa14   : > { %3175 = vmatprep.subr.mxu0 %v5949_v0  ;;  %5512 = vmatprep.subr.mxu1 %v5949_v0 }
 0xa15   : > { %3176 = vmatpush1.msra.mxu0 %v3123_v36  ;;  %5513 = vmatpush3.msra.mxu1 %v5270_v53  ;;  %v3473_v53 = vld [vmem:[#allocation6 + $0xc88] sm:$0xff] }
 0xa16   : > { %3177 = vmatprep.subr.mxu0 %v5949_v0  ;;  %5514 = vmatprep.subr.mxu1 %v5949_v0 }
 0xa17   : > { %3178 = vmatpush1.msra.mxu0 %v3122_v17  ;;  %5515 = vmatpush3.msra.mxu1 %v5269_v54  ;;  %v3452_v54 = vld [vmem:[#allocation6 + $0xbe8] sm:$0xff] }
 0xa18   : > { %3179 = vmatprep.subr.mxu0 %v5949_v0  ;;  %5516 = vmatprep.subr.mxu1 %v5949_v0 }
 0xa19   : > { %3180 = vmatpush1.msra.mxu0 %v3121_v37  ;;  %5517 = vmatpush3.msra.mxu1 %v5268_v55  ;;  %v3464_v37 = vld [vmem:[#allocation6 + $0xc48] sm:$0xff]  ;;  %v3472_v55 = vld [vmem:[#allocation6 + $0xc80] sm:$0xff] }
 0xa1a   : > { %3181 = vmatprep.subr.mxu0 %v5949_v0  ;;  %5518 = vmatprep.subr.mxu1 %v5949_v0 }
 0xa1b   : > { %3182 = vmatpush1.msra.mxu0 %v3120_v18  ;;  %5519 = vmatpush3.msra.mxu1 %v5267_v57  ;;  %v3463_v18 = vld [vmem:[#allocation6 + $0xc40] sm:$0xff] }
 0xa1c   : > { %3183 = vmatprep.subr.mxu0 %v5949_v0  ;;  %5520 = vmatprep.subr.mxu1 %v5949_v0  ;;  %v3451_v57 = vld [vmem:[#allocation6 + $0xbe0] sm:$0xff] }
 0xa1d   : > { %3184 = vmatpush1.msra.mxu0 %v3119_v39  ;;  %5521 = vmatpush3.msra.mxu1 %v5266_v59  ;;  %v3483_v39 = vld [vmem:[#allocation6 + $0xcd8] sm:$0xff] }
 0xa1e   : > { %3213 = vmatprep.subr.mxu0 %v5949_v0  ;;  %5522 = vmatprep.subr.mxu1 %v5949_v0  ;;  %v3471_v59 = vld [vmem:[#allocation6 + $0xc78] sm:$0xff] }
 0xa1f   : > { %3214 = vmatpush2.msra.mxu0 %v3136_v62  ;;  %5523 = vmatpush3.msra.mxu1 %v5265_v60  ;;  %v3462_v62 = vld [vmem:[#allocation6 + $0xc38] sm:$0xff] }
 0xa20   : > { %3215 = vmatprep.subr.mxu0 %v5949_v0  ;;  %5527 = vmatprep.subr.mxu1 %v5949_v0  ;;  %v3450_v60 = vld [vmem:[#allocation6 + $0xbd8] sm:$0xff] }
 0xa21   : > { %3216 = vmatpush2.msra.mxu0 %v3135_v44  ;;  %v3481_v44 = vld [vmem:[#allocation6 + $0xcc8] sm:$0xff] }
 0xa22   : > { %3218 = vmatmul.mubr.f32.vlgmr.msra.gmra.mxu0 %v3139_v30  ;;  %3508 = vmatprep.subr.mxu0 %v5949_v0  ;;  %v3459_v30 = vld [vmem:[#allocation6 + $0xc20] sm:$0xff] }
 0xa23   : > { %5263 = vmatprep.mubr.msk.f32.mxu0 %vm371_vm0, %v3146_v29  ;;  %3509 = vmatpush1.msra.mxu0 %v3483_v39  ;;  %v3480_v29 = vld [vmem:[#allocation6 + $0xcc0] sm:$0xff] }
 0xa24   : > { %3510 = vmatprep.subr.mxu0 %v5949_v0 }
 0xa25   : > { %3511 = vmatpush1.msra.mxu0 %v3482_v42 }
 0xa26   : > { %3223 = vmatmul.mubr.f32.gmra.mxu0 %v3144_v46  ;;  %3512 = vmatprep.subr.mxu0 %v5949_v0  ;;  %v3458_v46 = vld [vmem:[#allocation6 + $0xc18] sm:$0xff] }
 0xa27   : > { %3513 = vmatpush1.msra.mxu0 %v3481_v44 }
 0xa28   : > { %3514 = vmatprep.subr.mxu0 %v5949_v0 }
 0xa29   : > { %3515 = vmatpush1.msra.mxu0 %v3480_v29 }
 0xa2a   : > { %3516 = vmatprep.subr.mxu0 %v5949_v0 }
 0xa2b   : > { %3517 = vmatpush1.msra.mxu0 %v3479_v45  ;;  %v3677_v45 = vld [vmem:[#allocation6 + $0xd60] sm:$0xff] }
 0xa2c   : > { %3518 = vmatprep.subr.mxu0 %v5949_v0 }
 0xa2d   : > { %3519 = vmatpush1.msra.mxu0 %v3478_v47 }
 0xa2e   : > { %3520 = vmatprep.subr.mxu0 %v5949_v0 }
 0xa2f   : > { %3521 = vmatpush1.msra.mxu0 %v3477_v48  ;;  %v3675_v48 = vld [vmem:[#allocation6 + $0xd50] sm:$0xff] }
 0xa30   : > { %3522 = vmatprep.subr.mxu0 %v5949_v0 }
 0xa31   : > { %3523 = vmatpush1.msra.mxu0 %v3476_v35  ;;  %v3673_v35 = vld [vmem:[#allocation6 + $0xd40] sm:$0xff] }
 0xa32   : > { %3524 = vmatprep.subr.mxu0 %v5949_v0 }
 0xa33   : > { %3525 = vmatpush1.msra.mxu0 %v3475_v41  ;;  %v3671_v41 = vld [vmem:[#allocation6 + $0xd30] sm:$0xff] }
 0xa34   : > { %3526 = vmatprep.subr.mxu0 %v5949_v0 }
 0xa35   : > { %3527 = vmatpush1.msra.mxu0 %v3474_v49  ;;  %v3669_v49 = vld [vmem:[#allocation6 + $0xd20] sm:$0xff] }
 0xa36   : > { %3528 = vmatprep.subr.mxu0 %v5949_v0 }
 0xa37   : > { %3529 = vmatpush1.msra.mxu0 %v3473_v53  ;;  %v3667_v53 = vld [vmem:[#allocation6 + $0xd10] sm:$0xff] }
 0xa38   : > { %3530 = vmatprep.subr.mxu0 %v5949_v0 }
 0xa39   : > { %3531 = vmatpush1.msra.mxu0 %v3472_v55  ;;  %v3665_v55 = vld [vmem:[#allocation6 + $0xd00] sm:$0xff] }
 0xa3a   : > { %3532 = vmatprep.subr.mxu0 %v5949_v0 }
 0xa3b   : > { %3533 = vmatpush1.msra.mxu0 %v3471_v59  ;;  %v3663_v59 = vld [vmem:[#allocation6 + $0xcf0] sm:$0xff] }
 0xa3c   : > { %3534 = vmatprep.subr.mxu0 %v5949_v0 }
 0xabb   : > { %v3109_v50 = vpop.f32.mrf.mxu1 }
 0xabd   : > { %v3111_v61 = vpop.f32.mrf.mxu1 }
 0xabe   : > { %v3030_v63 = vpop.f32.mrf.mxu0  ;;  %v3449_v61 = vld [vmem:[#allocation6 + $0xbd0] sm:$0xff] }
 0xabf   : > { %v3114_v1 = vpop.f32.mrf.mxu1  ;;  %v3110_v7 = vadd.f32 %v3109_v50, %v3030_v63  ;;  %v3470_v50 = vld [vmem:[#allocation6 + $0xc70] sm:$0xff]  ;;  %v3469_v63 = vld [vmem:[#allocation6 + $0xc68] sm:$0xff] }
 0xac0   : > { %v3032_v2 = vpop.f32.mrf.mxu0  ;;  %3535 = vmatpush1.msra.mxu0 %v3470_v50 }
 0xac1   : > { %v3116_v3 = vpop.f32.mrf.mxu1  ;;  %3536 = vmatprep.subr.mxu0 %v5949_v0  ;;  %v3468_v2 = vld [vmem:[#allocation6 + $0xc60] sm:$0xff] }
 0xac2   : > { %v3035_v4 = vpop.f32.mrf.mxu0  ;;  %v7177_v3 = vld [vmem:[#allocation2 + $0x8] sm:$0xff]  ;;  %3537 = vmatpush1.msra.mxu0 %v3469_v63  ;;  %v3679_v63 = vld [vmem:[#allocation6 + $0xd70] sm:$0xff] }
 0xac3   : > { %v3115_v9 = vadd.f32 %v3114_v1, %v3035_v4  ;;  %v3466_v1 = vld [vmem:[#allocation6 + $0xc58] sm:$0xff]  ;;  %3538 = vmatprep.subr.mxu0 %v5949_v0  ;;  %v3465_v4 = vld [vmem:[#allocation6 + $0xc50] sm:$0xff]  ;;  %v3684_v42 = vrot.slane %v7177_v3, 2 }
 0xac4   : > { %v3037_v5 = vpop.f32.mrf.mxu0  ;;  %3539 = vmatpush1.msra.mxu0 %v3468_v2 }
 0xac5   : > { %v3495_v5 = vrot.slane %v7177_v3, 1  ;;  %3568 = vmatprep.subr.mxu0 %v5949_v0 }
 0xae2   : > { %v3219_v6 = vpop.f32.mrf.mxu0 }
 0xae3   : > { %v3228_v21 = vadd.f32 %v3219_v6, %v3110_v7  ;;  %v3485_v6 = vld [vmem:[#allocation6 + $0xce8] sm:$0xff] }
 0xae4   : > { %v3221_v8 = vpop.f32.mrf.mxu0  ;;  %v7184_v7 = vld [vmem:[#allocation2 + $0x18] sm:$0xff]  ;;  %3569 = vmatpush2.msra.mxu0 %v3485_v6 }
 0xae5   : > { %v7137_v15 = vadd.f32 %v5264_v10, %v3228_v21  ;;  %v7189_v8 = vrot.slane %v7184_v7, 1  ;;  %3570 = vmatprep.subr.mxu0 %v5949_v0  ;;  %v7225_v44 = vrot.slane %v7184_v7, 2 }
 0xae6   : > { %v3224_v11 = vpop.f32.mrf.mxu0 }
 0xae7   : > { %v3229_v12 = vadd.f32 %v3224_v11, %v3115_v9  ;;  %v3484_v9 = vld [vmem:[#allocation6 + $0xce0] sm:$0xff]  ;;  %v3497_v21 = vsel %vm441_vm3, %v3495_v5, %v7189_v8  ;;  %v7236_v47 = vsel %vm631_vm4, %v3684_v42, %v7225_v44  ;;  %v3827_v42 = vld [vmem:[#allocation6 + $0xe30] sm:$0xff] }
 0xae8   : > { %v3226_v14 = vpop.f32.mrf.mxu0  ;;  %3571 = vmatpush2.msra.mxu0 %v3484_v9  ;;  %5283 = vmatprep.mubr.msk.f32.mxu0 %vm371_vm0, %v3497_v21  ;;  %v3819_v9 = vld [vmem:[#allocation6 + $0xdf8] sm:$0xff] }
 0xae9   : > { %v7139_v16 = vadd.f32 %v5264_v10, %v3229_v12  ;;  %3697 = vmatprep.subr.mxu0 %v5949_v0  ;;  %v3340_v10 = vld [vmem:[#allocation12 + $0x2] sm:$0x1] }
 0xaeb   : > { %v3240_v20 = vadd.f32 %v7139_v16, %v7137_v15 }
 0xaed   : > { %v3241_v25 = vrot.slane %v3240_v20, 4 }
 0xaef   : > { %v3242_v22 = vadd.f32 %v3241_v25, %v3240_v20 }
 0xaf1   : > { %v3243_v26 = vrot.slane %v3242_v22, 2 }
 0xaf3   : > { %v3244_v23 = vadd.f32 %v3243_v26, %v3242_v22 }
 0xaf5   : > { %v3245_v24 = vrot.slane %v3244_v23, 1 }
 0xaf7   : > { %v3246_v27 = vadd.f32 %v3245_v24, %v3244_v23 }
 0xaf9   : > { %5525 = vmatmul.mubr.f32.vlgmr.msra.gmra.mxu1 %v3246_v27 }
 0xafa   : > { %5529 = vmatprep.mubr.msk.f32.mxu1 %vm5950_vm5, %v5949_v0  ;;  %5528 = vmatpush3.msk.msra.mxu1 %vm1190_vm6, %v3338_v31 }
 0xafb   : > { %3587 = vmatprep.subr.mxu1 %v5949_v0 }
 0xbb9   : > { %v3332_v58 = vpop.f32.mrf.mxu1 }
 0xbba   : > { %v3333_v34 = vadd.f32 %v3332_v58, %v3265_v32 }
 0xbbb   : > { %v5526_v36 = vpop.f32.mrf.mxu1 }
 0xbbc   : > { %v3336_v17 = vmax.f32 %v3333_v34, 0.0 }
 0xbbe   : > { %5530 = vmatmul.mubr.msk.f32.vlgmr.msra.gmra.mxu1 %vm1186_vm7, %v3336_v17  ;;  %v7208_v17 = vld [vmem:[#allocation2 + $0x28] sm:$0x3] }
 0xbbf   : > { %3588 = vmatpush1.msra.mxu1 %v3464_v37  ;;  %5285 = vmatprep.mubr.msk.f32.mxu1 %vm371_vm0, %v7177_v3  ;;  %v3689_v50 = vrot.slane %v7208_v17, 2 }
 0xbc0   : > { %3589 = vmatprep.subr.mxu1 %v5949_v0 }
 0xbc1   : > { %3590 = vmatpush1.msra.mxu1 %v3463_v18  ;;  %v3690_v2 = vsel %vm631_vm4, %v7225_v44, %v3689_v50  ;;  %v5289_v50 = vld [vmem:[#allocation8 + $0x7] ss:$0 sm:$0xff] }
 0xbc2   : > { %3591 = vmatprep.subr.mxu1 %v5949_v0 }
 0xbc3   : > { %3592 = vmatpush1.msra.mxu1 %v3462_v62 }
 0xbc4   : > { %3593 = vmatprep.subr.mxu1 %v5949_v0 }
 0xbc5   : > { %3594 = vmatpush1.msra.mxu1 %v3461_v43  ;;  %v3678_v43 = vld [vmem:[#allocation6 + $0xd68] sm:$0xff] }
 0xbc6   : > { %3595 = vmatprep.subr.mxu1 %v5949_v0 }
 0xbc7   : > { %3596 = vmatpush1.msra.mxu1 %v3460_v56 }
 0xbc8   : > { %3597 = vmatprep.subr.mxu1 %v5949_v0 }
 0xbc9   : > { %3598 = vmatpush1.msra.mxu1 %v3459_v30 }
 0xbca   : > { %3599 = vmatprep.subr.mxu1 %v5949_v0 }
 0xbcb   : > { %3600 = vmatpush1.msra.mxu1 %v3458_v46  ;;  %v3676_v46 = vld [vmem:[#allocation6 + $0xd58] sm:$0xff] }
 0xbcc   : > { %3601 = vmatprep.subr.mxu1 %v5949_v0 }
 0xbcd   : > { %3602 = vmatpush1.msra.mxu1 %v3457_v51 }
 0xbce   : > { %3603 = vmatprep.subr.mxu1 %v5949_v0 }
 0xbcf   : > { %3604 = vmatpush1.msra.mxu1 %v3456_v13  ;;  %v3674_v13 = vld [vmem:[#allocation6 + $0xd48] sm:$0xff] }
 0xbd0   : > { %3605 = vmatprep.subr.mxu1 %v5949_v0 }
 0xbd1   : > { %3606 = vmatpush1.msra.mxu1 %v3455_v38  ;;  %v3672_v38 = vld [vmem:[#allocation6 + $0xd38] sm:$0xff] }
 0xbd2   : > { %3607 = vmatprep.subr.mxu1 %v5949_v0 }
 0xbd3   : > { %3608 = vmatpush1.msra.mxu1 %v3454_v40  ;;  %v3670_v40 = vld [vmem:[#allocation6 + $0xd28] sm:$0xff] }
 0xbd4   : > { %3609 = vmatprep.subr.mxu1 %v5949_v0 }
 0xbd5   : > { %3610 = vmatpush1.msra.mxu1 %v3453_v52  ;;  %v3668_v52 = vld [vmem:[#allocation6 + $0xd18] sm:$0xff] }
 0xbd6   : > { %3611 = vmatprep.subr.mxu1 %v5949_v0 }
 0xbd7   : > { %3612 = vmatpush1.msra.mxu1 %v3452_v54  ;;  %v3666_v54 = vld [vmem:[#allocation6 + $0xd08] sm:$0xff] }
 0xbd8   : > { %3613 = vmatprep.subr.mxu1 %v5949_v0 }
 0xbd9   : > { %3614 = vmatpush1.msra.mxu1 %v3451_v57  ;;  %v3664_v57 = vld [vmem:[#allocation6 + $0xcf8] sm:$0xff] }
 0xbda   : > { %3615 = vmatprep.subr.mxu1 %v5949_v0 }
 0xbdb   : > { %3616 = vmatpush1.msra.mxu1 %v3450_v60  ;;  %v3680_v60 = vld [vmem:[#allocation6 + $0xd78] sm:$0xff] }
 0xbdc   : > { %3617 = vmatprep.subr.mxu1 %v5949_v0 }
 0xbdd   : > { %3618 = vmatpush1.msra.mxu1 %v3449_v61 }
 0xbde   : > { %3647 = vmatprep.subr.mxu1 %v5949_v0 }
 0xbdf   : > { %3648 = vmatpush2.msra.mxu1 %v3466_v1 }
 0xbe0   : > { %3649 = vmatprep.subr.mxu1 %v5949_v0 }
 0xbe1   : > { %3650 = vmatpush2.msra.mxu1 %v3465_v4 }
 0xbe2   : > { %3863 = vmatprep.subr.mxu1 %v5949_v0 }
 0xc7e   : > { %v3413_v11 = vpop.f32.mrf.mxu1 }
 0xc7f   : > { %v3414_v12 = vadd.f32 %v3413_v11, %v3340_v10  ;;  %v3838_v10 = vld [vmem:[#allocation6 + $0xe88] sm:$0xff] }
 0xc80   : > { %v5531_v14 = vpop.f32.mrf.mxu1  ;;  %v3817_v11 = vld [vmem:[#allocation6 + $0xde8] sm:$0xff] }
 0xc81   : > { %v3417_v20 = vsub.f32 0.0, %v3414_v12  ;;  %v3837_v12 = vld [vmem:[#allocation6 + $0xe80] sm:$0xff]  ;;  %v3836_v14 = vld [vmem:[#allocation6 + $0xe78] sm:$0xff] }
 0xc83   : > { %v3418_v25 = vmul.f32 1.442695, %v3417_v20  ;;  %v3816_v20 = vld [vmem:[#allocation6 + $0xde0] sm:$0xff] }
 0xc85   : > { %5687 = vpow2.f32 %v3418_v25  ;;  %v3815_v25 = vld [vmem:[#allocation6 + $0xdd8] sm:$0xff] }
 0xc92   : > { %v5688_v22 = vpop.eup %5687 }
 0xc93   : > { %v3420_v26 = vadd.f32 1.0, %v5688_v22  ;;  %v3834_v22 = vld [vmem:[#allocation6 + $0xe68] sm:$0xff] }
 0xc95   : > { %5689 = vrcp.f32 %v3420_v26  ;;  %v3814_v26 = vld [vmem:[#allocation6 + $0xdd0] sm:$0xff] }
 0xca2   : > { %v5690_v23 = vpop.eup %5689 }
 0xca3   : > { %v3426_v24 = vrot.slane %v5690_v23, %v6526_v33  ;;  %v3833_v23 = vld [vmem:[#allocation6 + $0xe60] sm:$0xff] }
 0xca5   : > { %v3427_v27 = vmul.f32 %v3426_v24, %v7137_v15  ;;  %v3428_v31 = vmul.f32 %v3426_v24, %v7139_v16  ;;  %v3500_v15 = vrot.slane %v7208_v17, 1  ;;  %v3813_v24 = vld [vmem:[#allocation6 + $0xdc8] sm:$0xff]  ;;  %v3810_v17 = vld [vmem:[#allocation6 + $0xdb0] sm:$0xff] }
 0xca7   : > { %v7201_v32 = vadd.f32 %v3427_v27, %v6922_v19  ;;  %v7204_v58 = vadd.f32 %v3428_v31, %v6926_v28  ;;  %v3501_v29 = vsel %vm441_vm3, %v7189_v8, %v3500_v15  ;;  %v3812_v27 = vld [vmem:[#allocation6 + $0xdc0] sm:$0xff]  ;;  %v3811_v31 = vld [vmem:[#allocation6 + $0xdb8] sm:$0xff]  ;;  %v3809_v15 = vld [vmem:[#allocation6 + $0xda8] sm:$0xff] }
 0xca9   : > { %v3433_v34 = vrot.slane %v7201_v32, 7  ;;  %v3434_v36 = vrot.slane %v7204_v58, 7 }
 0xcab   : > { %3439 = vst [vmem:[#allocation2] sm:$0xfe] %v3433_v34  ;;  %3441 = vst [vmem:[#allocation2 + $0x20] sm:$0x1] %v3434_v36  ;;  %v7211_v37 = vsel %vm382_vm2, %v3433_v34, %v3434_v36  ;;  %v3832_v34 = vld [vmem:[#allocation6 + $0xe58] sm:$0xff]  ;;  %v3831_v36 = vld [vmem:[#allocation6 + $0xe50] sm:$0xff] }
 0xcac   : > { %v3493_v62 = vrot.slane %v7211_v37, 1  ;;  %v3682_v1 = vrot.slane %v7211_v37, 2 }
 0xcb2   : > { %v7214_v16 = vld [vmem:[#allocation2] sm:$0xff] }
 0xcb3   : > { %v7216_v18 = vld [vmem:[#allocation2 + $0x20] sm:$0x3]  ;;  %3652 = vmatmul.mubr.f32.vlgmr.msra.gmra.mxu1 %v7214_v16  ;;  %v3492_v39 = vrot.slane %v7214_v16, 1  ;;  %v3681_v61 = vrot.slane %v7214_v16, 2  ;;  %v3829_v16 = vld [vmem:[#allocation6 + $0xe40] sm:$0xff] }
 0xcb4   : > { %5286 = vmatprep.mubr.msk.f32.mxu1 %vm371_vm0, %v7184_v7  ;;  %v3498_v30 = vrot.slane %v7216_v18, 1  ;;  %v3687_v5 = vrot.slane %v7216_v18, 2  ;;  %3864 = vmatpush1.msra.mxu1 %v3838_v10  ;;  %v3808_v18 = vld [vmem:[#allocation6 + $0xda0] sm:$0xff] }
 0xcb5   : > { %v3494_v56 = vsel %vm441_vm3, %v3492_v39, %v3493_v62  ;;  %v3683_v4 = vsel %vm631_vm4, %v3681_v61, %v3682_v1  ;;  %3865 = vmatprep.subr.mxu1 %v5949_v0  ;;  %v3828_v39 = vld [vmem:[#allocation6 + $0xe38] sm:$0xff] }
 0xcb6   : > { %3573 = vmatmul.mubr.f32.vlgmr.msra.gmra.mxu0 %v3494_v56  ;;  %v3499_v51 = vsel %vm441_vm3, %v3493_v62, %v3498_v30  ;;  %v3688_v6 = vsel %vm631_vm4, %v3682_v1, %v3687_v5  ;;  %3866 = vmatpush1.msra.mxu1 %v3837_v12  ;;  %v3807_v62 = vld [vmem:[#allocation6 + $0xd98] sm:$0xff]  ;;  %v3826_v56 = vld [vmem:[#allocation6 + $0xe28] sm:$0xff]  ;;  %v3825_v30 = vld [vmem:[#allocation6 + $0xe20] sm:$0xff] }
 0xcb7   : > { %3657 = vmatmul.mubr.f32.gmra.mxu1 %v7211_v37  ;;  %3698 = vmatpush1.msra.mxu0 %v3678_v43  ;;  %v3830_v37 = vld [vmem:[#allocation6 + $0xe48] sm:$0xff]  ;;  %v3806_v43 = vld [vmem:[#allocation6 + $0xd90] sm:$0xff] }
 0xcb8   : > { %3699 = vmatprep.subr.mxu0 %v5949_v0  ;;  %5284 = vmatprep.mubr.msk.f32.mxu0 %vm371_vm0, %v3501_v29  ;;  %v3805_v29 = vld [vmem:[#allocation6 + $0xd88] sm:$0xff] }
 0xcb9   : > { %3700 = vmatpush1.msra.mxu0 %v3677_v45  ;;  %5290 = vmatprep.mubr.msk.f32.mxu1 %vm371_vm0, %v3497_v21  ;;  %v3818_v21 = vld [vmem:[#allocation6 + $0xdf0] sm:$0xff]  ;;  %v3804_v45 = vld [vmem:[#allocation6 + $0xd80] sm:$0xff] }
 0xcba   : > { %3701 = vmatprep.subr.mxu0 %v5949_v0  ;;  %3578 = vmatmul.mubr.f32.gmra.mxu0 %v3499_v51  ;;  %v3821_v51 = vld [vmem:[#allocation6 + $0xe08] sm:$0xff] }
 0xcbb   : > { %3702 = vmatpush1.msra.mxu0 %v3676_v46  ;;  %5287 = vmatprep.mubr.msk.f32.mxu0 %vm371_vm0, %v7236_v47  ;;  %v3824_v46 = vld [vmem:[#allocation6 + $0xe18] sm:$0xff] }
 0xcbc   : > { %3703 = vmatprep.subr.mxu0 %v5949_v0  ;;  %3867 = vmatprep.subr.mxu1 %v5949_v0 }
 0xcbd   : > { %3704 = vmatpush1.msra.mxu0 %v3675_v48  ;;  %3868 = vmatpush1.msra.mxu1 %v3836_v14  ;;  %v3820_v48 = vld [vmem:[#allocation6 + $0xe00] sm:$0xff]  ;;  %v7306_v14 = vld [vmem:[#allocation2 + $0x28] sm:$0x3] }
 0xcbe   : > { %3705 = vmatprep.subr.mxu0 %v5949_v0  ;;  %3869 = vmatprep.subr.mxu1 %v5949_v0 }
 0xcbf   : > { %3706 = vmatpush1.msra.mxu0 %v3674_v13  ;;  %v3823_v13 = vld [vmem:[#allocation6 + $0xe10] sm:$0xff] }
 0xcc0   : > { %3707 = vmatprep.subr.mxu0 %v5949_v0 }
 0xcc1   : > { %3708 = vmatpush1.msra.mxu0 %v3673_v35  ;;  %v3840_v35 = vld [vmem:[#allocation6 + $0xe98] sm:$0xff] }
 0xcc2   : > { %3709 = vmatprep.subr.mxu0 %v5949_v0 }
 0xcc3   : > { %3710 = vmatpush1.msra.mxu0 %v3672_v38  ;;  %v3839_v38 = vld [vmem:[#allocation6 + $0xe90] sm:$0xff] }
 0xcc4   : > { %3711 = vmatprep.subr.mxu0 %v5949_v0 }
 0xcc5   : > { %3712 = vmatpush1.msra.mxu0 %v3671_v41 }
 0xcc6   : > { %3713 = vmatprep.subr.mxu0 %v5949_v0 }
 0xcc7   : > { %3714 = vmatpush1.msra.mxu0 %v3670_v40 }
 0xcc8   : > { %3715 = vmatprep.subr.mxu0 %v5949_v0 }
 0xcc9   : > { %3716 = vmatpush1.msra.mxu0 %v3669_v49 }
 0xcca   : > { %3717 = vmatprep.subr.mxu0 %v5949_v0 }
 0xccb   : > { %3718 = vmatpush1.msra.mxu0 %v3668_v52 }
 0xccc   : > { %3719 = vmatprep.subr.mxu0 %v5949_v0 }
 0xccd   : > { %3720 = vmatpush1.msra.mxu0 %v3667_v53 }
 0xcce   : > { %3721 = vmatprep.subr.mxu0 %v5949_v0 }
 0xccf   : > { %3722 = vmatpush1.msra.mxu0 %v3666_v54 }
 0xcd0   : > { %3723 = vmatprep.subr.mxu0 %v5949_v0 }
 0xcd1   : > { %3724 = vmatpush1.msra.mxu0 %v3665_v55 }
 0xcd2   : > { %3725 = vmatprep.subr.mxu0 %v5949_v0 }
 0xcd3   : > { %3726 = vmatpush1.msra.mxu0 %v3664_v57 }
 0xcd4   : > { %3727 = vmatprep.subr.mxu0 %v5949_v0 }
 0xcd5   : > { %3728 = vmatpush1.msra.mxu0 %v3663_v59 }
 0xcd6   : > { %3757 = vmatprep.subr.mxu0 %v5949_v0 }
 0xcd7   : > { %3758 = vmatpush2.msra.mxu0 %v3680_v60 }
 0xcd8   : > { %3759 = vmatprep.subr.mxu0 %v5949_v0 }
 0xcd9   : > { %3760 = vmatpush2.msra.mxu0 %v3679_v63 }
 0xcda   : > { %3762 = vmatmul.mubr.f32.vlgmr.msra.gmra.mxu0 %v3683_v4  ;;  %3942 = vmatprep.subr.mxu0 %v5949_v0 }
 0xcdb   : > { %5288 = vmatprep.mubr.msk.f32.mxu0 %vm371_vm0, %v3690_v2  ;;  %3943 = vmatpush1.msra.mxu0 %v3819_v9 }
 0xcdc   : > { %3944 = vmatprep.subr.mxu0 %v5949_v0 }
 0xcdd   : > { %3945 = vmatpush1.msra.mxu0 %v3818_v21 }
 0xcde   : > { %3767 = vmatmul.mubr.f32.gmra.mxu0 %v3688_v6  ;;  %3946 = vmatprep.subr.mxu0 %v5949_v0 }
 0xcdf   : > { %5292 = vmatprep.mubr.msk.f32.mxu0 %vm371_vm0, %v7177_v3  ;;  %3947 = vmatpush1.msra.mxu0 %v3817_v11  ;;  %v3835_v3 = vld [vmem:[#allocation6 + $0xe70] sm:$0xff] }
 0xce0   : > { %3948 = vmatprep.subr.mxu0 %v5949_v0  ;;  %3870 = vmatpush1.msra.mxu1 %v3835_v3  ;;  %v3855_v3 = vrot.slane %v7306_v14, 1 }
 0xce1   : > { %3949 = vmatpush1.msra.mxu0 %v3816_v20  ;;  %3871 = vmatprep.subr.mxu1 %v5949_v0 }
 0xce2   : > { %3950 = vmatprep.subr.mxu0 %v5949_v0  ;;  %3872 = vmatpush1.msra.mxu1 %v3834_v22 }
 0xce3   : > { %3951 = vmatpush1.msra.mxu0 %v3815_v25  ;;  %3873 = vmatprep.subr.mxu1 %v5949_v0 }
 0xce4   : > { %3952 = vmatprep.subr.mxu0 %v5949_v0  ;;  %3874 = vmatpush1.msra.mxu1 %v3833_v23  ;;  %v4033_v23 = vld [vmem:[#allocation6 + $0xf18] sm:$0xff] }
 0xce5   : > { %3953 = vmatpush1.msra.mxu0 %v3814_v26  ;;  %3875 = vmatprep.subr.mxu1 %v5949_v0 }
 0xce6   : > { %3954 = vmatprep.subr.mxu0 %v5949_v0  ;;  %3876 = vmatpush1.msra.mxu1 %v3832_v34 }
 0xce7   : > { %3955 = vmatpush1.msra.mxu0 %v3813_v24  ;;  %3877 = vmatprep.subr.mxu1 %v5949_v0 }
 0xce8   : > { %3956 = vmatprep.subr.mxu0 %v5949_v0  ;;  %3878 = vmatpush1.msra.mxu1 %v3831_v36 }
 0xce9   : > { %3957 = vmatpush1.msra.mxu0 %v3812_v27  ;;  %3879 = vmatprep.subr.mxu1 %v5949_v0  ;;  %v3856_v27 = vsel %vm441_vm3, %v7189_v8, %v3855_v3  ;;  %v4030_v8 = vld [vmem:[#allocation6 + $0xf00] sm:$0xff] }
 0xcea   : > { %3958 = vmatprep.subr.mxu0 %v5949_v0  ;;  %3880 = vmatpush1.msra.mxu1 %v3830_v37  ;;  %v4029_v37 = vld [vmem:[#allocation6 + $0xef8] sm:$0xff] }
 0xceb   : > { %3959 = vmatpush1.msra.mxu0 %v3811_v31  ;;  %3881 = vmatprep.subr.mxu1 %v5949_v0  ;;  %v4032_v31 = vld [vmem:[#allocation6 + $0xf10] sm:$0xff] }
 0xcec   : > { %3960 = vmatprep.subr.mxu0 %v5949_v0  ;;  %3882 = vmatpush1.msra.mxu1 %v3829_v16  ;;  %v4027_v16 = vld [vmem:[#allocation6 + $0xee8] sm:$0xff] }
 0xced   : > { %3961 = vmatpush1.msra.mxu0 %v3810_v17  ;;  %3883 = vmatprep.subr.mxu1 %v5949_v0 }
 0xcee   : > { %3962 = vmatprep.subr.mxu0 %v5949_v0  ;;  %3884 = vmatpush1.msra.mxu1 %v3828_v39  ;;  %v4025_v39 = vld [vmem:[#allocation6 + $0xed8] sm:$0xff] }
 0xcef   : > { %3963 = vmatpush1.msra.mxu0 %v3809_v15  ;;  %3885 = vmatprep.subr.mxu1 %v5949_v0  ;;  %v4028_v15 = vld [vmem:[#allocation6 + $0xef0] sm:$0xff] }
 0xcf0   : > { %3964 = vmatprep.subr.mxu0 %v5949_v0  ;;  %3886 = vmatpush1.msra.mxu1 %v3827_v42  ;;  %v4022_v42 = vld [vmem:[#allocation6 + $0xec0] sm:$0xff] }
 0xcf1   : > { %3965 = vmatpush1.msra.mxu0 %v3808_v18  ;;  %3887 = vmatprep.subr.mxu1 %v5949_v0  ;;  %v4026_v18 = vld [vmem:[#allocation6 + $0xee0] sm:$0xff] }
 0xcf2   : > { %3966 = vmatprep.subr.mxu0 %v5949_v0  ;;  %3888 = vmatpush1.msra.mxu1 %v3826_v56  ;;  %v4020_v56 = vld [vmem:[#allocation6 + $0xeb0] sm:$0xff] }
 0xcf3   : > { %3967 = vmatpush1.msra.mxu0 %v3807_v62  ;;  %3889 = vmatprep.subr.mxu1 %v5949_v0  ;;  %v4023_v62 = vld [vmem:[#allocation6 + $0xec8] sm:$0xff] }
 0xcf4   : > { %3968 = vmatprep.subr.mxu0 %v5949_v0  ;;  %3890 = vmatpush1.msra.mxu1 %v3825_v30  ;;  %v4018_v30 = vld [vmem:[#allocation6 + $0xea0] sm:$0xff] }
 0xcf5   : > { %3969 = vmatpush1.msra.mxu0 %v3806_v43  ;;  %3891 = vmatprep.subr.mxu1 %v5949_v0  ;;  %v4021_v43 = vld [vmem:[#allocation6 + $0xeb8] sm:$0xff] }
 0xcf6   : > { %3970 = vmatprep.subr.mxu0 %v5949_v0  ;;  %3892 = vmatpush1.msra.mxu1 %v3824_v46  ;;  %v4044_v46 = vrot.slane %v7306_v14, 2 }
 0xcf7   : > { %3971 = vmatpush1.msra.mxu0 %v3805_v29  ;;  %3893 = vmatprep.subr.mxu1 %v5949_v0  ;;  %v4019_v29 = vld [vmem:[#allocation6 + $0xea8] sm:$0xff] }
 0xcf8   : > { %3972 = vmatprep.subr.mxu0 %v5949_v0  ;;  %3894 = vmatpush1.msra.mxu1 %v3823_v13 }
 0xcf9   : > { %3973 = vmatpush1.msra.mxu0 %v3804_v45  ;;  %3923 = vmatprep.subr.mxu1 %v5949_v0  ;;  %v4035_v45 = vld [vmem:[#allocation6 + $0xf28] sm:$0xff] }
 0xcfa   : > { %4002 = vmatprep.subr.mxu0 %v5949_v0  ;;  %3924 = vmatpush2.msra.mxu1 %v3840_v35  ;;  %v4045_v35 = vsel %vm631_vm4, %v7225_v44, %v4044_v46  ;;  %v5312_v44 = vld [vmem:[%s7693_s3 + $0x1f8] sm:$0xff]  ;;  %v4382_v46 = vld [vmem:[#allocation6 + $0x1038] sm:$0xff] }
 0xcfb   : > { %4003 = vmatpush2.msra.mxu0 %v3821_v51  ;;  %3925 = vmatprep.subr.mxu1 %v5949_v0 }
 0xcfc   : > { %4004 = vmatprep.subr.mxu0 %v5949_v0  ;;  %3926 = vmatpush2.msra.mxu1 %v3839_v38 }
 0xcfd   : > { %4005 = vmatpush2.msra.mxu0 %v3820_v48  ;;  %4052 = vmatprep.subr.mxu1 %v5949_v0  ;;  %v4034_v48 = vld [vmem:[#allocation6 + $0xf20] sm:$0xff] }
 0xcfe   : > { %5532 = vmatprep.subr.mxu0 %v5949_v0 }
 0xd73   : > { %v3653_v41 = vpop.f32.mrf.mxu1 }
 0xd75   : > { %v3655_v40 = vpop.f32.mrf.mxu1 }
 0xd76   : > { %v3574_v49 = vpop.f32.mrf.mxu0 }
 0xd77   : > { %v3658_v52 = vpop.f32.mrf.mxu1  ;;  %v3654_v59 = vadd.f32 %v3653_v41, %v3574_v49  ;;  %v5311_v49 = vld [vmem:[%s7693_s3 + $0x1f0] sm:$0xff] }
 0xd78   : > { %v3576_v53 = vpop.f32.mrf.mxu0 }
 0xd79   : > { %v3660_v54 = vpop.f32.mrf.mxu1  ;;  %v5309_v53 = vld [vmem:[%s7693_s3 + $0x1e0] sm:$0xff] }
 0xd7a   : > { %v3579_v55 = vpop.f32.mrf.mxu0  ;;  %v5308_v54 = vld [vmem:[%s7693_s3 + $0x1d8] sm:$0xff] }
 0xd7b   : > { %v3659_v1 = vadd.f32 %v3658_v52, %v3579_v55  ;;  %v5310_v52 = vld [vmem:[%s7693_s3 + $0x1e8] sm:$0xff]  ;;  %v5307_v55 = vld [vmem:[%s7693_s3 + $0x1d0] sm:$0xff] }
 0xd7c   : > { %v3581_v57 = vpop.f32.mrf.mxu0 }
 0xd7d   : > { %v5306_v57 = vld [vmem:[%s7693_s3 + $0x1c8] sm:$0xff] }
 0xd9a   : > { %v3763_v60 = vpop.f32.mrf.mxu0 }
 0xd9b   : > { %v3772_v61 = vadd.f32 %v3763_v60, %v3654_v59  ;;  %v5305_v59 = vld [vmem:[%s7693_s3 + $0x1c0] sm:$0xff]  ;;  %v5304_v60 = vld [vmem:[%s7693_s3 + $0x1b8] sm:$0xff] }
 0xd9c   : > { %v3765_v63 = vpop.f32.mrf.mxu0 }
 0xd9d   : > { %v3782_v2 = vadd.f32 %v5289_v50, %v3772_v61  ;;  %v5302_v61 = vld [vmem:[%s7693_s3 + $0x1a8] sm:$0xff]  ;;  %v5301_v63 = vld [vmem:[%s7693_s3 + $0x1a0] sm:$0xff] }
 0xd9e   : > { %v3768_v4 = vpop.f32.mrf.mxu0 }
 0xd9f   : > { %v3784_v5 = vmax.f32 %v3782_v2, 0.0  ;;  %v3773_v6 = vadd.f32 %v3768_v4, %v3659_v1  ;;  %v5300_v1 = vld [vmem:[%s7693_s3 + $0x198] sm:$0xff]  ;;  %v5299_v2 = vld [vmem:[%s7693_s3 + $0x190] sm:$0xff]  ;;  %v5298_v4 = vld [vmem:[%s7693_s3 + $0x188] sm:$0xff] }
 0xda0   : > { %v3770_v9 = vpop.f32.mrf.mxu0 }
 0xda1   : > { %v3788_v21 = vrot.slane %v3784_v5, 7  ;;  %v3783_v10 = vadd.f32 %v5289_v50, %v3773_v6  ;;  %v5303_v50 = vld [vmem:[%s7693_s3 + $0x1b0] sm:$0xff]  ;;  %v5297_v5 = vld [vmem:[%s7693_s3 + $0x180] sm:$0xff]  ;;  %v4237_v6 = vld [vmem:[#allocation11 + $0xc] sm:$0xf] }
 0xda3   : > { %3794 = vst [vmem:[#allocation2] sm:$0xfe] %v3788_v21  ;;  %v3785_v11 = vmax.f32 %v3783_v10, 0.0 }
 0xda5   : > { %v3789_v12 = vrot.slane %v3785_v11, 7 }
 0xda7   : > { %3796 = vst [vmem:[#allocation2 + $0x20] sm:$0x1] %v3789_v12  ;;  %v7309_v20 = vsel %vm382_vm2, %v3788_v21, %v3789_v12 }
 0xda8   : > { %v3848_v22 = vrot.slane %v7309_v20, 1  ;;  %v4037_v13 = vrot.slane %v7309_v20, 2 }
 0xdaa   : > { %v7312_v25 = vld [vmem:[#allocation2] sm:$0xff] }
 0xdab   : > { %4007 = vmatmul.mubr.f32.vlgmr.msra.gmra.mxu0 %v7312_v25  ;;  %v3847_v26 = vrot.slane %v7312_v25, 1  ;;  %v4036_v51 = vrot.slane %v7312_v25, 2 }
 0xdac   : > { %5293 = vmatprep.mubr.msk.f32.mxu0 %vm371_vm0, %v7184_v7  ;;  %v4031_v7 = vld [vmem:[#allocation6 + $0xf08] sm:$0xff]  ;;  %5533 = vmatpush3.msra.mxu0 %v5312_v44  ;;  %v4378_v44 = vld [vmem:[#allocation6 + $0x1018] sm:$0xff] }
 0xdad   : > { %v3849_v24 = vsel %vm441_vm3, %v3847_v26, %v3848_v22  ;;  %v4038_v38 = vsel %vm631_vm4, %v4036_v51, %v4037_v13  ;;  %5534 = vmatprep.subr.mxu0 %v5949_v0  ;;  %v4361_v51 = vld [vmem:[#allocation6 + $0xf98] sm:$0xff] }
 0xdae   : > { %3928 = vmatmul.mubr.f32.vlgmr.msra.gmra.mxu1 %v3849_v24  ;;  %v7322_v34 = vld [vmem:[#allocation2 + $0x20] sm:$0x3]  ;;  %5535 = vmatpush3.msra.mxu0 %v5311_v49  ;;  %v4357_v49 = vld [vmem:[#allocation6 + $0xf78] sm:$0xff] }
 0xdaf   : > { %4012 = vmatmul.mubr.f32.gmra.mxu0 %v7309_v20  ;;  %4053 = vmatpush1.msra.mxu1 %v4033_v23  ;;  %v3853_v36 = vrot.slane %v7322_v34, 1  ;;  %v4042_v41 = vrot.slane %v7322_v34, 2 }
 0xdb0   : > { %4054 = vmatprep.subr.mxu1 %v5949_v0  ;;  %5291 = vmatprep.mubr.msk.f32.mxu1 %vm371_vm0, %v3856_v27  ;;  %v5296_v27 = vld [vmem:[#allocation8 + $0x8] ss:$0 sm:$0xff] }
 0xdb1   : > { %4055 = vmatpush1.msra.mxu1 %v4032_v31  ;;  %v3854_v17 = vsel %vm441_vm3, %v3848_v22, %v3853_v36  ;;  %5564 = vmatprep.mubr.msk.f32.mxu0 %vm5950_vm5, %v5949_v0  ;;  %v4043_v40 = vsel %vm631_vm4, %v4037_v13, %v4042_v41  ;;  %v4360_v13 = vld [vmem:[#allocation6 + $0xf90] sm:$0xff]  ;;  %v4379_v41 = vld [vmem:[#allocation6 + $0x1020] sm:$0xff] }
 0xdb2   : > { %4056 = vmatprep.subr.mxu1 %v5949_v0  ;;  %3933 = vmatmul.mubr.f32.gmra.mxu1 %v3854_v17 }
 0xdb3   : > { %4057 = vmatpush1.msra.mxu1 %v4031_v7  ;;  %5294 = vmatprep.mubr.msk.f32.mxu1 %vm371_vm0, %v7236_v47  ;;  %v4024_v47 = vld [vmem:[#allocation6 + $0xed0] sm:$0xff] }
 0xdb4   : > { %4058 = vmatprep.subr.mxu1 %v5949_v0  ;;  %5536 = vmatprep.subr.mxu0 %v5949_v0 }
 0xdb5   : > { %4059 = vmatpush1.msra.mxu1 %v4030_v8  ;;  %5537 = vmatpush3.msra.mxu0 %v5310_v52  ;;  %v4377_v52 = vld [vmem:[#allocation6 + $0x1010] sm:$0xff] }
 0xdb6   : > { %4060 = vmatprep.subr.mxu1 %v5949_v0  ;;  %5538 = vmatprep.subr.mxu0 %v5949_v0 }
 0xdb7   : > { %4061 = vmatpush1.msra.mxu1 %v4029_v37  ;;  %5539 = vmatpush3.msra.mxu0 %v5309_v53  ;;  %v4356_v53 = vld [vmem:[#allocation6 + $0xf70] sm:$0xff] }
 0xdb8   : > { %4062 = vmatprep.subr.mxu1 %v5949_v0  ;;  %5540 = vmatprep.subr.mxu0 %v5949_v0 }
 0xdb9   : > { %4063 = vmatpush1.msra.mxu1 %v4028_v15  ;;  %5541 = vmatpush3.msra.mxu0 %v5308_v54  ;;  %v4376_v54 = vld [vmem:[#allocation6 + $0x1008] sm:$0xff] }
 0xdba   : > { %4064 = vmatprep.subr.mxu1 %v5949_v0  ;;  %5542 = vmatprep.subr.mxu0 %v5949_v0 }
 0xdbb   : > { %4065 = vmatpush1.msra.mxu1 %v4027_v16  ;;  %5543 = vmatpush3.msra.mxu0 %v5307_v55  ;;  %v4355_v55 = vld [vmem:[#allocation6 + $0xf68] sm:$0xff] }
 0xdbc   : > { %4066 = vmatprep.subr.mxu1 %v5949_v0  ;;  %5544 = vmatprep.subr.mxu0 %v5949_v0 }
 0xdbd   : > { %4067 = vmatpush1.msra.mxu1 %v4026_v18  ;;  %5545 = vmatpush3.msra.mxu0 %v5306_v57  ;;  %v4375_v57 = vld [vmem:[#allocation6 + $0x1000] sm:$0xff] }
 0xdbe   : > { %4068 = vmatprep.subr.mxu1 %v5949_v0  ;;  %5546 = vmatprep.subr.mxu0 %v5949_v0 }
 0xdbf   : > { %4069 = vmatpush1.msra.mxu1 %v4025_v39  ;;  %5547 = vmatpush3.msra.mxu0 %v5305_v59  ;;  %v4354_v59 = vld [vmem:[#allocation6 + $0xf60] sm:$0xff] }
 0xdc0   : > { %4070 = vmatprep.subr.mxu1 %v5949_v0  ;;  %5548 = vmatprep.subr.mxu0 %v5949_v0 }
 0xdc1   : > { %4071 = vmatpush1.msra.mxu1 %v4024_v47  ;;  %5549 = vmatpush3.msra.mxu0 %v5304_v60  ;;  %v4374_v60 = vld [vmem:[#allocation6 + $0xff8] sm:$0xff] }
 0xdc2   : > { %4072 = vmatprep.subr.mxu1 %v5949_v0  ;;  %5550 = vmatprep.subr.mxu0 %v5949_v0 }
 0xdc3   : > { %4073 = vmatpush1.msra.mxu1 %v4023_v62  ;;  %5551 = vmatpush3.msra.mxu0 %v5303_v50  ;;  %v4164_v62 = vld [vmem:[#allocation9 + $0x3] sm:$0x1] }
 0xdc4   : > { %4074 = vmatprep.subr.mxu1 %v5949_v0  ;;  %5552 = vmatprep.subr.mxu0 %v5949_v0  ;;  %v4353_v50 = vld [vmem:[#allocation6 + $0xf58] sm:$0xff] }
 0xdc5   : > { %4075 = vmatpush1.msra.mxu1 %v4022_v42  ;;  %5553 = vmatpush3.msra.mxu0 %v5302_v61  ;;  %v4373_v61 = vld [vmem:[#allocation6 + $0xff0] sm:$0xff] }
 0xdc6   : > { %4076 = vmatprep.subr.mxu1 %v5949_v0  ;;  %5554 = vmatprep.subr.mxu0 %v5949_v0 }
 0xdc7   : > { %4077 = vmatpush1.msra.mxu1 %v4021_v43  ;;  %5555 = vmatpush3.msra.mxu0 %v5301_v63  ;;  %v4352_v63 = vld [vmem:[#allocation6 + $0xf50] sm:$0xff] }
 0xdc8   : > { %4078 = vmatprep.subr.mxu1 %v5949_v0  ;;  %5556 = vmatprep.subr.mxu0 %v5949_v0 }
 0xdc9   : > { %4079 = vmatpush1.msra.mxu1 %v4020_v56  ;;  %5557 = vmatpush3.msra.mxu0 %v5300_v1  ;;  %v4372_v1 = vld [vmem:[#allocation6 + $0xfe8] sm:$0xff] }
 0xdca   : > { %4080 = vmatprep.subr.mxu1 %v5949_v0  ;;  %5558 = vmatprep.subr.mxu0 %v5949_v0 }
 0xdcb   : > { %4081 = vmatpush1.msra.mxu1 %v4019_v29  ;;  %5559 = vmatpush3.msra.mxu0 %v5299_v2  ;;  %v4351_v2 = vld [vmem:[#allocation6 + $0xf48] sm:$0xff] }
 0xdcc   : > { %4082 = vmatprep.subr.mxu1 %v5949_v0  ;;  %5560 = vmatprep.subr.mxu0 %v5949_v0 }
 0xdcd   : > { %4083 = vmatpush1.msra.mxu1 %v4018_v30  ;;  %5561 = vmatpush3.msra.mxu0 %v5298_v4  ;;  %v4363_v30 = vld [vmem:[#allocation6 + $0xfa8] sm:$0xff]  ;;  %v4371_v4 = vld [vmem:[#allocation6 + $0xfe0] sm:$0xff] }
 0xdce   : > { %4112 = vmatprep.subr.mxu1 %v5949_v0  ;;  %5562 = vmatprep.subr.mxu0 %v5949_v0 }
 0xdcf   : > { %4113 = vmatpush2.msra.mxu1 %v4035_v45  ;;  %5563 = vmatpush3.msra.mxu0 %v5297_v5  ;;  %v4362_v45 = vld [vmem:[#allocation6 + $0xfa0] sm:$0xff] }
 0xdd0   : > { %4114 = vmatprep.subr.mxu1 %v5949_v0  ;;  %4486 = vmatprep.subr.mxu0 %v5949_v0  ;;  %v4350_v5 = vld [vmem:[#allocation6 + $0xf40] sm:$0xff] }
 0xdd1   : > { %4115 = vmatpush2.msra.mxu1 %v4034_v48  ;;  %v4381_v48 = vld [vmem:[#allocation6 + $0x1030] sm:$0xff] }
 0xdd2   : > { %4117 = vmatmul.mubr.f32.vlgmr.msra.gmra.mxu1 %v4038_v38  ;;  %5567 = vmatprep.subr.mxu1 %v5949_v0  ;;  %v4359_v38 = vld [vmem:[#allocation6 + $0xf88] sm:$0xff] }
 0xdd3   : > { %5295 = vmatprep.mubr.msk.f32.mxu1 %vm371_vm0, %v4045_v35  ;;  %5568 = vmatpush3.msk.msra.mxu1 %vm1190_vm6, %v4237_v6  ;;  %v4380_v35 = vld [vmem:[#allocation6 + $0x1028] sm:$0xff]  ;;  %v4370_v6 = vld [vmem:[#allocation6 + $0xfd8] sm:$0xff] }
 0xdd4   : > { %4407 = vmatprep.subr.mxu1 %v5949_v0 }
 0xdd6   : > { %4122 = vmatmul.mubr.f32.gmra.mxu1 %v4043_v40  ;;  %v4358_v40 = vld [vmem:[#allocation6 + $0xf80] sm:$0xff] }
 0xdd7   : > { %5569 = vmatprep.mubr.msk.f32.mxu1 %vm5950_vm5, %v5949_v0 }
 0xe6b   : > { %v4008_v9 = vpop.f32.mrf.mxu0 }
 0xe6d   : > { %v4010_v21 = vpop.f32.mrf.mxu0 }
 0xe6e   : > { %v3929_v10 = vpop.f32.mrf.mxu1  ;;  %v4369_v21 = vld [vmem:[#allocation6 + $0xfd0] sm:$0xff] }
 0xe6f   : > { %v4013_v11 = vpop.f32.mrf.mxu0  ;;  %v4009_v22 = vadd.f32 %v4008_v9, %v3929_v10  ;;  %v4349_v9 = vld [vmem:[#allocation6 + $0xf38] sm:$0xff]  ;;  %v4348_v10 = vld [vmem:[#allocation6 + $0xf30] sm:$0xff] }
 0xe70   : > { %v3931_v12 = vpop.f32.mrf.mxu1 }
 0xe71   : > { %v4015_v14 = vpop.f32.mrf.mxu0  ;;  %v4365_v12 = vld [vmem:[#allocation6 + $0xfb8] sm:$0xff] }
 0xe72   : > { %v3934_v20 = vpop.f32.mrf.mxu1  ;;  %v4367_v14 = vld [vmem:[#allocation6 + $0xfc0] sm:$0xff] }
 0xe73   : > { %v4014_v23 = vadd.f32 %v4013_v11, %v3934_v20  ;;  %v4368_v11 = vld [vmem:[#allocation6 + $0xfc8] sm:$0xff]  ;;  %v7463_v20 = vld [vmem:[#allocation2 + $0x8] sm:$0xff] }
 0xe74   : > { %v3936_v3 = vpop.f32.mrf.mxu1 }
 0xe75   : > { %v4364_v3 = vld [vmem:[#allocation6 + $0xfb0] sm:$0xff] }
 0xe92   : > { %v4118_v25 = vpop.f32.mrf.mxu1 }
 0xe93   : > { %v4127_v24 = vadd.f32 %v4118_v25, %v4009_v22  ;;  %v4394_v25 = vrot.slane %v7463_v20, 1  ;;  %v4384_v22 = vld [vmem:[#allocation6 + $0x1048] sm:$0xff] }
 0xe94   : > { %v4120_v26 = vpop.f32.mrf.mxu1 }
 0xe95   : > { %v7427_v7 = vadd.f32 %v5296_v27, %v4127_v24  ;;  %v7470_v26 = vld [vmem:[#allocation2 + $0x18] sm:$0xff]  ;;  %v4383_v24 = vld [vmem:[#allocation6 + $0x1040] sm:$0xff] }
 0xe96   : > { %v4123_v31 = vpop.f32.mrf.mxu1 }
 0xe97   : > { %v4128_v34 = vadd.f32 %v4123_v31, %v4014_v23  ;;  %v7475_v23 = vrot.slane %v7470_v26, 1  ;;  %v4239_v31 = vld [vmem:[#allocation12 + $0x3] sm:$0x1] }
 0xe98   : > { %v4125_v36 = vpop.f32.mrf.mxu1 }
 0xe99   : > { %v7429_v17 = vadd.f32 %v5296_v27, %v4128_v34  ;;  %v4396_v27 = vsel %vm441_vm3, %v4394_v25, %v7475_v23 }
 0xe9b   : > { %v4139_v8 = vadd.f32 %v7429_v17, %v7427_v7 }
 0xe9d   : > { %v4140_v37 = vrot.slane %v4139_v8, 4 }
 0xe9f   : > { %v4141_v15 = vadd.f32 %v4140_v37, %v4139_v8 }
 0xea1   : > { %v4142_v16 = vrot.slane %v4141_v15, 2 }
 0xea3   : > { %v4143_v18 = vadd.f32 %v4142_v16, %v4141_v15 }
 0xea5   : > { %v4144_v39 = vrot.slane %v4143_v18, 1 }
 0xea7   : > { %v4145_v47 = vadd.f32 %v4144_v39, %v4143_v18 }
 0xea9   : > { %5565 = vmatmul.mubr.f32.vlgmr.msra.gmra.mxu0 %v4145_v47 }
 0xeaa   : > { %4487 = vmatpush1.msra.mxu0 %v4363_v30  ;;  %5317 = vmatprep.mubr.msk.f32.mxu0 %vm371_vm0, %v7463_v20 }
 0xeab   : > { %4488 = vmatprep.subr.mxu0 %v5949_v0 }
 0xeac   : > { %4489 = vmatpush1.msra.mxu0 %v4362_v45  ;;  %v7488_v45 = vld [vmem:[#allocation2 + $0x28] sm:$0x3] }
 0xead   : > { %4490 = vmatprep.subr.mxu0 %v5949_v0 }
 0xeae   : > { %4491 = vmatpush1.msra.mxu0 %v4361_v51  ;;  %v4399_v51 = vrot.slane %v7488_v45, 1 }
 0xeaf   : > { %4492 = vmatprep.subr.mxu0 %v5949_v0 }
 0xeb0   : > { %4493 = vmatpush1.msra.mxu0 %v4360_v13  ;;  %v7505_v13 = vrot.slane %v7470_v26, 2 }
 0xeb1   : > { %4494 = vmatprep.subr.mxu0 %v5949_v0 }
 0xeb2   : > { %4495 = vmatpush1.msra.mxu0 %v4359_v38  ;;  %v4400_v38 = vsel %vm441_vm3, %v7475_v23, %v4399_v51  ;;  %v4727_v51 = vld [vmem:[#allocation6 + $0x1198] sm:$0xff] }
 0xeb3   : > { %4496 = vmatprep.subr.mxu0 %v5949_v0 }
 0xeb4   : > { %4497 = vmatpush1.msra.mxu0 %v4358_v40  ;;  %v4576_v40 = vld [vmem:[#allocation6 + $0x10c0] sm:$0xff] }
 0xeb5   : > { %4498 = vmatprep.subr.mxu0 %v5949_v0 }
 0xeb6   : > { %4499 = vmatpush1.msra.mxu0 %v4357_v49 }
 0xeb7   : > { %4500 = vmatprep.subr.mxu0 %v5949_v0 }
 0xeb8   : > { %4501 = vmatpush1.msra.mxu0 %v4356_v53  ;;  %v4574_v53 = vld [vmem:[#allocation6 + $0x10b0] sm:$0xff] }
 0xeb9   : > { %4502 = vmatprep.subr.mxu0 %v5949_v0 }
 0xeba   : > { %4503 = vmatpush1.msra.mxu0 %v4355_v55  ;;  %v4572_v55 = vld [vmem:[#allocation6 + $0x10a0] sm:$0xff] }
 0xebb   : > { %4504 = vmatprep.subr.mxu0 %v5949_v0 }
 0xebc   : > { %4505 = vmatpush1.msra.mxu0 %v4354_v59  ;;  %v4570_v59 = vld [vmem:[#allocation6 + $0x1090] sm:$0xff] }
 0xebd   : > { %4506 = vmatprep.subr.mxu0 %v5949_v0 }
 0xebe   : > { %4507 = vmatpush1.msra.mxu0 %v4353_v50  ;;  %v4568_v50 = vld [vmem:[#allocation6 + $0x1080] sm:$0xff] }
 0xebf   : > { %4508 = vmatprep.subr.mxu0 %v5949_v0 }
 0xec0   : > { %4509 = vmatpush1.msra.mxu0 %v4352_v63  ;;  %v4566_v63 = vld [vmem:[#allocation6 + $0x1070] sm:$0xff] }
 0xec1   : > { %4510 = vmatprep.subr.mxu0 %v5949_v0 }
 0xec2   : > { %4511 = vmatpush1.msra.mxu0 %v4351_v2  ;;  %v4564_v2 = vld [vmem:[#allocation6 + $0x1060] sm:$0xff] }
 0xec3   : > { %4512 = vmatprep.subr.mxu0 %v5949_v0 }
 0xec4   : > { %4513 = vmatpush1.msra.mxu0 %v4350_v5  ;;  %v4562_v5 = vld [vmem:[#allocation6 + $0x1050] sm:$0xff] }
 0xec5   : > { %4514 = vmatprep.subr.mxu0 %v5949_v0 }
 0xec6   : > { %4515 = vmatpush1.msra.mxu0 %v4349_v9  ;;  %v4588_v9 = vrot.slane %v7488_v45, 2  ;;  %v4728_v45 = vld [vmem:[#allocation6 + $0x11a0] sm:$0xff] }
 0xec7   : > { %4516 = vmatprep.subr.mxu0 %v5949_v0 }
 0xec8   : > { %4517 = vmatpush1.msra.mxu0 %v4348_v10  ;;  %v4578_v10 = vld [vmem:[#allocation6 + $0x10d0] sm:$0xff] }
 0xec9   : > { %4546 = vmatprep.subr.mxu0 %v5949_v0 }
 0xeca   : > { %4547 = vmatpush2.msra.mxu0 %v4365_v12  ;;  %v4589_v12 = vsel %vm631_vm4, %v7505_v13, %v4588_v9 }
 0xecb   : > { %4548 = vmatprep.subr.mxu0 %v5949_v0 }
 0xecc   : > { %4549 = vmatpush2.msra.mxu0 %v4364_v3 }
 0xecd   : > { %4762 = vmatprep.subr.mxu0 %v5949_v0 }
 0xf69   : > { %v4231_v42 = vpop.f32.mrf.mxu0 }
 0xf6a   : > { %v4232_v43 = vadd.f32 %v4231_v42, %v4164_v62 }
 0xf6b   : > { %v5566_v56 = vpop.f32.mrf.mxu0 }
 0xf6c   : > { %v4235_v29 = vmax.f32 %v4232_v43, 0.0 }
 0xf6e   : > { %5570 = vmatmul.mubr.msk.f32.vlgmr.msra.gmra.mxu1 %vm1186_vm7, %v4235_v29 }
 0xf6f   : > { %4408 = vmatpush1.msra.mxu1 %v4382_v46  ;;  %5315 = vmatprep.mubr.msk.f32.mxu1 %vm371_vm0, %v4396_v27 }
 0xf70   : > { %4409 = vmatprep.subr.mxu1 %v5949_v0 }
 0xf71   : > { %4410 = vmatpush1.msra.mxu1 %v4381_v48  ;;  %v4577_v48 = vld [vmem:[#allocation6 + $0x10c8] sm:$0xff] }
 0xf72   : > { %4411 = vmatprep.subr.mxu1 %v5949_v0 }
 0xf73   : > { %4412 = vmatpush1.msra.mxu1 %v4380_v35 }
 0xf74   : > { %4413 = vmatprep.subr.mxu1 %v5949_v0 }
 0xf75   : > { %4414 = vmatpush1.msra.mxu1 %v4379_v41 }
 0xf76   : > { %4415 = vmatprep.subr.mxu1 %v5949_v0 }
 0xf77   : > { %4416 = vmatpush1.msra.mxu1 %v4378_v44  ;;  %v4575_v44 = vld [vmem:[#allocation6 + $0x10b8] sm:$0xff] }
 0xf78   : > { %4417 = vmatprep.subr.mxu1 %v5949_v0 }
 0xf79   : > { %4418 = vmatpush1.msra.mxu1 %v4377_v52 }
 0xf7a   : > { %4419 = vmatprep.subr.mxu1 %v5949_v0 }
 0xf7b   : > { %4420 = vmatpush1.msra.mxu1 %v4376_v54  ;;  %v4573_v54 = vld [vmem:[#allocation6 + $0x10a8] sm:$0xff] }
 0xf7c   : > { %4421 = vmatprep.subr.mxu1 %v5949_v0 }
 0xf7d   : > { %4422 = vmatpush1.msra.mxu1 %v4375_v57  ;;  %v4571_v57 = vld [vmem:[#allocation6 + $0x1098] sm:$0xff] }
 0xf7e   : > { %4423 = vmatprep.subr.mxu1 %v5949_v0 }
 0xf7f   : > { %4424 = vmatpush1.msra.mxu1 %v4374_v60  ;;  %v4569_v60 = vld [vmem:[#allocation6 + $0x1088] sm:$0xff] }
 0xf80   : > { %4425 = vmatprep.subr.mxu1 %v5949_v0 }
 0xf81   : > { %4426 = vmatpush1.msra.mxu1 %v4373_v61  ;;  %v4567_v61 = vld [vmem:[#allocation6 + $0x1078] sm:$0xff] }
 0xf82   : > { %4427 = vmatprep.subr.mxu1 %v5949_v0 }
 0xf83   : > { %4428 = vmatpush1.msra.mxu1 %v4372_v1  ;;  %v4565_v1 = vld [vmem:[#allocation6 + $0x1068] sm:$0xff] }
 0xf84   : > { %4429 = vmatprep.subr.mxu1 %v5949_v0 }
 0xf85   : > { %4430 = vmatpush1.msra.mxu1 %v4371_v4  ;;  %v4563_v4 = vld [vmem:[#allocation6 + $0x1058] sm:$0xff] }
 0xf86   : > { %4431 = vmatprep.subr.mxu1 %v5949_v0 }
 0xf87   : > { %4432 = vmatpush1.msra.mxu1 %v4370_v6  ;;  %v4579_v6 = vld [vmem:[#allocation6 + $0x10d8] sm:$0xff] }
 0xf88   : > { %4433 = vmatprep.subr.mxu1 %v5949_v0 }
 0xf89   : > { %4434 = vmatpush1.msra.mxu1 %v4369_v21 }
 0xf8a   : > { %4435 = vmatprep.subr.mxu1 %v5949_v0 }
 0xf8b   : > { %4436 = vmatpush1.msra.mxu1 %v4368_v11 }
 0xf8c   : > { %4437 = vmatprep.subr.mxu1 %v5949_v0 }
 0xf8d   : > { %4438 = vmatpush1.msra.mxu1 %v4367_v14 }
 0xf8e   : > { %4467 = vmatprep.subr.mxu1 %v5949_v0 }
 0xf8f   : > { %4468 = vmatpush2.msra.mxu1 %v4384_v22  ;;  %v4718_v22 = vld [vmem:[#allocation6 + $0x1158] sm:$0xff] }
 0xf90   : > { %4469 = vmatprep.subr.mxu1 %v5949_v0 }
 0xf91   : > { %4470 = vmatpush2.msra.mxu1 %v4383_v24  ;;  %v4717_v24 = vld [vmem:[#allocation6 + $0x1150] sm:$0xff] }
 0xf92   : > { %4596 = vmatprep.subr.mxu1 %v5949_v0 }
0x102e   : > { %v4312_v34 = vpop.f32.mrf.mxu1 }
0x102f   : > { %v4313_v36 = vadd.f32 %v4312_v34, %v4239_v31  ;;  %v4716_v31 = vld [vmem:[#allocation6 + $0x1148] sm:$0xff]  ;;  %v4736_v34 = vld [vmem:[#allocation6 + $0x11e0] sm:$0xff] }
0x1030   : > { %v5571_v8 = vpop.f32.mrf.mxu1 }
0x1031   : > { %v4316_v37 = vsub.f32 0.0, %v4313_v36  ;;  %v4735_v36 = vld [vmem:[#allocation6 + $0x11d8] sm:$0xff]  ;;  %v4715_v8 = vld [vmem:[#allocation6 + $0x1140] sm:$0xff] }
0x1033   : > { %v4317_v15 = vmul.f32 1.442695, %v4316_v37  ;;  %v4714_v37 = vld [vmem:[#allocation6 + $0x1138] sm:$0xff] }
0x1035   : > { %5691 = vpow2.f32 %v4317_v15  ;;  %v4733_v15 = vld [vmem:[#allocation6 + $0x11c8] sm:$0xff] }
0x1042   : > { %v5692_v16 = vpop.eup %5691 }
0x1043   : > { %v4319_v18 = vadd.f32 1.0, %v5692_v16  ;;  %v4713_v16 = vld [vmem:[#allocation6 + $0x1130] sm:$0xff] }
0x1045   : > { %5693 = vrcp.f32 %v4319_v18  ;;  %v4732_v18 = vld [vmem:[#allocation6 + $0x11c0] sm:$0xff] }
0x1052   : > { %v5694_v39 = vpop.eup %5693 }
0x1053   : > { %v4325_v47 = vrot.slane %v5694_v39, %v6526_v33  ;;  %v4712_v39 = vld [vmem:[#allocation6 + $0x1128] sm:$0xff] }
0x1055   : > { %v4326_v62 = vmul.f32 %v4325_v47, %v7427_v7  ;;  %v4327_v42 = vmul.f32 %v4325_v47, %v7429_v17  ;;  %v4711_v47 = vld [vmem:[#allocation6 + $0x1120] sm:$0xff] }
0x1057   : > { %v4328_v43 = vadd.f32 %v4326_v62, %v7201_v32  ;;  %v4329_v56 = vadd.f32 %v4327_v42, %v7204_v58  ;;  %v4583_v58 = vrot.slane %v7463_v20, 2  ;;  %v4710_v62 = vld [vmem:[#allocation6 + $0x1118] sm:$0xff] }
0x1058   : > { %v4731_v42 = vld [vmem:[#allocation6 + $0x11b8] sm:$0xff] }
0x1059   : > { %v4332_v29 = vrot.slane %v4328_v43, 7  ;;  %v4333_v30 = vrot.slane %v4329_v56, 7  ;;  %v7516_v49 = vsel %vm631_vm4, %v4583_v58, %v7505_v13  ;;  %v4730_v43 = vld [vmem:[#allocation6 + $0x11b0] sm:$0xff]  ;;  %v4704_v58 = vld [vmem:[#allocation6 + $0x10e8] sm:$0xff] }
0x105a   : > { %v4709_v56 = vld [vmem:[#allocation6 + $0x1110] sm:$0xff] }
0x105b   : > { %4338 = vst [vmem:[#allocation2] sm:$0xfe] %v4332_v29  ;;  %4340 = vst [vmem:[#allocation2 + $0x20] sm:$0x1] %v4333_v30  ;;  %v7491_v46 = vsel %vm382_vm2, %v4332_v29, %v4333_v30  ;;  %v4729_v29 = vld [vmem:[#allocation6 + $0x11a8] sm:$0xff] }
0x105c   : > { %v4392_v32 = vrot.slane %v7491_v46, 1  ;;  %v4581_v11 = vrot.slane %v7491_v46, 2  ;;  %v4708_v30 = vld [vmem:[#allocation6 + $0x1108] sm:$0xff] }
0x1062   : > { %v7494_v33 = vld [vmem:[#allocation2] sm:$0xff] }
0x1063   : > { %v7496_v7 = vld [vmem:[#allocation2 + $0x20] sm:$0x3]  ;;  %v4391_v17 = vrot.slane %v7494_v33, 1  ;;  %4551 = vmatmul.mubr.f32.vlgmr.msra.gmra.mxu0 %v7494_v33  ;;  %v4580_v21 = vrot.slane %v7494_v33, 2  ;;  %v4706_v33 = vld [vmem:[#allocation6 + $0x10f8] sm:$0xff] }
0x1064   : > { %5318 = vmatprep.mubr.msk.f32.mxu0 %vm371_vm0, %v7470_v26  ;;  %v4397_v41 = vrot.slane %v7496_v7, 1  ;;  %v4586_v3 = vrot.slane %v7496_v7, 2  ;;  %v4726_v7 = vld [vmem:[#allocation6 + $0x1190] sm:$0xff] }
0x1065   : > { %v4393_v35 = vsel %vm441_vm3, %v4391_v17, %v4392_v32  ;;  %v4582_v14 = vsel %vm631_vm4, %v4580_v21, %v4581_v11  ;;  %v4705_v17 = vld [vmem:[#allocation6 + $0x10f0] sm:$0xff] }
0x1066   : > { %4472 = vmatmul.mubr.f32.vlgmr.msra.gmra.mxu1 %v4393_v35  ;;  %v4398_v52 = vsel %vm441_vm3, %v4392_v32, %v4397_v41  ;;  %v4587_v25 = vsel %vm631_vm4, %v4581_v11, %v4586_v3  ;;  %v4725_v32 = vld [vmem:[#allocation6 + $0x1188] sm:$0xff]  ;;  %v4703_v35 = vld [vmem:[#allocation6 + $0x10e0] sm:$0xff] }
0x1067   : > { %4556 = vmatmul.mubr.f32.gmra.mxu0 %v7491_v46  ;;  %4597 = vmatpush1.msra.mxu1 %v4577_v48  ;;  %v4707_v46 = vld [vmem:[#allocation6 + $0x1100] sm:$0xff]  ;;  %v4720_v41 = vld [vmem:[#allocation6 + $0x1168] sm:$0xff] }
0x1068   : > { %4598 = vmatprep.subr.mxu1 %v5949_v0  ;;  %5316 = vmatprep.mubr.msk.f32.mxu1 %vm371_vm0, %v4400_v38  ;;  %v4724_v48 = vld [vmem:[#allocation6 + $0x1180] sm:$0xff]  ;;  %v4723_v38 = vld [vmem:[#allocation6 + $0x1178] sm:$0xff] }
0x1069   : > { %4599 = vmatpush1.msra.mxu1 %v4576_v40  ;;  %5322 = vmatprep.mubr.msk.f32.mxu0 %vm371_vm0, %v4396_v27  ;;  %v4737_v27 = vld [vmem:[#allocation6 + $0x11e8] sm:$0xff]  ;;  %v4722_v40 = vld [vmem:[#allocation6 + $0x1170] sm:$0xff] }
0x106a   : > { %4600 = vmatprep.subr.mxu1 %v5949_v0  ;;  %4477 = vmatmul.mubr.f32.gmra.mxu1 %v4398_v52  ;;  %v4739_v52 = vld [vmem:[#allocation6 + $0x11f8] sm:$0xff] }
0x106b   : > { %4601 = vmatpush1.msra.mxu1 %v4575_v44  ;;  %5319 = vmatprep.mubr.msk.f32.mxu1 %vm371_vm0, %v7516_v49  ;;  %v4719_v44 = vld [vmem:[#allocation6 + $0x1160] sm:$0xff] }
0x106c   : > { %4602 = vmatprep.subr.mxu1 %v5949_v0  ;;  %4763 = vmatpush1.msra.mxu0 %v4737_v27  ;;  %v7587_v27 = vld [vmem:[#allocation2 + $0x28] sm:$0x3] }
0x106d   : > { %4603 = vmatpush1.msra.mxu1 %v4574_v53  ;;  %4764 = vmatprep.subr.mxu0 %v5949_v0  ;;  %v4738_v53 = vld [vmem:[#allocation6 + $0x11f0] sm:$0xff] }
0x106e   : > { %4604 = vmatprep.subr.mxu1 %v5949_v0  ;;  %4765 = vmatpush1.msra.mxu0 %v4736_v34  ;;  %v4754_v34 = vrot.slane %v7587_v27, 1 }
0x106f   : > { %4605 = vmatpush1.msra.mxu1 %v4573_v54  ;;  %4766 = vmatprep.subr.mxu0 %v5949_v0 }
0x1070   : > { %4606 = vmatprep.subr.mxu1 %v5949_v0  ;;  %4767 = vmatpush1.msra.mxu0 %v4735_v36 }
0x1071   : > { %4607 = vmatpush1.msra.mxu1 %v4572_v55  ;;  %4768 = vmatprep.subr.mxu0 %v5949_v0 }
0x1072   : > { %4608 = vmatprep.subr.mxu1 %v5949_v0 }
0x1073   : > { %4609 = vmatpush1.msra.mxu1 %v4571_v57 }
0x1074   : > { %4610 = vmatprep.subr.mxu1 %v5949_v0 }
0x1075   : > { %4611 = vmatpush1.msra.mxu1 %v4570_v59 }
0x1076   : > { %4612 = vmatprep.subr.mxu1 %v5949_v0 }
0x1077   : > { %4613 = vmatpush1.msra.mxu1 %v4569_v60 }
0x1078   : > { %4614 = vmatprep.subr.mxu1 %v5949_v0 }
0x1079   : > { %4615 = vmatpush1.msra.mxu1 %v4568_v50 }
0x107a   : > { %4616 = vmatprep.subr.mxu1 %v5949_v0 }
0x107b   : > { %4617 = vmatpush1.msra.mxu1 %v4567_v61 }
0x107c   : > { %4618 = vmatprep.subr.mxu1 %v5949_v0 }
0x107d   : > { %4619 = vmatpush1.msra.mxu1 %v4566_v63 }
0x107e   : > { %4620 = vmatprep.subr.mxu1 %v5949_v0 }
0x107f   : > { %4621 = vmatpush1.msra.mxu1 %v4565_v1 }
0x1080   : > { %4622 = vmatprep.subr.mxu1 %v5949_v0 }
0x1081   : > { %4623 = vmatpush1.msra.mxu1 %v4564_v2 }
0x1082   : > { %4624 = vmatprep.subr.mxu1 %v5949_v0 }
0x1083   : > { %4625 = vmatpush1.msra.mxu1 %v4563_v4  ;;  %v5321_v4 = vld [vmem:[#allocation8 + $0x9] ss:$0 sm:$0xff] }
0x1084   : > { %4626 = vmatprep.subr.mxu1 %v5949_v0 }
0x1085   : > { %4627 = vmatpush1.msra.mxu1 %v4562_v5 }
0x1086   : > { %4656 = vmatprep.subr.mxu1 %v5949_v0 }
0x1087   : > { %4657 = vmatpush2.msra.mxu1 %v4579_v6 }
0x1088   : > { %4658 = vmatprep.subr.mxu1 %v5949_v0 }
0x1089   : > { %4659 = vmatpush2.msra.mxu1 %v4578_v10 }
0x108a   : > { %4661 = vmatmul.mubr.f32.vlgmr.msra.gmra.mxu1 %v4582_v14  ;;  %4841 = vmatprep.subr.mxu1 %v5949_v0 }
0x108b   : > { %5320 = vmatprep.mubr.msk.f32.mxu1 %vm371_vm0, %v4589_v12  ;;  %4842 = vmatpush1.msra.mxu1 %v4718_v22 }
0x108c   : > { %4843 = vmatprep.subr.mxu1 %v5949_v0 }
0x108d   : > { %4844 = vmatpush1.msra.mxu1 %v4717_v24 }
0x108e   : > { %4666 = vmatmul.mubr.f32.gmra.mxu1 %v4587_v25  ;;  %4845 = vmatprep.subr.mxu1 %v5949_v0 }
0x108f   : > { %5324 = vmatprep.mubr.msk.f32.mxu1 %vm371_vm0, %v7463_v20  ;;  %4846 = vmatpush1.msra.mxu1 %v4716_v31  ;;  %v4734_v20 = vld [vmem:[#allocation6 + $0x11d0] sm:$0xff] }
0x1090   : > { %4847 = vmatprep.subr.mxu1 %v5949_v0  ;;  %4769 = vmatpush1.msra.mxu0 %v4734_v20 }
0x1091   : > { %4848 = vmatpush1.msra.mxu1 %v4715_v8  ;;  %4770 = vmatprep.subr.mxu0 %v5949_v0 }
0x1092   : > { %4849 = vmatprep.subr.mxu1 %v5949_v0  ;;  %4771 = vmatpush1.msra.mxu0 %v4733_v15  ;;  %v4931_v15 = vld [vmem:[#allocation6 + $0x1270] sm:$0xff] }
0x1093   : > { %4850 = vmatpush1.msra.mxu1 %v4714_v37  ;;  %4772 = vmatprep.subr.mxu0 %v5949_v0  ;;  %v4755_v37 = vsel %vm441_vm3, %v7475_v23, %v4754_v34  ;;  %v4929_v23 = vld [vmem:[#allocation6 + $0x1260] sm:$0xff] }
0x1094   : > { %4851 = vmatprep.subr.mxu1 %v5949_v0  ;;  %4773 = vmatpush1.msra.mxu0 %v4732_v18 }
0x1095   : > { %4852 = vmatpush1.msra.mxu1 %v4713_v16  ;;  %4774 = vmatprep.subr.mxu0 %v5949_v0 }
0x1096   : > { %4853 = vmatprep.subr.mxu1 %v5949_v0  ;;  %4775 = vmatpush1.msra.mxu0 %v4731_v42  ;;  %v4926_v42 = vld [vmem:[#allocation6 + $0x1248] sm:$0xff] }
0x1097   : > { %4854 = vmatpush1.msra.mxu1 %v4712_v39  ;;  %4776 = vmatprep.subr.mxu0 %v5949_v0 }
0x1098   : > { %4855 = vmatprep.subr.mxu1 %v5949_v0  ;;  %4777 = vmatpush1.msra.mxu0 %v4730_v43  ;;  %v4925_v43 = vld [vmem:[#allocation6 + $0x1240] sm:$0xff] }
0x1099   : > { %4856 = vmatpush1.msra.mxu1 %v4711_v47  ;;  %4778 = vmatprep.subr.mxu0 %v5949_v0  ;;  %v4928_v47 = vld [vmem:[#allocation6 + $0x1258] sm:$0xff] }
0x109a   : > { %4857 = vmatprep.subr.mxu1 %v5949_v0  ;;  %4779 = vmatpush1.msra.mxu0 %v4729_v29  ;;  %v4922_v29 = vld [vmem:[#allocation6 + $0x1228] sm:$0xff] }
0x109b   : > { %4858 = vmatpush1.msra.mxu1 %v4710_v62  ;;  %4780 = vmatprep.subr.mxu0 %v5949_v0  ;;  %v4927_v62 = vld [vmem:[#allocation6 + $0x1250] sm:$0xff] }
0x109c   : > { %4859 = vmatprep.subr.mxu1 %v5949_v0  ;;  %4781 = vmatpush1.msra.mxu0 %v4728_v45  ;;  %v4920_v45 = vld [vmem:[#allocation6 + $0x1218] sm:$0xff] }
0x109d   : > { %4860 = vmatpush1.msra.mxu1 %v4709_v56  ;;  %4782 = vmatprep.subr.mxu0 %v5949_v0  ;;  %v4924_v56 = vld [vmem:[#allocation6 + $0x1238] sm:$0xff] }
0x109e   : > { %4861 = vmatprep.subr.mxu1 %v5949_v0  ;;  %4783 = vmatpush1.msra.mxu0 %v4727_v51  ;;  %v4918_v51 = vld [vmem:[#allocation6 + $0x1208] sm:$0xff] }
0x109f   : > { %4862 = vmatpush1.msra.mxu1 %v4708_v30  ;;  %4784 = vmatprep.subr.mxu0 %v5949_v0  ;;  %v4921_v30 = vld [vmem:[#allocation6 + $0x1220] sm:$0xff] }
0x10a0   : > { %4863 = vmatprep.subr.mxu1 %v5949_v0  ;;  %4785 = vmatpush1.msra.mxu0 %v4726_v7  ;;  %v4934_v7 = vld [vmem:[#allocation6 + $0x1288] sm:$0xff] }
0x10a1   : > { %4864 = vmatpush1.msra.mxu1 %v4707_v46  ;;  %4786 = vmatprep.subr.mxu0 %v5949_v0  ;;  %v4919_v46 = vld [vmem:[#allocation6 + $0x1210] sm:$0xff] }
0x10a2   : > { %4865 = vmatprep.subr.mxu1 %v5949_v0  ;;  %4787 = vmatpush1.msra.mxu0 %v4725_v32 }
0x10a3   : > { %4866 = vmatpush1.msra.mxu1 %v4706_v33  ;;  %4788 = vmatprep.subr.mxu0 %v5949_v0  ;;  %v4917_v33 = vld [vmem:[#allocation6 + $0x1200] sm:$0xff] }
0x10a4   : > { %4867 = vmatprep.subr.mxu1 %v5949_v0  ;;  %4789 = vmatpush1.msra.mxu0 %v4724_v48 }
0x10a5   : > { %4868 = vmatpush1.msra.mxu1 %v4705_v17  ;;  %4790 = vmatprep.subr.mxu0 %v5949_v0  ;;  %v4943_v17 = vrot.slane %v7587_v27, 2 }
0x10a6   : > { %4869 = vmatprep.subr.mxu1 %v5949_v0  ;;  %4791 = vmatpush1.msra.mxu0 %v4723_v38 }
0x10a7   : > { %4870 = vmatpush1.msra.mxu1 %v4704_v58  ;;  %4792 = vmatprep.subr.mxu0 %v5949_v0  ;;  %v4933_v58 = vld [vmem:[#allocation6 + $0x1280] sm:$0xff] }
0x10a8   : > { %4871 = vmatprep.subr.mxu1 %v5949_v0  ;;  %4793 = vmatpush1.msra.mxu0 %v4722_v40 }
0x10a9   : > { %4872 = vmatpush1.msra.mxu1 %v4703_v35  ;;  %4822 = vmatprep.subr.mxu0 %v5949_v0  ;;  %v4944_v35 = vsel %vm631_vm4, %v7505_v13, %v4943_v17 }
0x10aa   : > { %4901 = vmatprep.subr.mxu1 %v5949_v0  ;;  %4823 = vmatpush2.msra.mxu0 %v4739_v52 }
0x10ab   : > { %4902 = vmatpush2.msra.mxu1 %v4720_v41  ;;  %4824 = vmatprep.subr.mxu0 %v5949_v0 }
0x10ac   : > { %4903 = vmatprep.subr.mxu1 %v5949_v0  ;;  %4825 = vmatpush2.msra.mxu0 %v4738_v53 }
0x10ad   : > { %4904 = vmatpush2.msra.mxu1 %v4719_v44  ;;  %4951 = vmatprep.subr.mxu0 %v5949_v0 }
0x1123   : > { %v4552_v54 = vpop.f32.mrf.mxu0 }
0x1125   : > { %v4554_v55 = vpop.f32.mrf.mxu0 }
0x1126   : > { %v4473_v57 = vpop.f32.mrf.mxu1 }
0x1127   : > { %v4557_v59 = vpop.f32.mrf.mxu0  ;;  %v4553_v1 = vadd.f32 %v4552_v54, %v4473_v57 }
0x1128   : > { %v4475_v60 = vpop.f32.mrf.mxu1 }
0x1129   : > { %v4559_v50 = vpop.f32.mrf.mxu0 }
0x112a   : > { %v4478_v61 = vpop.f32.mrf.mxu1  ;;  %v5328_v50 = vld [vmem:[#allocation8 + $0xa] ss:$0 sm:$0xff] }
0x112b   : > { %v4558_v9 = vadd.f32 %v4557_v59, %v4478_v61 }
0x112c   : > { %v4480_v63 = vpop.f32.mrf.mxu1 }
0x114a   : > { %v4662_v2 = vpop.f32.mrf.mxu1 }
0x114b   : > { %v4671_v5 = vadd.f32 %v4662_v2, %v4553_v1 }
0x114c   : > { %v4664_v6 = vpop.f32.mrf.mxu1 }
0x114d   : > { %v4681_v21 = vadd.f32 %v5321_v4, %v4671_v5  ;;  %v5699_v5 = vld [vmem:[%s6173_s9] sm:$0xff] }
0x114e   : > { %v4667_v10 = vpop.f32.mrf.mxu1 }
0x114f   : > { %v4683_v11 = vadd.f32 %v4681_v21, %v6922_v19  ;;  %v4672_v12 = vadd.f32 %v4667_v10, %v4558_v9 }
0x1150   : > { %v4669_v14 = vpop.f32.mrf.mxu1 }
0x1151   : > { %v4687_v3 = vrot.slane %v4683_v11, 7  ;;  %v4682_v25 = vadd.f32 %v5321_v4, %v4672_v12  ;;  %v5700_v11 = vld [vmem:[%s6173_s9 + $0x8] sm:$0xff] }
0x1153   : > { %4693 = vst [vmem:[#allocation2] sm:$0xfe] %v4687_v3  ;;  %v4684_v22 = vadd.f32 %v4682_v25, %v6926_v28  ;;  %v4932_v28 = vld [vmem:[#allocation6 + $0x1278] sm:$0xff] }
0x1155   : > { %v4688_v24 = vrot.slane %v4684_v22, 7 }
0x1157   : > { %v7590_v31 = vsel %vm382_vm2, %v4687_v3, %v4688_v24  ;;  %4695 = vst [vmem:[#allocation2 + $0x20] sm:$0x1] %v4688_v24 }
0x1158   : > { %v4747_v8 = vrot.slane %v7590_v31, 1  ;;  %v4936_v48 = vrot.slane %v7590_v31, 2 }
0x115a   : > { %v7593_v36 = vld [vmem:[#allocation2] sm:$0xff] }
0x115b   : > { %v4746_v19 = vrot.slane %v7593_v36, 1  ;;  %4906 = vmatmul.mubr.f32.vlgmr.msra.gmra.mxu1 %v7593_v36  ;;  %v4935_v32 = vrot.slane %v7593_v36, 2 }
0x115c   : > { %5325 = vmatprep.mubr.msk.f32.mxu1 %vm371_vm0, %v7470_v26  ;;  %v4930_v26 = vld [vmem:[#allocation6 + $0x1268] sm:$0xff] }
0x115d   : > { %v4748_v20 = vsel %vm441_vm3, %v4746_v19, %v4747_v8  ;;  %v4937_v38 = vsel %vm631_vm4, %v4935_v32, %v4936_v48 }
0x115e   : > { %4827 = vmatmul.mubr.f32.vlgmr.msra.gmra.mxu0 %v4748_v20  ;;  %v7603_v16 = vld [vmem:[#allocation2 + $0x20] sm:$0x3] }
0x115f   : > { %4911 = vmatmul.mubr.f32.gmra.mxu1 %v7590_v31  ;;  %4952 = vmatpush1.msra.mxu0 %v4932_v28  ;;  %v4752_v18 = vrot.slane %v7603_v16, 1  ;;  %v4941_v41 = vrot.slane %v7603_v16, 2 }
0x1160   : > { %4953 = vmatprep.subr.mxu0 %v5949_v0  ;;  %5323 = vmatprep.mubr.msk.f32.mxu0 %vm371_vm0, %v4755_v37 }
0x1161   : > { %4954 = vmatpush1.msra.mxu0 %v4931_v15  ;;  %v4753_v39 = vsel %vm441_vm3, %v4747_v8, %v4752_v18  ;;  %v4942_v40 = vsel %vm631_vm4, %v4936_v48, %v4941_v41 }
0x1162   : > { %4955 = vmatprep.subr.mxu0 %v5949_v0  ;;  %4832 = vmatmul.mubr.f32.gmra.mxu0 %v4753_v39 }
0x1163   : > { %4956 = vmatpush1.msra.mxu0 %v4930_v26  ;;  %5326 = vmatprep.mubr.msk.f32.mxu0 %vm371_vm0, %v7516_v49  ;;  %v4923_v49 = vld [vmem:[#allocation6 + $0x1230] sm:$0xff] }
0x1164   : > { %4957 = vmatprep.subr.mxu0 %v5949_v0 }
0x1165   : > { %4958 = vmatpush1.msra.mxu0 %v4929_v23 }
0x1166   : > { %4959 = vmatprep.subr.mxu0 %v5949_v0 }
0x1167   : > { %4960 = vmatpush1.msra.mxu0 %v4928_v47 }
0x1168   : > { %4961 = vmatprep.subr.mxu0 %v5949_v0 }
0x1169   : > { %4962 = vmatpush1.msra.mxu0 %v4927_v62 }
0x116a   : > { %4963 = vmatprep.subr.mxu0 %v5949_v0 }
0x116b   : > { %4964 = vmatpush1.msra.mxu0 %v4926_v42 }
0x116c   : > { %4965 = vmatprep.subr.mxu0 %v5949_v0 }
0x116d   : > { %4966 = vmatpush1.msra.mxu0 %v4925_v43 }
0x116e   : > { %4967 = vmatprep.subr.mxu0 %v5949_v0 }
0x116f   : > { %4968 = vmatpush1.msra.mxu0 %v4924_v56 }
0x1170   : > { %4969 = vmatprep.subr.mxu0 %v5949_v0 }
0x1171   : > { %4970 = vmatpush1.msra.mxu0 %v4923_v49 }
0x1172   : > { %4971 = vmatprep.subr.mxu0 %v5949_v0 }
0x1173   : > { %4972 = vmatpush1.msra.mxu0 %v4922_v29 }
0x1174   : > { %4973 = vmatprep.subr.mxu0 %v5949_v0 }
0x1175   : > { %4974 = vmatpush1.msra.mxu0 %v4921_v30 }
0x1176   : > { %4975 = vmatprep.subr.mxu0 %v5949_v0 }
0x1177   : > { %4976 = vmatpush1.msra.mxu0 %v4920_v45 }
0x1178   : > { %4977 = vmatprep.subr.mxu0 %v5949_v0 }
0x1179   : > { %4978 = vmatpush1.msra.mxu0 %v4919_v46 }
0x117a   : > { %4979 = vmatprep.subr.mxu0 %v5949_v0 }
0x117b   : > { %4980 = vmatpush1.msra.mxu0 %v4918_v51 }
0x117c   : > { %4981 = vmatprep.subr.mxu0 %v5949_v0 }
0x117d   : > { %4982 = vmatpush1.msra.mxu0 %v4917_v33 }
0x117e   : > { %5011 = vmatprep.subr.mxu0 %v5949_v0 }
0x117f   : > { %5012 = vmatpush2.msra.mxu0 %v4934_v7 }
0x1180   : > { %5013 = vmatprep.subr.mxu0 %v5949_v0 }
0x1181   : > { %5014 = vmatpush2.msra.mxu0 %v4933_v58 }
0x1182   : > { %5016 = vmatmul.mubr.f32.vlgmr.msra.gmra.mxu0 %v4937_v38 }
0x1183   : > { %5327 = vmatprep.mubr.msk.f32.mxu0 %vm371_vm0, %v4944_v35 }
0x1186   : > { %5021 = vmatmul.mubr.f32.gmra.mxu0 %v4942_v40 }
0x121b   : > { %v4907_v44 = vpop.f32.mrf.mxu1 }
0x121d   : > { %v4909_v52 = vpop.f32.mrf.mxu1 }
0x121e   : > { %v4828_v53 = vpop.f32.mrf.mxu0 }
0x121f   : > { %v4912_v0 = vpop.f32.mrf.mxu1  ;;  %v4908_v59 = vadd.f32 %v4907_v44, %v4828_v53 }
0x1220   : > { %v4830_v54 = vpop.f32.mrf.mxu0 }
0x1221   : > { %v4914_v55 = vpop.f32.mrf.mxu1 }
0x1222   : > { %v4833_v13 = vpop.f32.mrf.mxu0 }
0x1223   : > { %v4913_v1 = vadd.f32 %v4912_v0, %v4833_v13 }
0x1224   : > { %v4835_v57 = vpop.f32.mrf.mxu0 }
0x1242   : > { %v5017_v60 = vpop.f32.mrf.mxu0 }
0x1243   : > { %v5026_v61 = vadd.f32 %v5017_v60, %v4908_v59 }
0x1244   : > { %v5019_v63 = vpop.f32.mrf.mxu0 }
0x1245   : > { %v5036_v2 = vadd.f32 %v5328_v50, %v5026_v61 }
0x1246   : > { %v5022_v4 = vpop.f32.mrf.mxu0 }
0x1247   : > { %v5038_v6 = vadd.f32 %v5699_v5, %v5036_v2  ;;  %v5027_v9 = vadd.f32 %v5022_v4, %v4913_v1 }
0x1248   : > { %v5024_v21 = vpop.f32.mrf.mxu0 }
0x1249   : > { %5040 = vst [vmem:[%s369_s29] sm:$0xff] %v5038_v6  ;;  %v5037_v10 = vadd.f32 %v5328_v50, %v5027_v9 }
0x124b   : > { %v5039_v12 = vadd.f32 %v5700_v11, %v5037_v10 }
0x124d   : > { %5041 = vst [vmem:[%s369_s29 + $0x8] sm:$0xff] %v5039_v12 }
0x124e   : > { %5872 = shalt.err (!%p5869_p3)
}
0x124f   : > { %s5873_s9 = scalar_lea.hbm %s7646_s23, 256  ;;  %s5877_s22 = scalar_lea.hbm %s7697_s7, 512 }
0x1250   : > { %p5874_p4 = scmp.ne.s32.totalorder %s7646_s23, %s5873_s9  ;;  %p5878_p2 = scmp.lt.s32.totalorder %s7646_s23, %s7697_s7 }
0x1251   : > { %p5879_p7 = scmp.lt.s32.totalorder %s5877_s22, %s5873_s9 }
0x1252   : > { %p5875_p12 = pnand %p5874_p4, %p7723_p11 }
0x1253   : > { %p5880_p8 = por %p5879_p7, %p5878_p2 }
0x1254   : > { %p5876_p6 = pneg %p5875_p12 }
0x1256   : > { %p5881_p10 = pnand %p5880_p8, %p5876_p6 }
0x1258   : > { %5884 = shalt.err (!%p5881_p10)
}
0x1259   : > { %s5952_s13 = smov 128   ;;  %s5953_s8 = smov 8  }
0x125a   : > { %5594 = dma.vmem_to_hbm [thread:$0]  (%p7723_p11), %s7641_s16, 256, %s7646_s23, %s5043_s1, %s5952_s13, %s5952_s13, %s5953_s8  }
0x125b PF: > { %s5071_s15 = sand.u32 1, %s5923_s24   ;;  %p7724_p13 = scmp.ne.s32.totalorder %s7711_s28, 0 }
0x125c   : > { %p7725_p0 = scmp.ge.s32.totalorder %s5935_s27, 2  ;;  %s5072_s30 = scalar_lea.sflag [#allocation5], %s5071_s15 }
0x125e   : > { %p5617_p5 = pnand %p7725_p0, %p7724_p13 }
0x1260   : > { %p5618_p9 = pneg %p5617_p5 }
0x1262   : > { %5918 = dma.done.wait (%p5618_p9), %s5072_s30, 256  }
0x1263   : > { %5920 = vsyncadd (%p5618_p9), %s5072_s30, 4294967040  ;;  %p23_p1 = scmp.ge.s32.totalorder %s6098_s14, 4   ;;  %s7726_s24 = smov %s5927_s25 }
0x1264   : > { %s7727_s25 = smov %s5931_s26  ;;  %s7728_s26 = smov %s6110_s20 }
0x1265   : > { %s7729_s27 = smov %s6098_s14  ;;  %25 = sbr.rel (!%p23_p1) target bundleno = 10 (0xa), region = 167 }
0x126a   :  { %5077 = vsyncpa [#allocation4], 1 }
0x126b   :  { %5079 = vsyncpa [#allocation4 + $0x1], 1 }
0x126c   :  { %5080 = vsyncpa [#allocation7], 1 }
0x126d   :  { %5081 = vsyncpa [#allocation10], 1 }
0x126e   :  { %5082 = vsyncpa [#allocation13], 1 }
0x126f   :  { %5083 = vsyncpa [#allocation5], 1 }
0x1270   :  { %5085 = vsyncpa [#allocation5 + $0x1], 1 }

</bundles_post_ra>
